<compile_context>
chip_gen: v5e
topology: v5e:2x2
jax: 0.10.0
libtpu: 0.0.40
codegen_flags: <defaults>
</compile_context>

<pallas_src>
import jax
import jax.numpy as jnp
import numpy as np
from jax import lax
from jax.experimental import pallas as pl
from jax.experimental.pallas import tpu as pltpu

BN_EPS = 1e-5


# ---------------------------------------------------------------------------
# Pallas kernel: one batch tile through the full MLP hot path.
# ---------------------------------------------------------------------------
def mine_mlp_kernel(x_ref,
                    w1_ref, c1_ref,
                    w2_ref, c2_ref,
                    w3_ref, c3_ref,
                    wo_ref, bo_ref,
                    out_ref):
    def hidden(h_bf16, w_ref, c_ref):
        # Linear bias + BatchNorm1d(eval) are pre-folded into w_ref / c_ref.
        z = jnp.dot(h_bf16, w_ref[...], preferred_element_type=jnp.float32)
        return jnp.maximum(z + c_ref[...], 0.0)  # elementwise kept in f32 (v5e-safe)

    h = hidden(x_ref[...], w1_ref, c1_ref)                 # x tile is already bf16
    h = hidden(h.astype(jnp.bfloat16), w2_ref, c2_ref)
    h = hidden(h.astype(jnp.bfloat16), w3_ref, c3_ref)

    # Final projection as wo[1,H] (x) h[TN,H] contracting H -> [1, TN]: the result
    # lands lane-dense (batch on the lane axis), so the HBM writeback is 4 B/row
    # and there are no masked 1-lane stores.
    out = lax.dot_general(wo_ref[...], h,
                          dimension_numbers=(((1,), (1,)), ((), ())),
                          preferred_element_type=jnp.float32)
    out_ref[...] = out + bo_ref[...]


# ---------------------------------------------------------------------------
# Tile selection: big tiles, multiple of 128, even tile count (>= 2) when possible
# so v7x's two TensorCores split the "parallel" grid axis evenly.
# ---------------------------------------------------------------------------
def _round_up(x, m):
    return ((x + m - 1) // m) * m


def choose_tile_n(n, max_tile=1024):
    if n <= 128:
        return 128
    if n <= 2 * max_tile:
        return _round_up(pl.cdiv(n, 2), 128)       # exactly 2 tiles
    tile = max_tile
    n_tiles = pl.cdiv(n, tile)
    if n_tiles % 2 == 1:
        tile = _round_up(pl.cdiv(n, n_tiles + 1), 128)  # shrink tile -> even count
    return tile


# ---------------------------------------------------------------------------
# pallas_call wrapper: batch grid, weights resident across grid steps.
# ---------------------------------------------------------------------------
def mine_mlp_pallas(combined_bf16, prep, *, tile_n=None):
    """combined_bf16: [N, K] bf16 MLP input (K = mlp_input_dim).  Returns [N, 1] f32."""
    N, K = combined_bf16.shape
    if tile_n is None:
        tile_n = choose_tile_n(N)
    n_tiles = pl.cdiv(N, tile_n)
    n_pad = n_tiles * tile_n
    if n_pad != N:
        combined_bf16 = jnp.pad(combined_bf16, ((0, n_pad - N), (0, 0)))

    w1, c1 = prep["w1"], prep["c1"]
    w2, c2 = prep["w2"], prep["c2"]
    w3, c3 = prep["w3"], prep["c3"]
    wo, bo = prep["wo"], prep["bo"]

    const = lambda i: (0, 0)  # weights: same block every step -> fetched once

    out = pl.pallas_call(
        mine_mlp_kernel,
        out_shape=jax.ShapeDtypeStruct((1, n_pad), jnp.float32),
        grid=(n_tiles,),
        in_specs=[
            pl.BlockSpec((tile_n, K), lambda i: (i, 0)),
            pl.BlockSpec(w1.shape, const), pl.BlockSpec(c1.shape, const),
            pl.BlockSpec(w2.shape, const), pl.BlockSpec(c2.shape, const),
            pl.BlockSpec(w3.shape, const), pl.BlockSpec(c3.shape, const),
            pl.BlockSpec(wo.shape, const), pl.BlockSpec(bo.shape, const),
        ],
        out_specs=pl.BlockSpec((1, tile_n), lambda i: (0, i)),
        compiler_params=pltpu.CompilerParams(
            dimension_semantics=("parallel",)),
    )(combined_bf16, w1, c1, w2, c2, w3, c3, wo, bo)

    return out[0, :N].reshape(N, 1)


# ---------------------------------------------------------------------------
# Parameter init (module-style, mirrors the PyTorch __init__ shapes)
# ---------------------------------------------------------------------------
def init_params(key, x_vocab, x_emb_dim, y_vocab, y_emb_dim,
                hidden_dims, context_frames):
    keys = jax.random.split(key, 4 + 2 * len(hidden_dims))
    ki = iter(keys)

    params = {}
    # nn.Embedding default init: N(0, 1)
    params["x_embedding"] = jax.random.normal(next(ki), (x_vocab, x_emb_dim), jnp.float32)
    params["y_embedding"] = jax.random.normal(next(ki), (y_vocab, y_emb_dim), jnp.float32)

    mlp_in = x_emb_dim * context_frames + y_emb_dim * context_frames
    dims = [mlp_in] + list(hidden_dims)
    for i in range(len(hidden_dims)):
        din, dout = dims[i], dims[i + 1]
        bound = 1.0 / np.sqrt(din)
        # Linear weight stored as [in, out] (transpose of torch's [out, in])
        params[f"w{i+1}"] = jax.random.uniform(next(ki), (din, dout), jnp.float32,
                                               -bound, bound)
        params[f"b{i+1}"] = jax.random.uniform(next(ki), (1, dout), jnp.float32,
                                               -bound, bound)
        # BatchNorm1d fresh state
        params[f"gamma{i+1}"] = jnp.ones((1, dout), jnp.float32)
        params[f"beta{i+1}"] = jnp.zeros((1, dout), jnp.float32)
        params[f"mean{i+1}"] = jnp.zeros((1, dout), jnp.float32)
        params[f"var{i+1}"] = jnp.ones((1, dout), jnp.float32)

    # output layer: normal(std=0.01) weight, zero bias
    params["wo"] = 0.01 * jax.random.normal(next(ki), (hidden_dims[-1], 1), jnp.float32)
    params["bo"] = jnp.zeros((1, 1), jnp.float32)
    return params


def prepare_params(params, hidden_dims, bn_eps=BN_EPS):
    """Fold Linear bias + eval-mode BN into weights/shifts, cast matmul weights to bf16."""
    prep = {}
    for i in range(1, len(hidden_dims) + 1):
        w = params[f"w{i}"]
        b = params[f"b{i}"]
        scale = params[f"gamma{i}"] / jnp.sqrt(params[f"var{i}"] + bn_eps)
        shift = params[f"beta{i}"] - params[f"mean{i}"] * scale
        prep[f"w{i}"] = (w * scale).astype(jnp.bfloat16)       # BN scale folded in
        prep[f"c{i}"] = (b * scale + shift).astype(jnp.float32)  # bias + BN shift
    prep["wo"] = params["wo"].reshape(1, -1).astype(jnp.float32)  # [1, H_last]
    prep["bo"] = params["bo"].reshape(1, 1).astype(jnp.float32)
    return prep


# ---------------------------------------------------------------------------
# Full forward: embedding lookup + concat (XLA glue) -> Pallas MLP kernel
# ---------------------------------------------------------------------------
def mine_index_index_forward(x_idx, y_idx, params, prep, *, tile_n=None):
    """x_idx, y_idx: int32 [N, context_frames] (the 2D index path of the module)."""
    N, _ = x_idx.shape
    x_emb = params["x_embedding"][x_idx].reshape(N, -1)
    y_emb = params["y_embedding"][y_idx].reshape(N, -1)
    combined = jnp.concatenate([x_emb, y_emb], axis=1)   # [N, mlp_input_dim]
    return mine_mlp_pallas(combined.astype(jnp.bfloat16), prep, tile_n=tile_n)


# ---------------------------------------------------------------------------
# References
# ---------------------------------------------------------------------------
def reference_forward_matched(x_idx, y_idx, params, prep, hidden_dims):
    """Pure-JAX reference using the same folded bf16 weights / f32 accumulation."""
    N, _ = x_idx.shape
    x_emb = params["x_embedding"][x_idx].reshape(N, -1)
    y_emb = params["y_embedding"][y_idx].reshape(N, -1)
    h32 = jnp.concatenate([x_emb, y_emb], axis=1)
    hb = h32.astype(jnp.bfloat16)
    for i in range(1, len(hidden_dims) + 1):
        z = jnp.dot(hb, prep[f"w{i}"], preferred_element_type=jnp.float32) + prep[f"c{i}"]
        h32 = jnp.maximum(z, 0.0)
        hb = h32.astype(jnp.bfloat16)
    return jnp.sum(h32 * prep["wo"], axis=-1, keepdims=True) + prep["bo"]


def reference_forward_f32(x_idx, y_idx, params, hidden_dims, bn_eps=BN_EPS):
    """Full-f32, unfolded eval-mode reference (Linear -> BN -> ReLU) x3 -> Linear."""
    N, _ = x_idx.shape
    x_emb = params["x_embedding"][x_idx].reshape(N, -1)
    y_emb = params["y_embedding"][y_idx].reshape(N, -1)
    h = jnp.concatenate([x_emb, y_emb], axis=1)
    for i in range(1, len(hidden_dims) + 1):
        z = h @ params[f"w{i}"] + params[f"b{i}"]
        z = (z - params[f"mean{i}"]) / jnp.sqrt(params[f"var{i}"] + bn_eps)
        z = z * params[f"gamma{i}"] + params[f"beta{i}"]
        h = jnp.maximum(z, 0.0)
    return h @ params["wo"] + params["bo"]


if __name__ == "__main__":
    # Small, module-consistent configuration; batch chosen so the auto-tiler
    # produces an even (2-tile) parallel grid (256-row tiles).
    batch = 300
    context_frames = 2
    x_vocab, x_emb_dim = 50, 16
    y_vocab, y_emb_dim = 40, 16
    hidden_dims = [512, 512, 256]

    key = jax.random.PRNGKey(0)
    k_param, k_x, k_y = jax.random.split(key, 3)

    params = init_params(k_param, x_vocab, x_emb_dim, y_vocab, y_emb_dim,
                         hidden_dims, context_frames)
    prep = prepare_params(params, hidden_dims)

    x_idx = jax.random.randint(k_x, (batch, context_frames), 0, x_vocab, jnp.int32)
    y_idx = jax.random.randint(k_y, (batch, context_frames), 0, y_vocab, jnp.int32)

    out = mine_index_index_forward(x_idx, y_idx, params, prep)
    out = jax.block_until_ready(out)
    assert out.shape == (batch, 1)

    # Precision-matched reference (bf16 MXU inputs, f32 accumulation) -> tight check.
    ref = reference_forward_matched(x_idx, y_idx, params, prep, hidden_dims)
    np.testing.assert_allclose(np.asarray(out), np.asarray(ref), rtol=5e-3, atol=1e-4)

    # Semantic sanity check vs the full-f32 unfolded eval-mode module math
    # (loose tolerance: only bf16 matmul-input rounding separates them).
    ref32 = reference_forward_f32(x_idx, y_idx, params, hidden_dims)
    np.testing.assert_allclose(np.asarray(out), np.asarray(ref32), rtol=0.05, atol=0.02)

    print("KERNEL_OK")
</pallas_src>

<mosaic_0001>
module attributes {stable_mosaic.version = 11 : i64} {
  func.func @mine_mlp_kernel(%arg0: i32, %arg1: memref<256x64xbf16, #tpu.memory_space<vmem>>, %arg2: memref<64x512xbf16, #tpu.memory_space<vmem>>, %arg3: memref<1x512xf32, #tpu.memory_space<vmem>>, %arg4: memref<512x512xbf16, #tpu.memory_space<vmem>>, %arg5: memref<1x512xf32, #tpu.memory_space<vmem>>, %arg6: memref<512x256xbf16, #tpu.memory_space<vmem>>, %arg7: memref<1x256xf32, #tpu.memory_space<vmem>>, %arg8: memref<1x256xf32, #tpu.memory_space<vmem>>, %arg9: memref<1x1xf32, #tpu.memory_space<vmem>>, %arg10: memref<1x256xf32, #tpu.memory_space<vmem>>) attributes {dimension_semantics = [#tpu.dimension_semantics<parallel>], iteration_bounds = array<i64: 2>, scalar_prefetch = 0 : i64, scratch_operands = 0 : i64, tpu.core_type = #tpu.core_type<tc>, window_params = [{transform_indices = @transform_0, window_bounds = array<i64: 256, 64>}, {pipeline_mode = #tpu.pipeline_mode<synchronous>, transform_indices = @transform_1, window_bounds = array<i64: 64, 512>}, {pipeline_mode = #tpu.pipeline_mode<synchronous>, transform_indices = @transform_2, window_bounds = array<i64: 1, 512>}, {pipeline_mode = #tpu.pipeline_mode<synchronous>, transform_indices = @transform_3, window_bounds = array<i64: 512, 512>}, {pipeline_mode = #tpu.pipeline_mode<synchronous>, transform_indices = @transform_4, window_bounds = array<i64: 1, 512>}, {pipeline_mode = #tpu.pipeline_mode<synchronous>, transform_indices = @transform_5, window_bounds = array<i64: 512, 256>}, {pipeline_mode = #tpu.pipeline_mode<synchronous>, transform_indices = @transform_6, window_bounds = array<i64: 1, 256>}, {pipeline_mode = #tpu.pipeline_mode<synchronous>, transform_indices = @transform_7, window_bounds = array<i64: 1, 256>}, {pipeline_mode = #tpu.pipeline_mode<synchronous>, transform_indices = @transform_8, window_bounds = array<i64: 1, 1>}, {transform_indices = @transform_9, window_bounds = array<i64: 1, 256>}]} {
    %c0 = arith.constant 0 : index
    %c0_0 = arith.constant 0 : index
    %0 = vector.load %arg1[%c0, %c0_0] : memref<256x64xbf16, #tpu.memory_space<vmem>>, vector<256x64xbf16>
    %c0_1 = arith.constant 0 : index
    %c0_2 = arith.constant 0 : index
    %1 = vector.load %arg2[%c0_1, %c0_2] : memref<64x512xbf16, #tpu.memory_space<vmem>>, vector<64x512xbf16>
    %cst = arith.constant dense<0.000000e+00> : vector<256x512xf32>
    %2 = tpu.matmul %0, %1, %cst {dimension_numbers = #tpu.dot_dimension_numbers<[1], [0], [0], [1], [0, 0, 1, 1], [], []>} : vector<256x64xbf16>, vector<64x512xbf16>, vector<256x512xf32> -> vector<256x512xf32>
    %c0_3 = arith.constant 0 : index
    %c0_4 = arith.constant 0 : index
    %3 = vector.load %arg3[%c0_3, %c0_4] : memref<1x512xf32, #tpu.memory_space<vmem>>, vector<1x512xf32>
    %4 = vector.broadcast %3 : vector<1x512xf32> to vector<256x512xf32>
    %5 = arith.addf %2, %4 : vector<256x512xf32>
    %cst_5 = arith.constant 0.000000e+00 : f32
    %6 = vector.broadcast %cst_5 : f32 to vector<256x512xf32>
    %7 = arith.maximumf %5, %6 : vector<256x512xf32>
    %8 = arith.truncf %7 : vector<256x512xf32> to vector<256x512xbf16>
    %c0_6 = arith.constant 0 : index
    %c0_7 = arith.constant 0 : index
    %9 = vector.load %arg4[%c0_6, %c0_7] : memref<512x512xbf16, #tpu.memory_space<vmem>>, vector<512x512xbf16>
    %cst_8 = arith.constant dense<0.000000e+00> : vector<256x512xf32>
    %10 = tpu.matmul %8, %9, %cst_8 {dimension_numbers = #tpu.dot_dimension_numbers<[1], [0], [0], [1], [0, 0, 1, 1], [], []>} : vector<256x512xbf16>, vector<512x512xbf16>, vector<256x512xf32> -> vector<256x512xf32>
    %c0_9 = arith.constant 0 : index
    %c0_10 = arith.constant 0 : index
    %11 = vector.load %arg5[%c0_9, %c0_10] : memref<1x512xf32, #tpu.memory_space<vmem>>, vector<1x512xf32>
    %12 = vector.broadcast %11 : vector<1x512xf32> to vector<256x512xf32>
    %13 = arith.addf %10, %12 : vector<256x512xf32>
    %cst_11 = arith.constant 0.000000e+00 : f32
    %14 = vector.broadcast %cst_11 : f32 to vector<256x512xf32>
    %15 = arith.maximumf %13, %14 : vector<256x512xf32>
    %16 = arith.truncf %15 : vector<256x512xf32> to vector<256x512xbf16>
    %c0_12 = arith.constant 0 : index
    %c0_13 = arith.constant 0 : index
    %17 = vector.load %arg6[%c0_12, %c0_13] : memref<512x256xbf16, #tpu.memory_space<vmem>>, vector<512x256xbf16>
    %cst_14 = arith.constant dense<0.000000e+00> : vector<256x256xf32>
    %18 = tpu.matmul %16, %17, %cst_14 {dimension_numbers = #tpu.dot_dimension_numbers<[1], [0], [0], [1], [0, 0, 1, 1], [], []>} : vector<256x512xbf16>, vector<512x256xbf16>, vector<256x256xf32> -> vector<256x256xf32>
    %c0_15 = arith.constant 0 : index
    %c0_16 = arith.constant 0 : index
    %19 = vector.load %arg7[%c0_15, %c0_16] : memref<1x256xf32, #tpu.memory_space<vmem>>, vector<1x256xf32>
    %20 = vector.broadcast %19 : vector<1x256xf32> to vector<256x256xf32>
    %21 = arith.addf %18, %20 : vector<256x256xf32>
    %cst_17 = arith.constant 0.000000e+00 : f32
    %22 = vector.broadcast %cst_17 : f32 to vector<256x256xf32>
    %23 = arith.maximumf %21, %22 : vector<256x256xf32>
    %c0_18 = arith.constant 0 : index
    %c0_19 = arith.constant 0 : index
    %24 = vector.load %arg8[%c0_18, %c0_19] : memref<1x256xf32, #tpu.memory_space<vmem>>, vector<1x256xf32>
    %cst_20 = arith.constant dense<0.000000e+00> : vector<1x256xf32>
    %25 = tpu.matmul %24, %23, %cst_20 {dimension_numbers = #tpu.dot_dimension_numbers<[1], [1], [0], [0], [0, 0, 1, 0], [], []>} : vector<1x256xf32>, vector<256x256xf32>, vector<1x256xf32> -> vector<1x256xf32>
    %c0_21 = arith.constant 0 : index
    %c0_22 = arith.constant 0 : index
    %26 = vector.load %arg9[%c0_21, %c0_22] : memref<1x1xf32, #tpu.memory_space<vmem>>, vector<1x1xf32>
    %27 = vector.broadcast %26 : vector<1x1xf32> to vector<1x256xf32>
    %28 = arith.addf %25, %27 : vector<1x256xf32>
    %c0_23 = arith.constant 0 : index
    %c0_24 = arith.constant 0 : index
    %29 = vector.load %arg10[%c0_23, %c0_24] : memref<1x256xf32, #tpu.memory_space<vmem>>, vector<1x256xf32>
    tpu.vector_store %arg10[%c0_23, %c0_24], %28 {strides = array<i32>} : memref<1x256xf32, #tpu.memory_space<vmem>>, vector<1x256xf32>,
    return
  }
  func.func @transform_0(%arg0: i32) -> (i32, i32) {
    %c0_i32 = arith.constant 0 : i32
    %c0_i32_0 = arith.constant 0 : i32
    return %arg0, %c0_i32 : i32, i32
  }
  func.func @transform_1(%arg0: i32) -> (i32, i32) {
    %c0_i32 = arith.constant 0 : i32
    %c0_i32_0 = arith.constant 0 : i32
    %c0_i32_1 = arith.constant 0 : i32
    return %c0_i32, %c0_i32_0 : i32, i32
  }
  func.func @transform_2(%arg0: i32) -> (i32, i32) {
    %c0_i32 = arith.constant 0 : i32
    %c0_i32_0 = arith.constant 0 : i32
    %c0_i32_1 = arith.constant 0 : i32
    return %c0_i32, %c0_i32_0 : i32, i32
  }
  func.func @transform_3(%arg0: i32) -> (i32, i32) {
    %c0_i32 = arith.constant 0 : i32
    %c0_i32_0 = arith.constant 0 : i32
    %c0_i32_1 = arith.constant 0 : i32
    return %c0_i32, %c0_i32_0 : i32, i32
  }
  func.func @transform_4(%arg0: i32) -> (i32, i32) {
    %c0_i32 = arith.constant 0 : i32
    %c0_i32_0 = arith.constant 0 : i32
    %c0_i32_1 = arith.constant 0 : i32
    return %c0_i32, %c0_i32_0 : i32, i32
  }
  func.func @transform_5(%arg0: i32) -> (i32, i32) {
    %c0_i32 = arith.constant 0 : i32
    %c0_i32_0 = arith.constant 0 : i32
    %c0_i32_1 = arith.constant 0 : i32
    return %c0_i32, %c0_i32_0 : i32, i32
  }
  func.func @transform_6(%arg0: i32) -> (i32, i32) {
    %c0_i32 = arith.constant 0 : i32
    %c0_i32_0 = arith.constant 0 : i32
    %c0_i32_1 = arith.constant 0 : i32
    return %c0_i32, %c0_i32_0 : i32, i32
  }
  func.func @transform_7(%arg0: i32) -> (i32, i32) {
    %c0_i32 = arith.constant 0 : i32
    %c0_i32_0 = arith.constant 0 : i32
    %c0_i32_1 = arith.constant 0 : i32
    return %c0_i32, %c0_i32_0 : i32, i32
  }
  func.func @transform_8(%arg0: i32) -> (i32, i32) {
    %c0_i32 = arith.constant 0 : i32
    %c0_i32_0 = arith.constant 0 : i32
    %c0_i32_1 = arith.constant 0 : i32
    return %c0_i32, %c0_i32_0 : i32, i32
  }
  func.func @transform_9(%arg0: i32) -> (i32, i32) {
    %c0_i32 = arith.constant 0 : i32
    %c0_i32_0 = arith.constant 0 : i32
    return %c0_i32, %arg0 : i32, i32
  }
}

</mosaic_0001>

<bundles_post_ra>
// kernel: tpu_custom_call.1
= control target key start
LH: loop header
LB: loop body
LE: loop exit
PB: predicated region body
PF: predicated region fallthrough
CT: control target
= control target key end

     0   :  { %s7899_s0 = inlined_call_operand.vmem [shape: bf16[512,64], index: 0, kind: input, shape index: {}]   ;;  %s7900_s1 = inlined_call_operand.vmem [shape: bf16[64,512], index: 1, kind: input, shape index: {}]   ;;  %s7901_s2 = inlined_call_operand.vmem [shape: f32[1,512], index: 2, kind: input, shape index: {}]   ;;  %s7902_s3 = inlined_call_operand.hbm [shape: bf16[512,512], index: 3, kind: input, shape index: {}]   ;;  %s7903_s4 = inlined_call_operand.vmem [shape: f32[1,512], index: 4, kind: input, shape index: {}]   ;;  %s7904_s5 = inlined_call_operand.hbm [shape: bf16[512,256], index: 5, kind: input, shape index: {}]   ;;  %s7905_s6 = inlined_call_operand.vmem [shape: f32[1,256], index: 6, kind: input, shape index: {}]   ;;  %s7906_s7 = inlined_call_operand.vmem [shape: f32[1,256], index: 7, kind: input, shape index: {}]   ;;  %s7907_s8 = inlined_call_operand.<no memory space> [shape: f32[1,1], index: 8, kind: input, shape index: {}]   ;;  %s7908_s9 = inlined_call_operand.hbm [shape: f32[1,512], index: 9, kind: output, shape index: {}]  }
   0x1   :  { %v14_v0 = vstv %s7907_s8 }
   0x2   :  { %15 = vst [vmem:[#allocation2] sm:$0x1] %v14_v0 }
   0x3   :  { %16 = vsyncpa [#allocation4], 0 }
   0x4   :  { %17 = vsyncpa [#allocation7], 0 }
   0x5   :  { %18 = vsyncpa [#allocation5], 0 }
   0x6   :  { %20 = vsyncpa [#allocation5 + $0x1], 0  ;;  %s6405_s11 = smov 0   ;;  %s6407_s12 = smov 0  }
   0x7   :  { %s6409_s13 = smov 0   ;;  %s6411_s14 = smov 0  }
   0x8 LB: > { %s6426_s8 = sadd.s32 4294967295, %s6343_s14   ;;  %s4947_s15 = sadd.s32 4294967294, %s6343_s14   ;;  %s6343_s14 = sphi %s6411_s14, %s8330_s14   ;;  %s6339_s13 = sphi %s6409_s13, %s8329_s13   ;;  %s6335_s12 = sphi %s6407_s12, %s8328_s12   ;;  %s6331_s11 = sphi %s6405_s11, %s8327_s11  }
   0x9   : > { %s6430_s16 = sadd.s32 1, %s6343_s14   ;;  %s227_s17 = sadd.s32 1, %s6339_s13 }
   0xa   : > { %s224_s18 = ssub.s32 %s6343_s14, %s6430_s16  ;;  %p237_p0 = scmp.ne.s32.totalorder %s6339_s13, %s6335_s12 }
   0xb   : > { %p225_p1 = scmp.eq.s32.totalorder %s224_s18, 0  ;;  %p238_p2 = scmp.eq.s32.totalorder %s6426_s8, 1 }
   0xc   : > { %p243_p3 = scmp.ne.s32.totalorder %s6335_s12, %s6331_s11  ;;  %p244_p4 = scmp.eq.s32.totalorder %s4947_s15, 1 }
   0xd   : > { %s6441_s19 = scalar_select %p225_p1, %s6339_s13, %s227_s17  }
   0xe   : > { %p6443_p5 = por %p238_p2, %p237_p0  ;;  %p6447_p6 = por %p244_p4, %p243_p3 }
   0xf   : > { %p4948_p7 = scmp.ge.s32.totalorder %s6343_s14, 1  ;;  %p251_p8 = scmp.lt.s32.totalorder %s6343_s14, 3 }
  0x10   : > { %p6167_p9 = scmp.eq.s32.totalorder %s6426_s8, 0  ;;  %s268_s25 = sshll.u32 %s7902_s3, 4  ;;  %s269_s25 = int_to_ptr.hbm [resolvable:$true] %s268_s25 }
  0x11   : > { %p6454_p10 = pnand %p4948_p7, %p251_p8  ;;  %s6345_s26 = smov [#allocation3]  }
  0x12   : > { %s270_s27 = sshll.u32 %s6345_s26, 4  ;;  %s285_s30 = sshll.u32 %s7904_s5, 4  ;;  %s271_s27 = int_to_ptr.vmem [resolvable:$true] %s270_s27  ;;  %s286_s30 = int_to_ptr.hbm [resolvable:$true] %s285_s30 }
  0x13   : > { %p6156_p11 = pneg %p6454_p10  ;;  %s6346_s10 = smov 256  }
  0x14   : > { %s6347_s15 = smov 16   ;;  %s6348_s17 = smov [#allocation6]  }
  0x15   : > { %p6157_p12 = pnand %p6167_p9, %p6156_p11  ;;  %s287_s18 = sshll.u32 %s6348_s17, 4  ;;  %s288_s18 = int_to_ptr.vmem [resolvable:$true] %s287_s18 }
  0x16   : > { %s6349_s23 = smov 128   ;;  %s6350_s24 = smov 8  }
  0x17   : > { %6159 = dma.hbm_to_vmem [thread:$0]  (!%p6157_p12), %s269_s25, 16384, %s271_s27, [#allocation4], %s6346_s10, %s6346_s10, %s6347_s15  }
  0x18   : > { %6162 = dma.hbm_to_vmem [thread:$0]  (!%p6157_p12), %s286_s30, 8192, %s288_s18, [#allocation7], %s6349_s23, %s6349_s23, %s6350_s24  }
  0x19   : > { %321 = sbr.rel (%p6454_p10) target bundleno = 2178 (0x882), region = 56 }
  0x1e   : > { %6318 = dma.done.wait (%p6167_p9), [#allocation4], 16384  }
  0x1f   : > { %6320 = vsyncadd (%p6167_p9), [#allocation4], 4294950912 }
  0x20   : > { %6322 = dma.done.wait (%p6167_p9), [#allocation7], 8192  }
  0x21   : > { %6324 = vsyncadd (%p6167_p9), [#allocation7], 4294959104  ;;  %s4956_s25 = sshll.u32 %s6426_s8, 5  ;;  %v5072_v1 = vld [vmem:[%s7900_s1 + $0x60] sm:$0xf]  ;;  %vm589_vm0 = vcmask 523264  }
  0x22   : > { %p364_p13 = scmp.lt.s32.totalorder %s4956_s25, 63  ;;  %v5952_v2 = vld [vmem:[%s7900_s1 + $0x6c] sm:$0xf0]  ;;  %v5950_v3 = vld [vmem:[%s7900_s1 + $0x64] sm:$0xf]  ;;  %s360_s23 = sand.u32 1, %s6335_s12  }
  0x23   : > { %v5073_v4 = vor.u32 %v5952_v2, %v5072_v1  ;;  %v5074_v5 = vld [vmem:[%s7900_s1 + $0x70] sm:$0xf0]  ;;  %v5080_v6 = vld [vmem:[%s7900_s1 + $0x68] sm:$0xf]  ;;  %v5953_v7 = vld [vmem:[%s7900_s1 + $0x74] sm:$0xf0] }
  0x24   : > { %s8332_s25 = smov (!%p364_p13, %s4956_s25), 63  ;;  %v5077_v8 = vor.u32 %v5950_v3, %v5074_v5  ;;  %v5081_v9 = vor.u32 %v5953_v7, %v5080_v6  ;;  %v5951_v10 = vld [vmem:[%s7900_s1 + $0x6c] sm:$0xf]  ;;  %v5082_v11 = vld [vmem:[%s7900_s1 + $0x78] sm:$0xf0]  ;;  %s4955_s24 = sshll.u32 %s360_s23, 1 }
  0x25   : > { %s4957_s22 = sshll.u32 %s8332_s25, 2  ;;  %v5056_v12 = vld [vmem:[%s7900_s1 + $0x40] sm:$0xf]  ;;  %642 = vmatpush.bf16.msra.mxu0 %v5073_v4  ;;  %v5085_v13 = vor.u32 %v5951_v10, %v5082_v11  ;;  %v5948_v14 = vld [vmem:[%s7900_s1 + $0x4c] sm:$0xf0]  ;;  %s362_s28 = scalar_lea.vmem [#allocation8], %s4955_s24 }
  0x26   : > { %v5946_v15 = vld [vmem:[%s7900_s1 + $0x44] sm:$0xf]  ;;  %v5058_v16 = vld [vmem:[%s7900_s1 + $0x50] sm:$0xf0]  ;;  %731 = vmatpush.bf16.msra.mxu1 %v5077_v8  ;;  %820 = vmatpush.bf16.msra.mxu2 %v5081_v9  ;;  %v5057_v17 = vor.u32 %v5948_v14, %v5056_v12  ;;  %v5064_v19 = vld [vmem:[%s7900_s1 + $0x48] sm:$0xf]  ;;  %s6583_s26 = scalar_lea.vmem %s7899_s0, %s4957_s22 }
  0x27   : > { %v5061_v18 = vor.u32 %v5946_v15, %v5058_v16  ;;  %v5949_v20 = vld [vmem:[%s7900_s1 + $0x54] sm:$0xf0]  ;;  %v5947_v21 = vld [vmem:[%s7900_s1 + $0x4c] sm:$0xf]  ;;  %909 = vmatpush.bf16.msra.mxu3 %v5085_v13  ;;  %v5066_v23 = vld [vmem:[%s7900_s1 + $0x58] sm:$0xf0] }
  0x28   : > { %v5065_v22 = vor.u32 %v5949_v20, %v5064_v19  ;;  %v5040_v24 = vld [vmem:[%s7900_s1 + $0x20] sm:$0xf]  ;;  %v5944_v25 = vld [vmem:[%s7900_s1 + $0x2c] sm:$0xf0]  ;;  %v5069_v26 = vor.u32 %v5947_v21, %v5066_v23  ;;  %v5942_v27 = vld [vmem:[%s7900_s1 + $0x24] sm:$0xf] }
  0x29   : > { %v5042_v28 = vld [vmem:[%s7900_s1 + $0x30] sm:$0xf0]  ;;  %v5048_v29 = vld [vmem:[%s7900_s1 + $0x28] sm:$0xf]  ;;  %643 = vmatpush.bf16.msra.mxu0 %v5057_v17  ;;  %v5041_v30 = vor.u32 %v5944_v25, %v5040_v24  ;;  %v5945_v31 = vld [vmem:[%s7900_s1 + $0x34] sm:$0xf0] }
  0x2a   : > { %v5943_v32 = vld [vmem:[%s7900_s1 + $0x2c] sm:$0xf]  ;;  %v5050_v33 = vld [vmem:[%s7900_s1 + $0x38] sm:$0xf0]  ;;  %732 = vmatpush.bf16.msra.mxu1 %v5061_v18  ;;  %821 = vmatpush.bf16.msra.mxu2 %v5065_v22  ;;  %v5045_v34 = vor.u32 %v5942_v27, %v5042_v28  ;;  %v5049_v35 = vor.u32 %v5945_v31, %v5048_v29  ;;  %v5024_v36 = vld [vmem:[%s7900_s1] sm:$0xf] }
  0x2b   : > { %v5940_v37 = vld [vmem:[%s7900_s1 + $0xc] sm:$0xf0]  ;;  %v5938_v38 = vld [vmem:[%s7900_s1 + $0x4] sm:$0xf]  ;;  %910 = vmatpush.bf16.msra.mxu3 %v5069_v26  ;;  %v5053_v39 = vor.u32 %v5943_v32, %v5050_v33  ;;  %v5026_v40 = vld [vmem:[%s7900_s1 + $0x10] sm:$0xf0] }
  0x2c   : > { %v5032_v41 = vld [vmem:[%s7900_s1 + $0x8] sm:$0xf]  ;;  %v5941_v42 = vld [vmem:[%s7900_s1 + $0x14] sm:$0xf0]  ;;  %v5939_v43 = vld [vmem:[%s7900_s1 + $0xc] sm:$0xf]  ;;  %v5025_v45 = vor.u32 %v5940_v37, %v5024_v36  ;;  %v5029_v46 = vor.u32 %v5938_v38, %v5026_v40 }
  0x2d   : > { %v5034_v44 = vld [vmem:[%s7900_s1 + $0x18] sm:$0xf0]  ;;  %644 = vmatpush.bf16.msra.mxu0 %v5041_v30  ;;  %v5033_v47 = vor.u32 %v5941_v42, %v5032_v41  ;;  %v5922_v49 = vld [vmem:[%s6583_s26] sm:$0xff]  ;;  %v5923_v50 = vld [vmem:[%s6583_s26 + $0x8] sm:$0xff]  ;;  %s4863_s29 = sshll.u32 %s362_s28, 4  ;;  %vm4842_vm1 = vcmask 1040384   ;;  %s4864_s29 = int_to_ptr.vmem [resolvable:$true] %s4863_s29 }
  0x2e   : > { %733 = vmatpush.bf16.msra.mxu1 %v5045_v34  ;;  %822 = vmatpush.bf16.msra.mxu2 %v5049_v35  ;;  %v5037_v48 = vor.u32 %v5939_v43, %v5034_v44  ;;  %v5924_v51 = vld [vmem:[%s6583_s26 + $0x10] sm:$0xff]  ;;  %v5925_v52 = vld [vmem:[%s6583_s26 + $0x18] sm:$0xff]  ;;  %v5926_v53 = vld [vmem:[%s6583_s26 + $0x20] sm:$0xff]  ;;  %s6293_s24 = scalar_lea.hbm %s7908_s9, 4 }
  0x2f   : > { %911 = vmatpush.bf16.msra.mxu3 %v5053_v39  ;;  %v5927_v54 = vld [vmem:[%s6583_s26 + $0x28] sm:$0xff]  ;;  %v5928_v55 = vld [vmem:[%s6583_s26 + $0x30] sm:$0xff]  ;;  %v5929_v56 = vld [vmem:[%s6583_s26 + $0x38] sm:$0xff] }
  0x30   : > { %v5930_v57 = vld [vmem:[%s6583_s26 + $0x40] sm:$0xff]  ;;  %v5931_v18 = vld [vmem:[%s6583_s26 + $0x48] sm:$0xff] }
  0x31   : > { %645 = vmatpush.bf16.msra.mxu0 %v5025_v45  ;;  %v419_v58 = vld [vmem:[%s7901_s2] sm:$0xf] }
  0x32   : > { %734 = vmatpush.bf16.msra.mxu1 %v5029_v46  ;;  %823 = vmatpush.bf16.msra.mxu2 %v5033_v47  ;;  %v6629_v61 = vperm.slane %v419_v58, 0  ;;  %v6632_v62 = vperm.slane %v419_v58, 1  ;;  %v6640_v6 = vperm.slane %v419_v58, 2  ;;  %v6643_v9 = vperm.slane %v419_v58, 3  ;;  %v5932_v47 = vld [vmem:[%s6583_s26 + $0x50] sm:$0xff] }
  0x33   : > { %912 = vmatpush.bf16.msra.mxu3 %v5037_v48 }
  0x34   : > { %5086 = vmatmul.msk.bf16.vlgmr.msra.gmra.mxu0 %vm589_vm0, %v5922_v49 }
  0x35   : > { %5102 = vmatmul.msk.bf16.vlgmr.msra.gmra.mxu1 %vm589_vm0, %v5922_v49  ;;  %5118 = vmatmul.msk.bf16.vlgmr.msra.gmra.mxu2 %vm589_vm0, %v5922_v49 }
  0x36   : > { %5134 = vmatmul.msk.bf16.vlgmr.msra.gmra.mxu3 %vm589_vm0, %v5922_v49 }
  0x44   : > { %5087 = vmatmul.msk.bf16.gmra.mxu0 %vm589_vm0, %v5923_v50 }
  0x45   : > { %5103 = vmatmul.msk.bf16.gmra.mxu1 %vm589_vm0, %v5923_v50  ;;  %5119 = vmatmul.msk.bf16.gmra.mxu2 %vm589_vm0, %v5923_v50 }
  0x46   : > { %5135 = vmatmul.msk.bf16.gmra.mxu3 %vm589_vm0, %v5923_v50 }
  0x54   : > { %5088 = vmatmul.msk.bf16.gmra.mxu0 %vm589_vm0, %v5924_v51 }
  0x55   : > { %5104 = vmatmul.msk.bf16.gmra.mxu1 %vm589_vm0, %v5924_v51  ;;  %5120 = vmatmul.msk.bf16.gmra.mxu2 %vm589_vm0, %v5924_v51 }
  0x56   : > { %5136 = vmatmul.msk.bf16.gmra.mxu3 %vm589_vm0, %v5924_v51 }
  0x64   : > { %5089 = vmatmul.msk.bf16.gmra.mxu0 %vm589_vm0, %v5925_v52 }
  0x65   : > { %5105 = vmatmul.msk.bf16.gmra.mxu1 %vm589_vm0, %v5925_v52  ;;  %5121 = vmatmul.msk.bf16.gmra.mxu2 %vm589_vm0, %v5925_v52 }
  0x66   : > { %5137 = vmatmul.msk.bf16.gmra.mxu3 %vm589_vm0, %v5925_v52 }
  0x74   : > { %5090 = vmatmul.msk.bf16.gmra.mxu0 %vm589_vm0, %v5926_v53 }
  0x75   : > { %5106 = vmatmul.msk.bf16.gmra.mxu1 %vm589_vm0, %v5926_v53  ;;  %5122 = vmatmul.msk.bf16.gmra.mxu2 %vm589_vm0, %v5926_v53 }
  0x76   : > { %5138 = vmatmul.msk.bf16.gmra.mxu3 %vm589_vm0, %v5926_v53 }
  0x84   : > { %5091 = vmatmul.msk.bf16.gmra.mxu0 %vm589_vm0, %v5927_v54 }
  0x85   : > { %5107 = vmatmul.msk.bf16.gmra.mxu1 %vm589_vm0, %v5927_v54  ;;  %5123 = vmatmul.msk.bf16.gmra.mxu2 %vm589_vm0, %v5927_v54 }
  0x86   : > { %5139 = vmatmul.msk.bf16.gmra.mxu3 %vm589_vm0, %v5927_v54 }
  0x94   : > { %5092 = vmatmul.msk.bf16.gmra.mxu0 %vm589_vm0, %v5928_v55 }
  0x95   : > { %5108 = vmatmul.msk.bf16.gmra.mxu1 %vm589_vm0, %v5928_v55  ;;  %5124 = vmatmul.msk.bf16.gmra.mxu2 %vm589_vm0, %v5928_v55 }
  0x96   : > { %5140 = vmatmul.msk.bf16.gmra.mxu3 %vm589_vm0, %v5928_v55 }
  0xa4   : > { %5093 = vmatmul.msk.bf16.gmra.mxu0 %vm589_vm0, %v5929_v56 }
  0xa5   : > { %5109 = vmatmul.msk.bf16.gmra.mxu1 %vm589_vm0, %v5929_v56  ;;  %5125 = vmatmul.msk.bf16.gmra.mxu2 %vm589_vm0, %v5929_v56 }
  0xa6   : > { %5141 = vmatmul.msk.bf16.gmra.mxu3 %vm589_vm0, %v5929_v56 }
  0xb1   : > { %v647_v59 = vpop.f32.mrf.mxu0 }
  0xb2   : > { %v736_v60 = vpop.f32.mrf.mxu1  ;;  %v648_v63 = vadd.f32 %v647_v59, %v6629_v61  ;;  %v5520_v59 = vld [vmem:[#allocation3 + $0x2e0] sm:$0xf] }
  0xb3   : > { %v737_v1 = vadd.f32 %v736_v60, %v6632_v62  ;;  %v6048_v60 = vld [vmem:[#allocation3 + $0x2ec] sm:$0xf0] }
  0xb4   : > { %5094 = vmatmul.msk.bf16.gmra.mxu0 %vm589_vm0, %v5930_v57  ;;  %v994_v8 = vmax.f32 %v648_v63, 0.0  ;;  %v5521_v63 = vor.u32 %v6048_v60, %v5520_v59 }
  0xb5   : > { %5110 = vmatmul.msk.bf16.gmra.mxu1 %vm589_vm0, %v5930_v57  ;;  %5126 = vmatmul.msk.bf16.gmra.mxu2 %vm589_vm0, %v5930_v57  ;;  %v995_v11 = vmax.f32 %v737_v1, 0.0 }
  0xb6   : > { %5142 = vmatmul.msk.bf16.gmra.mxu3 %vm589_vm0, %v5930_v57  ;;  %2142 = vmatpush.bf16.msrb.mxu2 %v5521_v63 }
  0xb8   : > { %v825_v0 = vpop.f32.mrf.mxu2 }
  0xb9   : > { %v914_v2 = vpop.f32.mrf.mxu3  ;;  %v649_v3 = vpop.f32.mrf.mxu0  ;;  %v826_v14 = vadd.f32 %v825_v0, %v6640_v6 }
  0xba   : > { %v650_v4 = vadd.f32 %v649_v3, %v6629_v61  ;;  %v738_v5 = vpop.f32.mrf.mxu1  ;;  %v915_v16 = vadd.f32 %v914_v2, %v6643_v9 }
  0xbb   : > { %v739_v7 = vadd.f32 %v738_v5, %v6632_v62  ;;  %v996_v24 = vmax.f32 %v826_v14, 0.0  ;;  %v5984_v14 = vld [vmem:[#allocation3 + $0xec] sm:$0xf0] }
  0xbc   : > { %v998_v10 = vmax.f32 %v650_v4, 0.0  ;;  %v997_v26 = vmax.f32 %v915_v16, 0.0 }
  0xbd   : > { %v999_v12 = vmax.f32 %v739_v7, 0.0 }
  0xbe   : > { %v6645_v13 = vpack.c.bf16 %v998_v10, %v994_v8 }
  0xbf   : > { %v6648_v15 = vpack.c.bf16 %v999_v12, %v995_v11  ;;  %v5264_v12 = vld [vmem:[#allocation3 + $0xe0] sm:$0xf] }
  0xc0   : > { %v827_v17 = vpop.f32.mrf.mxu2 }
  0xc1   : > { %v828_v19 = vadd.f32 %v827_v17, %v6640_v6  ;;  %v916_v20 = vpop.f32.mrf.mxu3  ;;  %v652_v21 = vpop.f32.mrf.mxu0 }
  0xc2   : > { %v917_v22 = vadd.f32 %v916_v20, %v6643_v9  ;;  %v741_v23 = vpop.f32.mrf.mxu1  ;;  %v653_v30 = vadd.f32 %v652_v21, %v6629_v61  ;;  %v6080_v20 = vld [vmem:[#allocation3 + $0x3ec] sm:$0xf0] }
  0xc3   : > { %v1000_v25 = vmax.f32 %v828_v19, 0.0  ;;  %v742_v32 = vadd.f32 %v741_v23, %v6632_v62  ;;  %v5648_v19 = vld [vmem:[#allocation3 + $0x3e0] sm:$0xf] }
  0xc4   : > { %v1001_v27 = vmax.f32 %v917_v22, 0.0  ;;  %5095 = vmatmul.msk.bf16.gmra.mxu0 %vm589_vm0, %v5931_v18  ;;  %v1002_v38 = vmax.f32 %v653_v30, 0.0  ;;  %v5649_v22 = vor.u32 %v6080_v20, %v5648_v19  ;;  %v5504_v19 = vld [vmem:[#allocation3 + $0x2c0] sm:$0xf]  ;;  %v6044_v20 = vld [vmem:[#allocation3 + $0x2cc] sm:$0xf0] }
  0xc5   : > { %v6655_v28 = vpack.c.bf16 %v1000_v25, %v996_v24  ;;  %5111 = vmatmul.msk.bf16.gmra.mxu1 %vm589_vm0, %v5931_v18  ;;  %5127 = vmatmul.msk.bf16.gmra.mxu2 %vm589_vm0, %v5931_v18  ;;  %v1003_v40 = vmax.f32 %v742_v32, 0.0  ;;  %v5392_v25 = vld [vmem:[#allocation3 + $0x1e0] sm:$0xf] }
  0xc6   : > { %v6659_v29 = vpack.c.bf16 %v1001_v27, %v997_v26  ;;  %5143 = vmatmul.msk.bf16.gmra.mxu3 %vm589_vm0, %v5931_v18  ;;  %v5265_v18 = vor.u32 %v5984_v14, %v5264_v12  ;;  %v6016_v26 = vld [vmem:[#allocation3 + $0x1ec] sm:$0xf0] }
  0xc7   : > { %2231 = vmatpush.bf16.msrb.mxu3 %v5649_v22  ;;  %v5393_v32 = vor.u32 %v6016_v26, %v5392_v25  ;;  %v5505_v22 = vor.u32 %v6044_v20, %v5504_v19  ;;  %v5248_v26 = vld [vmem:[#allocation3 + $0xc0] sm:$0xf] }
  0xc8   : > { %v830_v31 = vpop.f32.mrf.mxu2  ;;  %1964 = vmatpush.bf16.msrb.mxu0 %v5265_v18  ;;  %v5344_v19 = vld [vmem:[#allocation3 + $0x180] sm:$0xf] }
  0xc9   : > { %v919_v33 = vpop.f32.mrf.mxu3  ;;  %v654_v34 = vpop.f32.mrf.mxu0  ;;  %v831_v43 = vadd.f32 %v830_v31, %v6640_v6  ;;  %v5933_v31 = vld [vmem:[%s6583_s26 + $0x58] sm:$0xff]  ;;  %2053 = vmatpush.bf16.msrb.mxu1 %v5393_v32  ;;  %2143 = vmatpush.bf16.msrb.mxu2 %v5505_v22 }
  0xca   : > { %v655_v35 = vadd.f32 %v654_v34, %v6629_v61  ;;  %v743_v36 = vpop.f32.mrf.mxu1  ;;  %v920_v45 = vadd.f32 %v919_v33, %v6643_v9 }
  0xcb   : > { %v744_v37 = vadd.f32 %v743_v36, %v6632_v62  ;;  %v1004_v53 = vmax.f32 %v831_v43, 0.0 }
  0xcc   : > { %v1006_v39 = vmax.f32 %v655_v35, 0.0  ;;  %v1005_v55 = vmax.f32 %v920_v45, 0.0 }
  0xcd   : > { %v1007_v41 = vmax.f32 %v744_v37, 0.0 }
  0xce   : > { %v6666_v42 = vpack.c.bf16 %v1006_v39, %v1002_v38 }
  0xcf   : > { %v6669_v44 = vpack.c.bf16 %v1007_v41, %v1003_v40 }
  0xd0   : > { %v832_v46 = vpop.f32.mrf.mxu2 }
  0xd1   : > { %v833_v48 = vadd.f32 %v832_v46, %v6640_v6  ;;  %v921_v49 = vpop.f32.mrf.mxu3  ;;  %v657_v50 = vpop.f32.mrf.mxu0 }
  0xd2   : > { %v922_v51 = vadd.f32 %v921_v49, %v6643_v9  ;;  %v746_v52 = vpop.f32.mrf.mxu1  ;;  %v658_v0 = vadd.f32 %v657_v50, %v6629_v61 }
  0xd3   : > { %v1008_v54 = vmax.f32 %v833_v48, 0.0  ;;  %v747_v2 = vadd.f32 %v746_v52, %v6632_v62 }
  0xd4   : > { %v1009_v56 = vmax.f32 %v922_v51, 0.0  ;;  %5096 = vmatmul.msk.bf16.gmra.mxu0 %vm589_vm0, %v5932_v47  ;;  %v1010_v10 = vmax.f32 %v658_v0, 0.0 }
  0xd5   : > { %v6676_v57 = vpack.c.bf16 %v1008_v54, %v1004_v53  ;;  %5112 = vmatmul.msk.bf16.gmra.mxu1 %vm589_vm0, %v5932_v47  ;;  %5128 = vmatmul.msk.bf16.gmra.mxu2 %vm589_vm0, %v5932_v47  ;;  %v1011_v16 = vmax.f32 %v747_v2, 0.0 }
  0xd6   : > { %v6680_v58 = vpack.c.bf16 %v1009_v56, %v1005_v55  ;;  %5144 = vmatmul.msk.bf16.gmra.mxu3 %vm589_vm0, %v5932_v47 }
  0xd8   : > { %v835_v1 = vpop.f32.mrf.mxu2 }
  0xd9   : > { %v924_v3 = vpop.f32.mrf.mxu3  ;;  %v659_v4 = vpop.f32.mrf.mxu0  ;;  %v836_v23 = vadd.f32 %v835_v1, %v6640_v6 }
  0xda   : > { %v660_v5 = vadd.f32 %v659_v4, %v6629_v61  ;;  %v748_v7 = vpop.f32.mrf.mxu1  ;;  %v925_v27 = vadd.f32 %v924_v3, %v6643_v9  ;;  %v5934_v3 = vld [vmem:[%s6583_s26 + $0x60] sm:$0xff] }
  0xdb   : > { %v749_v8 = vadd.f32 %v748_v7, %v6632_v62  ;;  %v1012_v38 = vmax.f32 %v836_v23, 0.0 }
  0xdc   : > { %v1014_v11 = vmax.f32 %v660_v5, 0.0  ;;  %v1013_v40 = vmax.f32 %v925_v27, 0.0  ;;  %v5980_v27 = vld [vmem:[#allocation3 + $0xcc] sm:$0xf0] }
  0xdd   : > { %v1015_v17 = vmax.f32 %v749_v8, 0.0 }
  0xde   : > { %v6687_v21 = vpack.c.bf16 %v1014_v11, %v1010_v10 }
  0xdf   : > { %v6690_v24 = vpack.c.bf16 %v1015_v17, %v1011_v16 }
  0xe0   : > { %v837_v30 = vpop.f32.mrf.mxu2 }
  0xe1   : > { %v838_v33 = vadd.f32 %v837_v30, %v6640_v6  ;;  %v926_v34 = vpop.f32.mrf.mxu3  ;;  %v662_v35 = vpop.f32.mrf.mxu0  ;;  %v5632_v30 = vld [vmem:[#allocation3 + $0x3c0] sm:$0xf] }
  0xe2   : > { %v927_v36 = vadd.f32 %v926_v34, %v6643_v9  ;;  %v751_v37 = vpop.f32.mrf.mxu1  ;;  %v663_v46 = vadd.f32 %v662_v35, %v6629_v61  ;;  %v5249_v34 = vor.u32 %v5980_v27, %v5248_v26  ;;  %v6076_v35 = vld [vmem:[#allocation3 + $0x3cc] sm:$0xf0]  ;;  %v5472_v27 = vld [vmem:[#allocation3 + $0x280] sm:$0xf] }
  0xe3   : > { %v1016_v39 = vmax.f32 %v838_v33, 0.0  ;;  %v752_v48 = vadd.f32 %v751_v37, %v6632_v62  ;;  %v6012_v37 = vld [vmem:[#allocation3 + $0x1cc] sm:$0xf0] }
  0xe4   : > { %v1017_v41 = vmax.f32 %v927_v36, 0.0  ;;  %5097 = vmatmul.msk.bf16.gmra.mxu0 %vm589_vm0, %v5933_v31  ;;  %v1018_v54 = vmax.f32 %v663_v46, 0.0  ;;  %v5376_v36 = vld [vmem:[#allocation3 + $0x1c0] sm:$0xf]  ;;  %v6004_v26 = vld [vmem:[#allocation3 + $0x18c] sm:$0xf0] }
  0xe5   : > { %v6697_v43 = vpack.c.bf16 %v1016_v39, %v1012_v38  ;;  %5113 = vmatmul.msk.bf16.gmra.mxu1 %vm589_vm0, %v5933_v31  ;;  %5129 = vmatmul.msk.bf16.gmra.mxu2 %vm589_vm0, %v5933_v31  ;;  %v1019_v56 = vmax.f32 %v752_v48, 0.0 }
  0xe6   : > { %v6701_v45 = vpack.c.bf16 %v1017_v41, %v1013_v40  ;;  %5145 = vmatmul.msk.bf16.gmra.mxu3 %vm589_vm0, %v5933_v31  ;;  %v5633_v40 = vor.u32 %v6076_v35, %v5632_v30  ;;  %v5377_v41 = vor.u32 %v6012_v37, %v5376_v36  ;;  %1965 = vmatpush.bf16.msrb.mxu0 %v5249_v34  ;;  %v6036_v30 = vld [vmem:[#allocation3 + $0x28c] sm:$0xf0]  ;;  %v5600_v35 = vld [vmem:[#allocation3 + $0x380] sm:$0xf] }
  0xe7   : > { %v5473_v34 = vor.u32 %v6036_v30, %v5472_v27  ;;  %v6068_v36 = vld [vmem:[#allocation3 + $0x38c] sm:$0xf0]  ;;  %v5568_v30 = vld [vmem:[#allocation3 + $0x340] sm:$0xf] }
  0xe8   : > { %v840_v47 = vpop.f32.mrf.mxu2  ;;  %2232 = vmatpush.bf16.msrb.mxu3 %v5633_v40  ;;  %2054 = vmatpush.bf16.msrb.mxu1 %v5377_v41 }
  0xe9   : > { %v929_v49 = vpop.f32.mrf.mxu3  ;;  %v664_v50 = vpop.f32.mrf.mxu0  ;;  %v841_v63 = vadd.f32 %v840_v47, %v6640_v6 }
  0xea   : > { %v665_v51 = vadd.f32 %v664_v50, %v6629_v61  ;;  %v753_v52 = vpop.f32.mrf.mxu1  ;;  %v930_v1 = vadd.f32 %v929_v49, %v6643_v9  ;;  %v5232_v49 = vld [vmem:[#allocation3 + $0xa0] sm:$0xf]  ;;  %v5976_v50 = vld [vmem:[#allocation3 + $0xac] sm:$0xf0] }
  0xeb   : > { %v754_v53 = vadd.f32 %v753_v52, %v6632_v62  ;;  %v1020_v11 = vmax.f32 %v841_v63, 0.0  ;;  %v5488_v63 = vld [vmem:[#allocation3 + $0x2a0] sm:$0xf] }
  0xec   : > { %v1022_v55 = vmax.f32 %v665_v51, 0.0  ;;  %v1021_v14 = vmax.f32 %v930_v1, 0.0  ;;  %v6040_v1 = vld [vmem:[#allocation3 + $0x2ac] sm:$0xf0] }
  0xed   : > { %v1023_v59 = vmax.f32 %v754_v53, 0.0  ;;  %v5233_v53 = vor.u32 %v5976_v50, %v5232_v49  ;;  %v5328_v49 = vld [vmem:[#allocation3 + $0x160] sm:$0xf] }
  0xee   : > { %v6708_v60 = vpack.c.bf16 %v1022_v55, %v1018_v54  ;;  %v5360_v54 = vld [vmem:[#allocation3 + $0x1a0] sm:$0xf]  ;;  %v6008_v55 = vld [vmem:[#allocation3 + $0x1ac] sm:$0xf0] }
  0xef   : > { %v6711_v0 = vpack.c.bf16 %v1023_v59, %v1019_v56  ;;  %v5361_v59 = vor.u32 %v6008_v55, %v5360_v54  ;;  %1966 = vmatpush.bf16.msrb.mxu0 %v5233_v53  ;;  %v5456_v53 = vld [vmem:[#allocation3 + $0x260] sm:$0xf]  ;;  %v6032_v54 = vld [vmem:[#allocation3 + $0x26c] sm:$0xf0] }
  0xf0   : > { %8051 = vst [vmem:[#allocation12_spill] sm:$0xff] %v6708_v60  ;;  %v842_v2 = vpop.f32.mrf.mxu2 }
  0xf1   : > { %8052 = vst [vmem:[#allocation13_spill] sm:$0xff] %v6711_v0  ;;  %v843_v4 = vadd.f32 %v842_v2, %v6640_v6  ;;  %v931_v5 = vpop.f32.mrf.mxu3  ;;  %v667_v7 = vpop.f32.mrf.mxu0  ;;  %v5616_v2 = vld [vmem:[#allocation3 + $0x3a0] sm:$0xf]  ;;  %2055 = vmatpush.bf16.msrb.mxu1 %v5361_v59  ;;  %v5457_v59 = vor.u32 %v6032_v54, %v5456_v53 }
  0xf2   : > { %v932_v8 = vadd.f32 %v931_v5, %v6643_v9  ;;  %v756_v10 = vpop.f32.mrf.mxu1  ;;  %v668_v23 = vadd.f32 %v667_v7, %v6629_v61  ;;  %v5935_v5 = vld [vmem:[%s6583_s26 + $0x68] sm:$0xff]  ;;  %v5489_v7 = vor.u32 %v6040_v1, %v5488_v63  ;;  %v5584_v63 = vld [vmem:[#allocation3 + $0x360] sm:$0xf]  ;;  %v6064_v1 = vld [vmem:[#allocation3 + $0x36c] sm:$0xf0] }
  0xf3   : > { %v1024_v12 = vmax.f32 %v843_v4, 0.0  ;;  %v757_v31 = vadd.f32 %v756_v10, %v6632_v62  ;;  %v5552_v53 = vld [vmem:[#allocation3 + $0x320] sm:$0xf] }
  0xf4   : > { %v1025_v16 = vmax.f32 %v932_v8, 0.0  ;;  %5098 = vmatmul.msk.bf16.gmra.mxu0 %vm589_vm0, %v5934_v3  ;;  %v1026_v47 = vmax.f32 %v668_v23, 0.0  ;;  %v6072_v8 = vld [vmem:[#allocation3 + $0x3ac] sm:$0xf0]  ;;  %2144 = vmatpush.bf16.msrb.mxu2 %v5489_v7  ;;  %v5585_v7 = vor.u32 %v6064_v1, %v5584_v63 }
  0xf5   : > { %v6718_v17 = vpack.c.bf16 %v1024_v12, %v1020_v11  ;;  %5114 = vmatmul.msk.bf16.gmra.mxu1 %vm589_vm0, %v5934_v3  ;;  %5130 = vmatmul.msk.bf16.gmra.mxu2 %vm589_vm0, %v5934_v3  ;;  %v1027_v51 = vmax.f32 %v757_v31, 0.0  ;;  %v5617_v12 = vor.u32 %v6072_v8, %v5616_v2  ;;  %v5184_v8 = vld [vmem:[#allocation3 + $0x40] sm:$0xf]  ;;  %v6056_v1 = vld [vmem:[#allocation3 + $0x32c] sm:$0xf0] }
  0xf6   : > { %v6722_v18 = vpack.c.bf16 %v1025_v16, %v1021_v14  ;;  %5146 = vmatmul.msk.bf16.gmra.mxu3 %vm589_vm0, %v5934_v3  ;;  %v5216_v14 = vld [vmem:[#allocation3 + $0x80] sm:$0xf]  ;;  %v5972_v16 = vld [vmem:[#allocation3 + $0x8c] sm:$0xf0] }
  0xf7   : > { %8053 = vst [vmem:[#allocation14_spill] sm:$0xff] %v6718_v17  ;;  %2233 = vmatpush.bf16.msrb.mxu3 %v5617_v12 }
  0xf8   : > { %8054 = vst [vmem:[#allocation15_spill] sm:$0xff] %v6722_v18  ;;  %v845_v25 = vpop.f32.mrf.mxu2  ;;  %2145 = vmatpush.bf16.msrb.mxu2 %v5473_v34 }
  0xf9   : > { %v934_v32 = vpop.f32.mrf.mxu3  ;;  %v669_v33 = vpop.f32.mrf.mxu0  ;;  %v846_v3 = vadd.f32 %v845_v25, %v6640_v6  ;;  %v5217_v25 = vor.u32 %v5972_v16, %v5216_v14 }
  0xfa   : > { %v670_v38 = vadd.f32 %v669_v33, %v6629_v61  ;;  %v758_v39 = vpop.f32.mrf.mxu1  ;;  %v935_v10 = vadd.f32 %v934_v32, %v6643_v9  ;;  %v5345_v32 = vor.u32 %v6004_v26, %v5344_v19  ;;  %v5996_v19 = vld [vmem:[#allocation3 + $0x14c] sm:$0xf0] }
  0xfb   : > { %v759_v46 = vadd.f32 %v758_v39, %v6632_v62  ;;  %v1028_v37 = vmax.f32 %v846_v3, 0.0  ;;  %1967 = vmatpush.bf16.msrb.mxu0 %v5217_v25  ;;  %v5601_v39 = vor.u32 %v6068_v36, %v5600_v35  ;;  %v5168_v36 = vld [vmem:[#allocation3 + $0x20] sm:$0xf] }
  0xfc   : > { %v1030_v48 = vmax.f32 %v670_v38, 0.0  ;;  %v1029_v40 = vmax.f32 %v935_v10, 0.0  ;;  %2056 = vmatpush.bf16.msrb.mxu1 %v5345_v32  ;;  %v5964_v10 = vld [vmem:[#allocation3 + $0x4c] sm:$0xf0]  ;;  %2146 = vmatpush.bf16.msrb.mxu2 %v5457_v59 }
  0xfd   : > { %v1031_v52 = vmax.f32 %v759_v46, 0.0  ;;  %v5200_v46 = vld [vmem:[#allocation3 + $0x60] sm:$0xf]  ;;  %2234 = vmatpush.bf16.msrb.mxu3 %v5601_v39  ;;  %v5185_v16 = vor.u32 %v5964_v10, %v5184_v8  ;;  %v5936_v59 = vld [vmem:[%s6583_s26 + $0x70] sm:$0xff]  ;;  %v5553_v8 = vor.u32 %v6056_v1, %v5552_v53 }
  0xfe   : > { %v6729_v56 = vpack.c.bf16 %v1030_v48, %v1026_v47  ;;  %v5968_v48 = vld [vmem:[#allocation3 + $0x6c] sm:$0xf0]  ;;  %v5152_v10 = vld [vmem:[#allocation3] sm:$0xf] }
  0xff   : > { %v6732_v4 = vpack.c.bf16 %v1031_v52, %v1027_v51  ;;  %v5201_v51 = vor.u32 %v5968_v48, %v5200_v46  ;;  %v6000_v52 = vld [vmem:[#allocation3 + $0x16c] sm:$0xf0] }
 0x100   : > { %8055 = vst [vmem:[#allocation16_spill] sm:$0xff] %v6729_v56  ;;  %v847_v11 = vpop.f32.mrf.mxu2  ;;  %v5329_v55 = vor.u32 %v6000_v52, %v5328_v49  ;;  %v5992_v46 = vld [vmem:[#allocation3 + $0x12c] sm:$0xf0] }
 0x101   : > { %8056 = vst [vmem:[#allocation17_spill] sm:$0xff] %v6732_v4  ;;  %v848_v20 = vadd.f32 %v847_v11, %v6640_v6  ;;  %v936_v22 = vpop.f32.mrf.mxu3  ;;  %v672_v23 = vpop.f32.mrf.mxu0  ;;  %1968 = vmatpush.bf16.msrb.mxu0 %v5201_v51  ;;  %v5312_v11 = vld [vmem:[#allocation3 + $0x140] sm:$0xf]  ;;  %2235 = vmatpush.bf16.msrb.mxu3 %v5585_v7  ;;  %v6024_v52 = vld [vmem:[#allocation3 + $0x22c] sm:$0xf0] }
 0x102   : > { %v937_v31 = vadd.f32 %v936_v22, %v6643_v9  ;;  %v761_v33 = vpop.f32.mrf.mxu1  ;;  %v673_v2 = vadd.f32 %v672_v23, %v6629_v61  ;;  %2057 = vmatpush.bf16.msrb.mxu1 %v5329_v55  ;;  %v6028_v22 = vld [vmem:[#allocation3 + $0x24c] sm:$0xf0]  ;;  %v5313_v23 = vor.u32 %v5996_v19, %v5312_v11  ;;  %v5424_v51 = vld [vmem:[#allocation3 + $0x220] sm:$0xf] }
 0x103   : > { %v1032_v38 = vmax.f32 %v848_v20, 0.0  ;;  %v5440_v20 = vld [vmem:[#allocation3 + $0x240] sm:$0xf]  ;;  %v5425_v63 = vor.u32 %v6024_v52, %v5424_v51  ;;  %v5956_v11 = vld [vmem:[#allocation3 + $0xc] sm:$0xf0] }
 0x104   : > { %v1033_v41 = vmax.f32 %v937_v31, 0.0  ;;  %5099 = vmatmul.msk.bf16.gmra.mxu0 %vm589_vm0, %v5935_v5  ;;  %v5441_v27 = vor.u32 %v6028_v22, %v5440_v20  ;;  %v6060_v31 = vld [vmem:[#allocation3 + $0x34c] sm:$0xf0]  ;;  %v5408_v20 = vld [vmem:[#allocation3 + $0x200] sm:$0xf] }
 0x105   : > { %v6739_v47 = vpack.c.bf16 %v1032_v38, %v1028_v37  ;;  %5115 = vmatmul.msk.bf16.gmra.mxu1 %vm589_vm0, %v5935_v5  ;;  %5131 = vmatmul.msk.bf16.gmra.mxu2 %vm589_vm0, %v5935_v5  ;;  %v5569_v34 = vor.u32 %v6060_v31, %v5568_v30  ;;  %v5960_v37 = vld [vmem:[#allocation3 + $0x2c] sm:$0xf0] }
 0x106   : > { %v6743_v50 = vpack.c.bf16 %v1033_v41, %v1029_v40  ;;  %5147 = vmatmul.msk.bf16.gmra.mxu3 %vm589_vm0, %v5935_v5  ;;  %v762_v5 = vadd.f32 %v761_v33, %v6632_v62  ;;  %v1034_v33 = vmax.f32 %v673_v2, 0.0  ;;  %1969 = vmatpush.bf16.msrb.mxu0 %v5185_v16  ;;  %v5169_v40 = vor.u32 %v5960_v37, %v5168_v36  ;;  %v5296_v41 = vld [vmem:[#allocation3 + $0x120] sm:$0xf]  ;;  %v6020_v22 = vld [vmem:[#allocation3 + $0x20c] sm:$0xf0] }
 0x107   : > { %8057 = vst [vmem:[#allocation18_spill] sm:$0xff] %v6739_v47  ;;  %2058 = vmatpush.bf16.msrb.mxu1 %v5313_v23  ;;  %2147 = vmatpush.bf16.msrb.mxu2 %v5441_v27  ;;  %v5297_v49 = vor.u32 %v5992_v46, %v5296_v41  ;;  %v5153_v23 = vor.u32 %v5956_v11, %v5152_v10  ;;  %v6052_v27 = vld [vmem:[#allocation3 + $0x30c] sm:$0xf0] }
 0x108   : > { %8058 = vst [vmem:[#allocation19_spill] sm:$0xff] %v6743_v50  ;;  %v850_v3 = vpop.f32.mrf.mxu2  ;;  %v1035_v38 = vmax.f32 %v762_v5, 0.0  ;;  %2236 = vmatpush.bf16.msrb.mxu3 %v5569_v34  ;;  %v5280_v5 = vld [vmem:[#allocation3 + $0x100] sm:$0xf]  ;;  %v5409_v34 = vor.u32 %v6020_v22, %v5408_v20 }
 0x109   : > { %v939_v12 = vpop.f32.mrf.mxu3  ;;  %v674_v14 = vpop.f32.mrf.mxu0  ;;  %v851_v54 = vadd.f32 %v850_v3, %v6640_v6  ;;  %v5988_v3 = vld [vmem:[#allocation3 + $0x10c] sm:$0xf0] }
 0x10a   : > { %v675_v25 = vadd.f32 %v674_v14, %v6629_v61  ;;  %v763_v26 = vpop.f32.mrf.mxu1  ;;  %v940_v2 = vadd.f32 %v939_v12, %v6643_v9  ;;  %1970 = vmatpush.bf16.msrb.mxu0 %v5169_v40  ;;  %v5536_v12 = vld [vmem:[#allocation3 + $0x300] sm:$0xf] }
 0x10b   : > { %v764_v32 = vadd.f32 %v763_v26, %v6632_v62  ;;  %2059 = vmatpush.bf16.msrb.mxu1 %v5297_v49  ;;  %2148 = vmatpush.bf16.msrb.mxu2 %v5425_v63  ;;  %v1036_v30 = vmax.f32 %v851_v54, 0.0  ;;  %v5537_v36 = vor.u32 %v6052_v27, %v5536_v12 }
 0x10c   : > { %v1038_v35 = vmax.f32 %v675_v25, 0.0  ;;  %2237 = vmatpush.bf16.msrb.mxu3 %v5553_v8 }
 0x10d   : > { %v1039_v39 = vmax.f32 %v764_v32, 0.0  ;;  %v5281_v32 = vor.u32 %v5988_v3, %v5280_v5  ;;  %v5937_v5 = vld [vmem:[%s6583_s26 + $0x78] sm:$0xff]  ;;  %s5919_s26 = sshll.u32 %s6426_s8, 1  ;;  %s4851_s8 = scalar_lea.sflag [#allocation5], %s360_s23 }
 0x10e   : > { %v6750_v48 = vpack.c.bf16 %v1038_v35, %v1034_v33  ;;  %v1037_v33 = vmax.f32 %v940_v2, 0.0  ;;  %1971 = vmatpush.bf16.msrb.mxu0 %v5153_v23  ;;  %s4861_s27 = scalar_lea.hbm %s7908_s9, %s5919_s26 }
 0x10f   : > { %v6753_v55 = vpack.c.bf16 %v1039_v39, %v1035_v38  ;;  %2060 = vmatpush.bf16.msrb.mxu1 %v5281_v32  ;;  %2149 = vmatpush.bf16.msrb.mxu2 %v5409_v34  ;;  %s4865_s30 = sshll.u32 %s4861_s27, 4  ;;  %s4866_s30 = int_to_ptr.hbm [resolvable:$true] %s4865_s30 }
 0x110   : > { %8059 = vst [vmem:[#allocation20_spill] sm:$0xff] %v6750_v48  ;;  %v852_v7 = vpop.f32.mrf.mxu2  ;;  %2238 = vmatpush.bf16.msrb.mxu3 %v5537_v36  ;;  %s6287_s10 = sshra.s32 %s4866_s30, 4  ;;  %s6288_s10 = int_to_ptr.hbm [resolvable:$true] %s6287_s10 }
 0x111   : > { %8060 = vst [vmem:[#allocation21_spill] sm:$0xff] %v6753_v55  ;;  %v853_v14 = vadd.f32 %v852_v7, %v6640_v6  ;;  %v941_v16 = vpop.f32.mrf.mxu3  ;;  %v677_v19 = vpop.f32.mrf.mxu0  ;;  %s6289_s15 = scalar_lea.hbm %s6288_s10, 2  ;;  %p6294_p3 = scmp.lt.s32.totalorder %s6288_s10, %s7908_s9 }
 0x112   : > { %v942_v25 = vadd.f32 %v941_v16, %v6643_v9  ;;  %v766_v26 = vpop.f32.mrf.mxu1  ;;  %v678_v39 = vadd.f32 %v677_v19, %v6629_v61  ;;  %p6290_p0 = scmp.ne.s32.totalorder %s6288_s10, %s6289_s15  ;;  %p6295_p4 = scmp.lt.s32.totalorder %s6293_s24, %s6289_s15 }
 0x113   : > { %v1040_v31 = vmax.f32 %v853_v14, 0.0  ;;  %v767_v41 = vadd.f32 %v766_v26, %v6632_v62 }
 0x114   : > { %v1041_v35 = vmax.f32 %v942_v25, 0.0  ;;  %5100 = vmatmul.msk.bf16.gmra.mxu0 %vm589_vm0, %v5936_v59  ;;  %v1042_v54 = vmax.f32 %v678_v39, 0.0  ;;  %p6291_p1 = pnand %p6290_p0, %p6443_p5  ;;  %p6296_p7 = por %p6295_p4, %p6294_p3 }
 0x115   : > { %v6760_v37 = vpack.c.bf16 %v1040_v31, %v1036_v30  ;;  %5116 = vmatmul.msk.bf16.gmra.mxu1 %vm589_vm0, %v5936_v59  ;;  %5132 = vmatmul.msk.bf16.gmra.mxu2 %vm589_vm0, %v5936_v59 }
 0x116   : > { %v6764_v38 = vpack.c.bf16 %v1041_v35, %v1037_v33  ;;  %5148 = vmatmul.msk.bf16.gmra.mxu3 %vm589_vm0, %v5936_v59  ;;  %v1043_v59 = vmax.f32 %v767_v41, 0.0  ;;  %p6292_p2 = pneg %p6291_p1 }
 0x117   : > { %8061 = vst [vmem:[#allocation22_spill] sm:$0xff] %v6760_v37 }
 0x118   : > { %8062 = vst [vmem:[#allocation23_spill] sm:$0xff] %v6764_v38  ;;  %v855_v40 = vpop.f32.mrf.mxu2  ;;  %p6297_p8 = pnand %p6296_p7, %p6292_p2 }
 0x119   : > { %v944_v46 = vpop.f32.mrf.mxu3  ;;  %v679_v49 = vpop.f32.mrf.mxu0  ;;  %v856_v7 = vadd.f32 %v855_v40, %v6640_v6 }
 0x11a   : > { %v680_v51 = vadd.f32 %v679_v49, %v6629_v61  ;;  %v768_v52 = vpop.f32.mrf.mxu1  ;;  %v945_v10 = vadd.f32 %v944_v46, %v6643_v9 }
 0x11b   : > { %v769_v53 = vadd.f32 %v768_v52, %v6632_v62  ;;  %v1044_v22 = vmax.f32 %v856_v7, 0.0 }
 0x11c   : > { %v1046_v63 = vmax.f32 %v680_v51, 0.0  ;;  %v1045_v26 = vmax.f32 %v945_v10, 0.0 }
 0x11d   : > { %v1047_v1 = vmax.f32 %v769_v53, 0.0 }
 0x11e   : > { %v6771_v2 = vpack.c.bf16 %v1046_v63, %v1042_v54 }
 0x11f   : > { %v6774_v8 = vpack.c.bf16 %v1047_v1, %v1043_v59 }
 0x120   : > { %8063 = vst [vmem:[#allocation24_spill] sm:$0xff] %v6771_v2  ;;  %v857_v11 = vpop.f32.mrf.mxu2 }
 0x121   : > { %8064 = vst [vmem:[#allocation25_spill] sm:$0xff] %v6774_v8  ;;  %v858_v14 = vadd.f32 %v857_v11, %v6640_v6  ;;  %v946_v16 = vpop.f32.mrf.mxu3  ;;  %v682_v19 = vpop.f32.mrf.mxu0 }
 0x122   : > { %v947_v3 = vadd.f32 %v946_v16, %v6643_v9  ;;  %v771_v20 = vpop.f32.mrf.mxu1  ;;  %v683_v30 = vadd.f32 %v682_v19, %v6629_v61 }
 0x123   : > { %v1048_v25 = vmax.f32 %v858_v14, 0.0  ;;  %v772_v32 = vadd.f32 %v771_v20, %v6632_v62 }
 0x124   : > { %v1049_v23 = vmax.f32 %v947_v3, 0.0  ;;  %5101 = vmatmul.msk.bf16.gmra.mxu0 %vm589_vm0, %v5937_v5  ;;  %v1050_v40 = vmax.f32 %v683_v30, 0.0 }
 0x125   : > { %v6781_v12 = vpack.c.bf16 %v1048_v25, %v1044_v22  ;;  %5117 = vmatmul.msk.bf16.gmra.mxu1 %vm589_vm0, %v5937_v5  ;;  %5133 = vmatmul.msk.bf16.gmra.mxu2 %vm589_vm0, %v5937_v5  ;;  %v1051_v46 = vmax.f32 %v772_v32, 0.0 }
 0x126   : > { %v6785_v27 = vpack.c.bf16 %v1049_v23, %v1045_v26  ;;  %5149 = vmatmul.msk.bf16.gmra.mxu3 %vm589_vm0, %v5937_v5 }
 0x127   : > { %8065 = vst [vmem:[#allocation26_spill] sm:$0xff] %v6781_v12 }
 0x128   : > { %8066 = vst [vmem:[#allocation27_spill] sm:$0xff] %v6785_v27  ;;  %v860_v31 = vpop.f32.mrf.mxu2 }
 0x129   : > { %v949_v34 = vpop.f32.mrf.mxu3  ;;  %v684_v33 = vpop.f32.mrf.mxu0  ;;  %v861_v52 = vadd.f32 %v860_v31, %v6640_v6 }
 0x12a   : > { %v685_v35 = vadd.f32 %v684_v33, %v6629_v61  ;;  %v773_v36 = vpop.f32.mrf.mxu1  ;;  %v950_v54 = vadd.f32 %v949_v34, %v6643_v9 }
 0x12b   : > { %v774_v39 = vadd.f32 %v773_v36, %v6632_v62  ;;  %v1052_v5 = vmax.f32 %v861_v52, 0.0 }
 0x12c   : > { %v1054_v41 = vmax.f32 %v685_v35, 0.0  ;;  %v1053_v16 = vmax.f32 %v950_v54, 0.0 }
 0x12d   : > { %v1055_v49 = vmax.f32 %v774_v39, 0.0 }
 0x12e   : > { %v6792_v51 = vpack.c.bf16 %v1054_v41, %v1050_v40 }
 0x12f   : > { %v6795_v53 = vpack.c.bf16 %v1055_v49, %v1051_v46 }
 0x130   : > { %v862_v63 = vpop.f32.mrf.mxu2 }
 0x131   : > { %8067 = vst [vmem:[#allocation28_spill] sm:$0xff] %v6795_v53  ;;  %v863_v59 = vadd.f32 %v862_v63, %v6640_v6  ;;  %v951_v1 = vpop.f32.mrf.mxu3  ;;  %v687_v7 = vpop.f32.mrf.mxu0 }
 0x132   : > { %v952_v10 = vadd.f32 %v951_v1, %v6643_v9  ;;  %v776_v11 = vpop.f32.mrf.mxu1  ;;  %v688_v22 = vadd.f32 %v687_v7, %v6629_v61 }
 0x133   : > { %v1056_v14 = vmax.f32 %v863_v59, 0.0  ;;  %v777_v26 = vadd.f32 %v776_v11, %v6632_v62 }
 0x134   : > { %v1057_v19 = vmax.f32 %v952_v10, 0.0  ;;  %1972 = vmatmul.bf16.vlgmr.msrb.gmra.mxu0 %v6645_v13  ;;  %v1058_v33 = vmax.f32 %v688_v22, 0.0 }
 0x135   : > { %v6801_v3 = vpack.c.bf16 %v1056_v14, %v1052_v5  ;;  %2061 = vmatmul.bf16.vlgmr.msrb.gmra.mxu1 %v6648_v15  ;;  %2150 = vmatmul.bf16.vlgmr.msrb.gmra.mxu2 %v6655_v28  ;;  %v1059_v36 = vmax.f32 %v777_v26, 0.0 }
 0x136   : > { %v6805_v20 = vpack.c.bf16 %v1057_v19, %v1053_v16  ;;  %2239 = vmatmul.bf16.vlgmr.msrb.gmra.mxu3 %v6659_v29 }
 0x137   : > { %8068 = vst [vmem:[#allocation29_spill] sm:$0xff] %v6801_v3 }
 0x138   : > { %8069 = vst [vmem:[#allocation30_spill] sm:$0xff] %v6805_v20  ;;  %v865_v25 = vpop.f32.mrf.mxu2 }
 0x139   : > { %v954_v23 = vpop.f32.mrf.mxu3  ;;  %v689_v30 = vpop.f32.mrf.mxu0  ;;  %v866_v41 = vadd.f32 %v865_v25, %v6640_v6 }
 0x13a   : > { %v690_v31 = vadd.f32 %v689_v30, %v6629_v61  ;;  %v778_v32 = vpop.f32.mrf.mxu1  ;;  %v955_v49 = vadd.f32 %v954_v23, %v6643_v9 }
 0x13b   : > { %v779_v34 = vadd.f32 %v778_v32, %v6632_v62  ;;  %v1060_v10 = vmax.f32 %v866_v41, 0.0 }
 0x13c   : > { %v1062_v35 = vmax.f32 %v690_v31, 0.0  ;;  %v1061_v5 = vmax.f32 %v955_v49, 0.0 }
 0x13d   : > { %v1063_v39 = vmax.f32 %v779_v34, 0.0 }
 0x13e   : > { %v6812_v40 = vpack.c.bf16 %v1062_v35, %v1058_v33 }
 0x13f   : > { %v6815_v46 = vpack.c.bf16 %v1063_v39, %v1059_v36 }
 0x140   : > { %8070 = vst [vmem:[#allocation31_spill] sm:$0xff] %v6812_v40  ;;  %v867_v52 = vpop.f32.mrf.mxu2 }
 0x141   : > { %8071 = vst [vmem:[#allocation32_spill] sm:$0xff] %v6815_v46  ;;  %v868_v54 = vadd.f32 %v867_v52, %v6640_v6  ;;  %v956_v63 = vpop.f32.mrf.mxu3  ;;  %v692_v59 = vpop.f32.mrf.mxu0 }
 0x142   : > { %v957_v1 = vadd.f32 %v956_v63, %v6643_v9  ;;  %v781_v7 = vpop.f32.mrf.mxu1  ;;  %v693_v22 = vadd.f32 %v692_v59, %v6629_v61 }
 0x143   : > { %v1064_v11 = vmax.f32 %v868_v54, 0.0  ;;  %v782_v26 = vadd.f32 %v781_v7, %v6632_v62 }
 0x144   : > { %v1065_v14 = vmax.f32 %v957_v1, 0.0  ;;  %1977 = vmatmul.bf16.gmra.mxu0 %v6666_v42  ;;  %v1066_v33 = vmax.f32 %v693_v22, 0.0 }
 0x145   : > { %v6821_v16 = vpack.c.bf16 %v1064_v11, %v1060_v10  ;;  %2066 = vmatmul.bf16.gmra.mxu1 %v6669_v44  ;;  %2155 = vmatmul.bf16.gmra.mxu2 %v6676_v57  ;;  %v1067_v36 = vmax.f32 %v782_v26, 0.0 }
 0x146   : > { %v6825_v19 = vpack.c.bf16 %v1065_v14, %v1061_v5  ;;  %2244 = vmatmul.bf16.gmra.mxu3 %v6680_v58 }
 0x147   : > { %8072 = vst [vmem:[#allocation33_spill] sm:$0xff] %v6821_v16 }
 0x148   : > { %8073 = vst [vmem:[#allocation34_spill] sm:$0xff] %v6825_v19  ;;  %v870_v25 = vpop.f32.mrf.mxu2 }
 0x149   : > { %v959_v23 = vpop.f32.mrf.mxu3  ;;  %v694_v30 = vpop.f32.mrf.mxu0  ;;  %v871_v49 = vadd.f32 %v870_v25, %v6640_v6 }
 0x14a   : > { %v695_v31 = vadd.f32 %v694_v30, %v6629_v61  ;;  %v783_v32 = vpop.f32.mrf.mxu1  ;;  %v960_v54 = vadd.f32 %v959_v23, %v6643_v9 }
 0x14b   : > { %v784_v34 = vadd.f32 %v783_v32, %v6632_v62  ;;  %v1068_v5 = vmax.f32 %v871_v49, 0.0 }
 0x14c   : > { %v1070_v35 = vmax.f32 %v695_v31, 0.0  ;;  %v1069_v22 = vmax.f32 %v960_v54, 0.0 }
 0x14d   : > { %v1071_v39 = vmax.f32 %v784_v34, 0.0 }
 0x14e   : > { %v6832_v41 = vpack.c.bf16 %v1070_v35, %v1066_v33 }
 0x14f   : > { %v6835_v52 = vpack.c.bf16 %v1071_v39, %v1067_v36 }
 0x150   : > { %8074 = vst [vmem:[#allocation35_spill] sm:$0xff] %v6832_v41  ;;  %v872_v63 = vpop.f32.mrf.mxu2 }
 0x151   : > { %8075 = vst [vmem:[#allocation36_spill] sm:$0xff] %v6835_v52  ;;  %v873_v59 = vadd.f32 %v872_v63, %v6640_v6  ;;  %v961_v1 = vpop.f32.mrf.mxu3  ;;  %v697_v7 = vpop.f32.mrf.mxu0 }
 0x152   : > { %v962_v10 = vadd.f32 %v961_v1, %v6643_v9  ;;  %v786_v11 = vpop.f32.mrf.mxu1  ;;  %v698_v23 = vadd.f32 %v697_v7, %v6629_v61 }
 0x153   : > { %v1072_v14 = vmax.f32 %v873_v59, 0.0  ;;  %v787_v32 = vadd.f32 %v786_v11, %v6632_v62 }
 0x154   : > { %v1073_v26 = vmax.f32 %v962_v10, 0.0  ;;  %1982 = vmatmul.bf16.gmra.mxu0 %v6687_v21  ;;  %v1074_v49 = vmax.f32 %v698_v23, 0.0 }
 0x155   : > { %v6841_v30 = vpack.c.bf16 %v1072_v14, %v1068_v5  ;;  %2071 = vmatmul.bf16.gmra.mxu1 %v6690_v24  ;;  %2160 = vmatmul.bf16.gmra.mxu2 %v6697_v43  ;;  %v1075_v63 = vmax.f32 %v787_v32, 0.0 }
 0x156   : > { %v6845_v25 = vpack.c.bf16 %v1073_v26, %v1069_v22  ;;  %2249 = vmatmul.bf16.gmra.mxu3 %v6701_v45 }
 0x157   : > { %8076 = vst [vmem:[#allocation37_spill] sm:$0xff] %v6841_v30 }
 0x158   : > { %8077 = vst [vmem:[#allocation38_spill] sm:$0xff] %v6845_v25  ;;  %v875_v31 = vpop.f32.mrf.mxu2 }
 0x159   : > { %v964_v34 = vpop.f32.mrf.mxu3  ;;  %v699_v33 = vpop.f32.mrf.mxu0  ;;  %v876_v10 = vadd.f32 %v875_v31, %v6640_v6 }
 0x15a   : > { %v700_v35 = vadd.f32 %v699_v33, %v6629_v61  ;;  %v788_v36 = vpop.f32.mrf.mxu1  ;;  %v965_v7 = vadd.f32 %v964_v34, %v6643_v9 }
 0x15b   : > { %v789_v39 = vadd.f32 %v788_v36, %v6632_v62  ;;  %v1076_v23 = vmax.f32 %v876_v10, 0.0 }
 0x15c   : > { %v1078_v54 = vmax.f32 %v700_v35, 0.0  ;;  %v1077_v32 = vmax.f32 %v965_v7, 0.0 }
 0x15d   : > { %v1079_v59 = vmax.f32 %v789_v39, 0.0 }
 0x15e   : > { %v6852_v1 = vpack.c.bf16 %v1078_v54, %v1074_v49 }
 0x15f   : > { %v6855_v5 = vpack.c.bf16 %v1079_v59, %v1075_v63 }
 0x160   : > { %8078 = vst [vmem:[#allocation39_spill] sm:$0xff] %v6852_v1  ;;  %v877_v11 = vpop.f32.mrf.mxu2 }
 0x161   : > { %8079 = vst [vmem:[#allocation40_spill] sm:$0xff] %v6855_v5  ;;  %v878_v14 = vadd.f32 %v877_v11, %v6640_v6  ;;  %v966_v22 = vpop.f32.mrf.mxu3  ;;  %v702_v26 = vpop.f32.mrf.mxu0 }
 0x162   : > { %v967_v33 = vadd.f32 %v966_v22, %v6643_v9  ;;  %v791_v36 = vpop.f32.mrf.mxu1  ;;  %v703_v34 = vadd.f32 %v702_v26, %v6629_v61 }
 0x163   : > { %v1080_v35 = vmax.f32 %v878_v14, 0.0  ;;  %v792_v63 = vadd.f32 %v791_v36, %v6632_v62 }
 0x164   : > { %v1081_v39 = vmax.f32 %v967_v33, 0.0  ;;  %1987 = vmatmul.bf16.gmra.mxu0 %v6708_v60  ;;  %v1082_v22 = vmax.f32 %v703_v34, 0.0 }
 0x165   : > { %v6861_v49 = vpack.c.bf16 %v1080_v35, %v1076_v23  ;;  %2076 = vmatmul.bf16.gmra.mxu1 %v6711_v0  ;;  %2165 = vmatmul.bf16.gmra.mxu2 %v6718_v17  ;;  %v1083_v23 = vmax.f32 %v792_v63, 0.0 }
 0x166   : > { %v6865_v31 = vpack.c.bf16 %v1081_v39, %v1077_v32  ;;  %2254 = vmatmul.bf16.gmra.mxu3 %v6722_v18 }
 0x167   : > { %8080 = vst [vmem:[#allocation41_spill] sm:$0xff] %v6861_v49 }
 0x168   : > { %8081 = vst [vmem:[#allocation42_spill] sm:$0xff] %v6865_v31  ;;  %v880_v54 = vpop.f32.mrf.mxu2 }
 0x169   : > { %v969_v59 = vpop.f32.mrf.mxu3  ;;  %v704_v10 = vpop.f32.mrf.mxu0  ;;  %v881_v39 = vadd.f32 %v880_v54, %v6640_v6 }
 0x16a   : > { %v705_v7 = vadd.f32 %v704_v10, %v6629_v61  ;;  %v793_v11 = vpop.f32.mrf.mxu1  ;;  %v970_v26 = vadd.f32 %v969_v59, %v6643_v9 }
 0x16b   : > { %v794_v14 = vadd.f32 %v793_v11, %v6632_v62  ;;  %v1084_v34 = vmax.f32 %v881_v39, 0.0 }
 0x16c   : > { %v1086_v33 = vmax.f32 %v705_v7, 0.0  ;;  %v1085_v63 = vmax.f32 %v970_v26, 0.0 }
 0x16d   : > { %v1087_v35 = vmax.f32 %v794_v14, 0.0 }
 0x16e   : > { %v6872_v32 = vpack.c.bf16 %v1086_v33, %v1082_v22 }
 0x16f   : > { %v6875_v18 = vpack.c.bf16 %v1087_v35, %v1083_v23 }
 0x170   : > { %8082 = vst [vmem:[#allocation43_spill] sm:$0xff] %v6872_v32  ;;  %v882_v36 = vpop.f32.mrf.mxu2 }
 0x171   : > { %8083 = vst [vmem:[#allocation44_spill] sm:$0xff] %v6875_v18  ;;  %v883_v17 = vadd.f32 %v882_v36, %v6640_v6  ;;  %v971_v0 = vpop.f32.mrf.mxu3  ;;  %v707_v10 = vpop.f32.mrf.mxu0 }
 0x172   : > { %v972_v60 = vadd.f32 %v971_v0, %v6643_v9  ;;  %v796_v11 = vpop.f32.mrf.mxu1  ;;  %v708_v59 = vadd.f32 %v707_v10, %v6629_v61 }
 0x173   : > { %v1088_v7 = vmax.f32 %v883_v17, 0.0  ;;  %v797_v33 = vadd.f32 %v796_v11, %v6632_v62 }
 0x174   : > { %v1089_v14 = vmax.f32 %v972_v60, 0.0  ;;  %1992 = vmatmul.bf16.gmra.mxu0 %v6729_v56  ;;  %v1090_v26 = vmax.f32 %v708_v59, 0.0 }
 0x175   : > { %v6881_v22 = vpack.c.bf16 %v1088_v7, %v1084_v34  ;;  %2081 = vmatmul.bf16.gmra.mxu1 %v6732_v4  ;;  %2170 = vmatmul.bf16.gmra.mxu2 %v6739_v47  ;;  %v1091_v34 = vmax.f32 %v797_v33, 0.0 }
 0x176   : > { %v6885_v54 = vpack.c.bf16 %v1089_v14, %v1085_v63  ;;  %2259 = vmatmul.bf16.gmra.mxu3 %v6743_v50 }
 0x177   : > { %8084 = vst [vmem:[#allocation45_spill] sm:$0xff] %v6881_v22 }
 0x178   : > { %8085 = vst [vmem:[#allocation46_spill] sm:$0xff] %v6885_v54  ;;  %v885_v0 = vpop.f32.mrf.mxu2 }
 0x179   : > { %v974_v17 = vpop.f32.mrf.mxu3  ;;  %v709_v23 = vpop.f32.mrf.mxu0  ;;  %v886_v14 = vadd.f32 %v885_v0, %v6640_v6 }
 0x17a   : > { %v710_v60 = vadd.f32 %v709_v23, %v6629_v61  ;;  %v798_v35 = vpop.f32.mrf.mxu1  ;;  %v975_v10 = vadd.f32 %v974_v17, %v6643_v9 }
 0x17b   : > { %v799_v39 = vadd.f32 %v798_v35, %v6632_v62  ;;  %v1092_v59 = vmax.f32 %v886_v14, 0.0 }
 0x17c   : > { %v1094_v36 = vmax.f32 %v710_v60, 0.0  ;;  %v1093_v33 = vmax.f32 %v975_v10, 0.0 }
 0x17d   : > { %v1095_v7 = vmax.f32 %v799_v39, 0.0 }
 0x17e   : > { %v6892_v63 = vpack.c.bf16 %v1094_v36, %v1090_v26 }
 0x17f   : > { %v6895_v50 = vpack.c.bf16 %v1095_v7, %v1091_v34 }
 0x180   : > { %8086 = vst [vmem:[#allocation47_spill] sm:$0xff] %v6892_v63  ;;  %v887_v11 = vpop.f32.mrf.mxu2 }
 0x181   : > { %8087 = vst [vmem:[#allocation48_spill] sm:$0xff] %v6895_v50  ;;  %v888_v47 = vadd.f32 %v887_v11, %v6640_v6  ;;  %v976_v4 = vpop.f32.mrf.mxu3  ;;  %v712_v23 = vpop.f32.mrf.mxu0 }
 0x182   : > { %v977_v56 = vadd.f32 %v976_v4, %v6643_v9  ;;  %v801_v35 = vpop.f32.mrf.mxu1  ;;  %v713_v17 = vadd.f32 %v712_v23, %v6629_v61 }
 0x183   : > { %v1096_v60 = vmax.f32 %v888_v47, 0.0  ;;  %v802_v36 = vadd.f32 %v801_v35, %v6632_v62 }
 0x184   : > { %v1097_v39 = vmax.f32 %v977_v56, 0.0  ;;  %1997 = vmatmul.bf16.gmra.mxu0 %v6750_v48  ;;  %v1098_v10 = vmax.f32 %v713_v17, 0.0 }
 0x185   : > { %v6901_v26 = vpack.c.bf16 %v1096_v60, %v1092_v59  ;;  %2086 = vmatmul.bf16.gmra.mxu1 %v6753_v55  ;;  %2175 = vmatmul.bf16.gmra.mxu2 %v6760_v37  ;;  %v1099_v59 = vmax.f32 %v802_v36, 0.0 }
 0x186   : > { %v6905_v0 = vpack.c.bf16 %v1097_v39, %v1093_v33  ;;  %2264 = vmatmul.bf16.gmra.mxu3 %v6764_v38 }
 0x187   : > { %8088 = vst [vmem:[#allocation49_spill] sm:$0xff] %v6901_v26 }
 0x188   : > { %8089 = vst [vmem:[#allocation50_spill] sm:$0xff] %v6905_v0  ;;  %v890_v4 = vpop.f32.mrf.mxu2 }
 0x189   : > { %v979_v47 = vpop.f32.mrf.mxu3  ;;  %v714_v34 = vpop.f32.mrf.mxu0  ;;  %v891_v39 = vadd.f32 %v890_v4, %v6640_v6 }
 0x18a   : > { %v715_v56 = vadd.f32 %v714_v34, %v6629_v61  ;;  %v803_v7 = vpop.f32.mrf.mxu1  ;;  %v980_v23 = vadd.f32 %v979_v47, %v6643_v9 }
 0x18b   : > { %v804_v14 = vadd.f32 %v803_v7, %v6632_v62  ;;  %v1100_v17 = vmax.f32 %v891_v39, 0.0 }
 0x18c   : > { %v1102_v11 = vmax.f32 %v715_v56, 0.0  ;;  %v1101_v36 = vmax.f32 %v980_v23, 0.0 }
 0x18d   : > { %v1103_v60 = vmax.f32 %v804_v14, 0.0 }
 0x18e   : > { %v6912_v33 = vpack.c.bf16 %v1102_v11, %v1098_v10 }
 0x18f   : > { %v6915_v38 = vpack.c.bf16 %v1103_v60, %v1099_v59 }
 0x190   : > { %8090 = vst [vmem:[#allocation51_spill] sm:$0xff] %v6912_v33  ;;  %v892_v35 = vpop.f32.mrf.mxu2 }
 0x191   : > { %8091 = vst [vmem:[#allocation52_spill] sm:$0xff] %v6915_v38  ;;  %v893_v37 = vadd.f32 %v892_v35, %v6640_v6  ;;  %v981_v55 = vpop.f32.mrf.mxu3  ;;  %v717_v34 = vpop.f32.mrf.mxu0 }
 0x192   : > { %v982_v48 = vadd.f32 %v981_v55, %v6643_v9  ;;  %v806_v7 = vpop.f32.mrf.mxu1  ;;  %v718_v47 = vadd.f32 %v717_v34, %v6629_v61 }
 0x193   : > { %v1104_v56 = vmax.f32 %v893_v37, 0.0  ;;  %v807_v11 = vadd.f32 %v806_v7, %v6632_v62 }
 0x194   : > { %v1105_v14 = vmax.f32 %v982_v48, 0.0  ;;  %2002 = vmatmul.bf16.gmra.mxu0 %v6771_v2  ;;  %v1106_v23 = vmax.f32 %v718_v47, 0.0 }
 0x195   : > { %v6921_v10 = vpack.c.bf16 %v1104_v56, %v1100_v17  ;;  %2091 = vmatmul.bf16.gmra.mxu1 %v6774_v8  ;;  %2180 = vmatmul.bf16.gmra.mxu2 %v6781_v12  ;;  %v1107_v17 = vmax.f32 %v807_v11, 0.0 }
 0x196   : > { %v6925_v4 = vpack.c.bf16 %v1105_v14, %v1101_v36  ;;  %2269 = vmatmul.bf16.gmra.mxu3 %v6785_v27 }
 0x197   : > { %8092 = vst [vmem:[#allocation53_spill] sm:$0xff] %v6921_v10 }
 0x198   : > { %8093 = vst [vmem:[#allocation54_spill] sm:$0xff] %v6925_v4  ;;  %v895_v55 = vpop.f32.mrf.mxu2 }
 0x199   : > { %v984_v37 = vpop.f32.mrf.mxu3  ;;  %v719_v59 = vpop.f32.mrf.mxu0  ;;  %v896_v14 = vadd.f32 %v895_v55, %v6640_v6 }
 0x19a   : > { %v720_v48 = vadd.f32 %v719_v59, %v6629_v61  ;;  %v808_v60 = vpop.f32.mrf.mxu1  ;;  %v985_v34 = vadd.f32 %v984_v37, %v6643_v9 }
 0x19b   : > { %v809_v39 = vadd.f32 %v808_v60, %v6632_v62  ;;  %v1108_v47 = vmax.f32 %v896_v14, 0.0 }
 0x19c   : > { %v1110_v35 = vmax.f32 %v720_v48, 0.0  ;;  %v1109_v11 = vmax.f32 %v985_v34, 0.0  ;;  %v6955_v34 = vld [vmem:[%s7903_s4] sm:$0xf] }
 0x19d   : > { %v1111_v56 = vmax.f32 %v809_v39, 0.0  ;;  %8094 = vst [vmem:[#allocation55_spill] sm:$0xff] %v6955_v34 }
 0x19e   : > { %v6932_v36 = vpack.c.bf16 %v1110_v35, %v1106_v23 }
 0x19f   : > { %v6935_v27 = vpack.c.bf16 %v1111_v56, %v1107_v17 }
 0x1a0   : > { %v897_v7 = vpop.f32.mrf.mxu2 }
 0x1a1   : > { %v898_v12 = vadd.f32 %v897_v7, %v6640_v6  ;;  %v986_v8 = vpop.f32.mrf.mxu3  ;;  %v722_v59 = vpop.f32.mrf.mxu0 }
 0x1a2   : > { %v987_v2 = vadd.f32 %v986_v8, %v6643_v9  ;;  %v811_v60 = vpop.f32.mrf.mxu1  ;;  %v723_v37 = vadd.f32 %v722_v59, %v6629_v61 }
 0x1a3   : > { %v1112_v48 = vmax.f32 %v898_v12, 0.0  ;;  %v812_v35 = vadd.f32 %v811_v60, %v6632_v62  ;;  %v6960_v60 = vperm.slane %v6955_v34, 0 }
 0x1a4   : > { %v1113_v39 = vmax.f32 %v987_v2, 0.0  ;;  %2007 = vmatmul.bf16.gmra.mxu0 %v6792_v51  ;;  %v1114_v7 = vmax.f32 %v723_v37, 0.0 }
 0x1a5   : > { %v6941_v23 = vpack.c.bf16 %v1112_v48, %v1108_v47  ;;  %2096 = vmatmul.bf16.gmra.mxu1 %v6795_v53  ;;  %2185 = vmatmul.bf16.gmra.mxu2 %v6801_v3  ;;  %v1115_v48 = vmax.f32 %v812_v35, 0.0 }
 0x1a6   : > { %v6945_v55 = vpack.c.bf16 %v1113_v39, %v1109_v11  ;;  %2274 = vmatmul.bf16.gmra.mxu3 %v6805_v20 }
 0x1a8   : > { %v900_v8 = vpop.f32.mrf.mxu2 }
 0x1a9   : > { %v989_v12 = vpop.f32.mrf.mxu3  ;;  %v724_v17 = vpop.f32.mrf.mxu0  ;;  %v901_v39 = vadd.f32 %v900_v8, %v6640_v6 }
 0x1aa   : > { %v725_v2 = vadd.f32 %v724_v17, %v6629_v61  ;;  %v813_v56 = vpop.f32.mrf.mxu1 }
 0x1ab   : > { %v814_v14 = vadd.f32 %v813_v56, %v6632_v62  ;;  %v990_v62 = vadd.f32 %v989_v12, %v6643_v9 }
 0x1ac   : > { %v1118_v47 = vmax.f32 %v725_v2, 0.0 }
 0x1ad   : > { %v1119_v11 = vmax.f32 %v814_v14, 0.0  ;;  %v1116_v14 = vmax.f32 %v901_v39, 0.0 }
 0x1ae   : > { %v6957_v59 = vpack.c.bf16 %v1118_v47, %v1114_v7  ;;  %v1117_v47 = vmax.f32 %v990_v62, 0.0 }
 0x1af   : > { %v6963_v61 = vpack.c.bf16 %v1119_v11, %v1115_v48 }
 0x1b0   : > { %v902_v17 = vpop.f32.mrf.mxu2 }
 0x1b1   : > { %v903_v56 = vadd.f32 %v902_v17, %v6640_v6  ;;  %v991_v20 = vpop.f32.mrf.mxu3  ;;  %v1973_v3 = vpop.f32.mrf.mxu0 }
 0x1b2   : > { %v992_v37 = vadd.f32 %v991_v20, %v6643_v9  ;;  %v1974_v35 = vadd.f32 %v1973_v3, %v6960_v60  ;;  %v2062_v2 = vpop.f32.mrf.mxu1 }
 0x1b3   : > { %v1120_v7 = vmax.f32 %v903_v56, 0.0 }
 0x1b4   : > { %v1121_v34 = vmax.f32 %v992_v37, 0.0  ;;  %v2063_v53 = vadd.f32 %v2062_v2, %v1974_v35  ;;  %2012 = vmatmul.bf16.gmra.mxu0 %v6812_v40 }
 0x1b5   : > { %v6970_v8 = vpack.c.bf16 %v1120_v7, %v1116_v14  ;;  %2101 = vmatmul.bf16.gmra.mxu1 %v6815_v46  ;;  %2190 = vmatmul.bf16.gmra.mxu2 %v6821_v16 }
 0x1b6   : > { %v6974_v6 = vpack.c.bf16 %v1121_v34, %v1117_v47  ;;  %2279 = vmatmul.bf16.gmra.mxu3 %v6825_v19 }
 0x1b8   : > { %v2151_v9 = vpop.f32.mrf.mxu2 }
 0x1b9   : > { %v2152_v3 = vadd.f32 %v2151_v9, %v2063_v53  ;;  %v2240_v20 = vpop.f32.mrf.mxu3  ;;  %v1975_v12 = vpop.f32.mrf.mxu0 }
 0x1ba   : > { %v1976_v48 = vadd.f32 %v1975_v12, %v6960_v60  ;;  %v2064_v11 = vpop.f32.mrf.mxu1 }
 0x1bb   : > { %v2241_v39 = vadd.f32 %v2240_v20, %v2152_v3 }
 0x1bc   : > { %v2065_v62 = vadd.f32 %v2064_v11, %v1976_v48 }
 0x1bd   : > { %v3388_v47 = vmax.f32 %v2241_v39, 0.0 }
 0x1c0   : > { %v2153_v17 = vpop.f32.mrf.mxu2 }
 0x1c1   : > { %v2154_v56 = vadd.f32 %v2153_v17, %v2065_v62  ;;  %v2242_v37 = vpop.f32.mrf.mxu3  ;;  %v1978_v35 = vpop.f32.mrf.mxu0 }
 0x1c2   : > { %v1979_v2 = vadd.f32 %v1978_v35, %v6960_v60  ;;  %v2067_v14 = vpop.f32.mrf.mxu1 }
 0x1c3   : > { %v2243_v34 = vadd.f32 %v2242_v37, %v2154_v56 }
 0x1c4   : > { %v2068_v7 = vadd.f32 %v2067_v14, %v1979_v2  ;;  %2017 = vmatmul.bf16.gmra.mxu0 %v6832_v41 }
 0x1c5   : > { %v3392_v53 = vmax.f32 %v2243_v34, 0.0  ;;  %2106 = vmatmul.bf16.gmra.mxu1 %v6835_v52  ;;  %2195 = vmatmul.bf16.gmra.mxu2 %v6841_v30 }
 0x1c6   : > { %2284 = vmatmul.bf16.gmra.mxu3 %v6845_v25 }
 0x1c7   : > { %v6983_v9 = vpack.c.bf16 %v3392_v53, %v3388_v47  ;;  %v6046_v53 = vld [vmem:[#allocation3 + $0x2e4] sm:$0xf] }
 0x1c8   : > { %v2156_v3 = vpop.f32.mrf.mxu2 }
 0x1c9   : > { %8095 = vst [vmem:[#allocation56_spill] sm:$0xff] %v6983_v9  ;;  %v2157_v20 = vadd.f32 %v2156_v3, %v2068_v7  ;;  %v2245_v12 = vpop.f32.mrf.mxu3  ;;  %v1980_v48 = vpop.f32.mrf.mxu0  ;;  %v5522_v3 = vld [vmem:[#allocation3 + $0x2f0] sm:$0xf0] }
 0x1ca   : > { %v1981_v11 = vadd.f32 %v1980_v48, %v6960_v60  ;;  %v2069_v62 = vpop.f32.mrf.mxu1  ;;  %v5650_v9 = vld [vmem:[#allocation3 + $0x3f0] sm:$0xf0] }
 0x1cb   : > { %v2246_v17 = vadd.f32 %v2245_v12, %v2157_v20  ;;  %v5525_v20 = vor.u32 %v6046_v53, %v5522_v3  ;;  %v5394_v53 = vld [vmem:[#allocation3 + $0x1f0] sm:$0xf0] }
 0x1cc   : > { %v2070_v56 = vadd.f32 %v2069_v62, %v1981_v11 }
 0x1cd   : > { %v3396_v47 = vmax.f32 %v2246_v17, 0.0  ;;  %2498 = vmatpush.bf16.msra.mxu2 %v5525_v20 }
 0x1d0   : > { %v2158_v37 = vpop.f32.mrf.mxu2 }
 0x1d1   : > { %v2159_v39 = vadd.f32 %v2158_v37, %v2070_v56  ;;  %v2247_v35 = vpop.f32.mrf.mxu3  ;;  %v1983_v2 = vpop.f32.mrf.mxu0 }
 0x1d2   : > { %v1984_v14 = vadd.f32 %v1983_v2, %v6960_v60  ;;  %v2072_v34 = vpop.f32.mrf.mxu1  ;;  %v5266_v2 = vld [vmem:[#allocation3 + $0xf0] sm:$0xf0] }
 0x1d3   : > { %v2248_v30 = vadd.f32 %v2247_v35, %v2159_v39  ;;  %v5982_v35 = vld [vmem:[#allocation3 + $0xe4] sm:$0xf] }
 0x1d4   : > { %v2073_v25 = vadd.f32 %v2072_v34, %v1984_v14  ;;  %2022 = vmatmul.bf16.gmra.mxu0 %v6852_v1  ;;  %v5269_v14 = vor.u32 %v5982_v35, %v5266_v2  ;;  %v6078_v34 = vld [vmem:[#allocation3 + $0x3e4] sm:$0xf] }
 0x1d5   : > { %v3400_v7 = vmax.f32 %v2248_v30, 0.0  ;;  %2111 = vmatmul.bf16.gmra.mxu1 %v6855_v5  ;;  %2200 = vmatmul.bf16.gmra.mxu2 %v6861_v49  ;;  %v5653_v49 = vor.u32 %v6078_v34, %v5650_v9 }
 0x1d6   : > { %2289 = vmatmul.bf16.gmra.mxu3 %v6865_v31  ;;  %v6014_v31 = vld [vmem:[#allocation3 + $0x1e4] sm:$0xf]  ;;  %2320 = vmatpush.bf16.msra.mxu0 %v5269_v14 }
 0x1d7   : > { %v6991_v12 = vpack.c.bf16 %v3400_v7, %v3396_v47  ;;  %v5397_v7 = vor.u32 %v6014_v31, %v5394_v53  ;;  %2587 = vmatpush.bf16.msra.mxu3 %v5653_v49 }
 0x1d8   : > { %v2161_v48 = vpop.f32.mrf.mxu2 }
 0x1d9   : > { %8096 = vst [vmem:[#allocation57_spill] sm:$0xff] %v6991_v12  ;;  %v2162_v11 = vadd.f32 %v2161_v48, %v2073_v25  ;;  %v2250_v62 = vpop.f32.mrf.mxu3  ;;  %v1985_v56 = vpop.f32.mrf.mxu0  ;;  %2409 = vmatpush.bf16.msra.mxu1 %v5397_v7 }
 0x1da   : > { %v1986_v37 = vadd.f32 %v1985_v56, %v6960_v60  ;;  %v2074_v17 = vpop.f32.mrf.mxu1 }
 0x1db   : > { %v2251_v30 = vadd.f32 %v2250_v62, %v2162_v11 }
 0x1dc   : > { %v2075_v39 = vadd.f32 %v2074_v17, %v1986_v37 }
 0x1dd   : > { %v3404_v37 = vmax.f32 %v2251_v30, 0.0 }
 0x1e0   : > { %v2163_v47 = vpop.f32.mrf.mxu2 }
 0x1e1   : > { %v2164_v25 = vadd.f32 %v2163_v47, %v2075_v39  ;;  %v2252_v3 = vpop.f32.mrf.mxu3  ;;  %v1988_v48 = vpop.f32.mrf.mxu0 }
 0x1e2   : > { %v1989_v20 = vadd.f32 %v1988_v48, %v6960_v60  ;;  %v2077_v56 = vpop.f32.mrf.mxu1 }
 0x1e3   : > { %v2253_v11 = vadd.f32 %v2252_v3, %v2164_v25 }
 0x1e4   : > { %v2078_v62 = vadd.f32 %v2077_v56, %v1989_v20  ;;  %2027 = vmatmul.bf16.gmra.mxu0 %v6872_v32 }
 0x1e5   : > { %v3408_v17 = vmax.f32 %v2253_v11, 0.0  ;;  %2116 = vmatmul.bf16.gmra.mxu1 %v6875_v18  ;;  %2205 = vmatmul.bf16.gmra.mxu2 %v6881_v22 }
 0x1e6   : > { %2294 = vmatmul.bf16.gmra.mxu3 %v6885_v54 }
 0x1e7   : > { %v6999_v31 = vpack.c.bf16 %v3408_v17, %v3404_v37  ;;  %v6042_v37 = vld [vmem:[#allocation3 + $0x2c4] sm:$0xf]  ;;  %v5506_v17 = vld [vmem:[#allocation3 + $0x2d0] sm:$0xf0] }
 0x1e8   : > { %v2166_v9 = vpop.f32.mrf.mxu2 }
 0x1e9   : > { %8097 = vst [vmem:[#allocation58_spill] sm:$0xff] %v6999_v31  ;;  %v2167_v49 = vadd.f32 %v2166_v9, %v2078_v62  ;;  %v2255_v39 = vpop.f32.mrf.mxu3  ;;  %v1990_v35 = vpop.f32.mrf.mxu0  ;;  %v5509_v9 = vor.u32 %v6042_v37, %v5506_v17  ;;  %v6006_v17 = vld [vmem:[#allocation3 + $0x1a4] sm:$0xf] }
 0x1ea   : > { %v1991_v2 = vadd.f32 %v1990_v35, %v6960_v60  ;;  %v2079_v14 = vpop.f32.mrf.mxu1  ;;  %v5978_v35 = vld [vmem:[#allocation3 + $0xc4] sm:$0xf] }
 0x1eb   : > { %v2256_v34 = vadd.f32 %v2255_v39, %v2167_v49  ;;  %2499 = vmatpush.bf16.msra.mxu2 %v5509_v9  ;;  %v5362_v9 = vld [vmem:[#allocation3 + $0x1b0] sm:$0xf0] }
 0x1ec   : > { %v2080_v53 = vadd.f32 %v2079_v14, %v1991_v2  ;;  %v5250_v2 = vld [vmem:[#allocation3 + $0xd0] sm:$0xf0]  ;;  %v6074_v14 = vld [vmem:[#allocation3 + $0x3c4] sm:$0xf] }
 0x1ed   : > { %v3412_v11 = vmax.f32 %v2256_v34, 0.0  ;;  %v5253_v34 = vor.u32 %v5978_v35, %v5250_v2  ;;  %v6038_v35 = vld [vmem:[#allocation3 + $0x2a4] sm:$0xf]  ;;  %v5365_v2 = vor.u32 %v6006_v17, %v5362_v9 }
 0x1ef   : > { %2321 = vmatpush.bf16.msra.mxu0 %v5253_v34  ;;  %v6002_v34 = vld [vmem:[#allocation3 + $0x184] sm:$0xf] }
 0x1f0   : > { %v2168_v47 = vpop.f32.mrf.mxu2 }
 0x1f1   : > { %v2169_v30 = vadd.f32 %v2168_v47, %v2080_v53  ;;  %v2257_v7 = vpop.f32.mrf.mxu3  ;;  %v1993_v25 = vpop.f32.mrf.mxu0 }
 0x1f2   : > { %v1994_v3 = vadd.f32 %v1993_v25, %v6960_v60  ;;  %v2082_v48 = vpop.f32.mrf.mxu1  ;;  %v6010_v25 = vld [vmem:[#allocation3 + $0x1c4] sm:$0xf] }
 0x1f3   : > { %v2258_v20 = vadd.f32 %v2257_v7, %v2169_v30  ;;  %v5634_v7 = vld [vmem:[#allocation3 + $0x3d0] sm:$0xf0] }
 0x1f4   : > { %v2083_v56 = vadd.f32 %v2082_v48, %v1994_v3  ;;  %2032 = vmatmul.bf16.gmra.mxu0 %v6892_v63  ;;  %v5378_v3 = vld [vmem:[#allocation3 + $0x1d0] sm:$0xf0]  ;;  %v5637_v31 = vor.u32 %v6074_v14, %v5634_v7 }
 0x1f5   : > { %v3416_v62 = vmax.f32 %v2258_v20, 0.0  ;;  %2121 = vmatmul.bf16.gmra.mxu1 %v6895_v50  ;;  %2210 = vmatmul.bf16.gmra.mxu2 %v6901_v26  ;;  %v5381_v12 = vor.u32 %v6010_v25, %v5378_v3  ;;  %v5618_v26 = vld [vmem:[#allocation3 + $0x3b0] sm:$0xf0] }
 0x1f6   : > { %2299 = vmatmul.bf16.gmra.mxu3 %v6905_v0  ;;  %v6070_v0 = vld [vmem:[#allocation3 + $0x3a4] sm:$0xf] }
 0x1f7   : > { %v7007_v49 = vpack.c.bf16 %v3416_v62, %v3412_v11  ;;  %2588 = vmatpush.bf16.msra.mxu3 %v5637_v31  ;;  %2410 = vmatpush.bf16.msra.mxu1 %v5381_v12  ;;  %v5974_v62 = vld [vmem:[#allocation3 + $0xa4] sm:$0xf]  ;;  %v5621_v14 = vor.u32 %v6070_v0, %v5618_v26  ;;  %v5602_v0 = vld [vmem:[#allocation3 + $0x390] sm:$0xf0] }
 0x1f8   : > { %v2171_v39 = vpop.f32.mrf.mxu2  ;;  %v6066_v26 = vld [vmem:[#allocation3 + $0x384] sm:$0xf] }
 0x1f9   : > { %8098 = vst [vmem:[#allocation59_spill] sm:$0xff] %v7007_v49  ;;  %v2172_v53 = vadd.f32 %v2171_v39, %v2083_v56  ;;  %v2260_v47 = vpop.f32.mrf.mxu3  ;;  %v1995_v30 = vpop.f32.mrf.mxu0  ;;  %v5234_v56 = vld [vmem:[#allocation3 + $0xb0] sm:$0xf0] }
 0x1fa   : > { %v1996_v48 = vadd.f32 %v1995_v30, %v6960_v60  ;;  %v2084_v20 = vpop.f32.mrf.mxu1  ;;  %v5237_v39 = vor.u32 %v5974_v62, %v5234_v56  ;;  %v5490_v49 = vld [vmem:[#allocation3 + $0x2b0] sm:$0xf0] }
 0x1fb   : > { %v7010_v37 = vadd.f32 %v2260_v47, %v2172_v53  ;;  %v5493_v30 = vor.u32 %v6038_v35, %v5490_v49  ;;  %2411 = vmatpush.bf16.msra.mxu1 %v5365_v2  ;;  %v5970_v53 = vld [vmem:[#allocation3 + $0x84] sm:$0xf]  ;;  %v5218_v47 = vld [vmem:[#allocation3 + $0x90] sm:$0xf0]  ;;  %2589 = vmatpush.bf16.msra.mxu3 %v5621_v14  ;;  %v5605_v35 = vor.u32 %v6066_v26, %v5602_v0 }
 0x1fc   : > { %v2085_v11 = vadd.f32 %v2084_v20, %v1996_v48  ;;  %2322 = vmatpush.bf16.msra.mxu0 %v5237_v39  ;;  %v5221_v3 = vor.u32 %v5970_v53, %v5218_v47  ;;  %v5346_v48 = vld [vmem:[#allocation3 + $0x190] sm:$0xf0]  ;;  %v6034_v20 = vld [vmem:[#allocation3 + $0x284] sm:$0xf] }
 0x1fd   : > { %2500 = vmatpush.bf16.msra.mxu2 %v5493_v30  ;;  %v5474_v62 = vld [vmem:[#allocation3 + $0x290] sm:$0xf0]  ;;  %v5349_v39 = vor.u32 %v6002_v34, %v5346_v48  ;;  %v5998_v14 = vld [vmem:[#allocation3 + $0x164] sm:$0xf] }
 0x1fe   : > { %v5477_v49 = vor.u32 %v6034_v20, %v5474_v62  ;;  %v5202_v30 = vld [vmem:[#allocation3 + $0x70] sm:$0xf0]  ;;  %v5994_v26 = vld [vmem:[#allocation3 + $0x144] sm:$0xf] }
 0x1ff   : > { %2412 = vmatpush.bf16.msra.mxu1 %v5349_v39  ;;  %v5330_v34 = vld [vmem:[#allocation3 + $0x170] sm:$0xf0]  ;;  %2590 = vmatpush.bf16.msra.mxu3 %v5605_v35 }
 0x200   : > { %v2173_v7 = vpop.f32.mrf.mxu2  ;;  %2323 = vmatpush.bf16.msra.mxu0 %v5221_v3  ;;  %v6062_v3 = vld [vmem:[#allocation3 + $0x364] sm:$0xf]  ;;  %v5586_v48 = vld [vmem:[#allocation3 + $0x370] sm:$0xf0] }
 0x201   : > { %v2174_v31 = vadd.f32 %v2173_v7, %v2085_v11  ;;  %v2262_v12 = vpop.f32.mrf.mxu3  ;;  %v1998_v25 = vpop.f32.mrf.mxu0  ;;  %v5966_v11 = vld [vmem:[#allocation3 + $0x64] sm:$0xf]  ;;  %v3420_v7 = vmax.f32 %v7010_v37, 0.0  ;;  %2501 = vmatpush.bf16.msra.mxu2 %v5477_v49  ;;  %v5589_v62 = vor.u32 %v6062_v3, %v5586_v48  ;;  %v5186_v39 = vld [vmem:[#allocation3 + $0x50] sm:$0xf0] }
 0x202   : > { %v1999_v56 = vadd.f32 %v1998_v25, %v6960_v60  ;;  %v2087_v17 = vpop.f32.mrf.mxu1  ;;  %v5205_v47 = vor.u32 %v5966_v11, %v5202_v30  ;;  %v6030_v25 = vld [vmem:[#allocation3 + $0x264] sm:$0xf]  ;;  %v5314_v49 = vld [vmem:[#allocation3 + $0x150] sm:$0xf0] }
 0x203   : > { %v2263_v9 = vadd.f32 %v2262_v12, %v2174_v31  ;;  %v5333_v31 = vor.u32 %v5998_v14, %v5330_v34  ;;  %v5458_v12 = vld [vmem:[#allocation3 + $0x270] sm:$0xf0]  ;;  %v6026_v14 = vld [vmem:[#allocation3 + $0x244] sm:$0xf]  ;;  %2591 = vmatpush.bf16.msra.mxu3 %v5589_v62 }
 0x204   : > { %v2088_v2 = vadd.f32 %v2087_v17, %v1999_v56  ;;  %2037 = vmatmul.bf16.gmra.mxu0 %v6912_v33  ;;  %v5461_v20 = vor.u32 %v6030_v25, %v5458_v12  ;;  %v5962_v17 = vld [vmem:[#allocation3 + $0x44] sm:$0xf]  ;;  %v5442_v34 = vld [vmem:[#allocation3 + $0x250] sm:$0xf0] }
 0x205   : > { %v3424_v53 = vmax.f32 %v2263_v9, 0.0  ;;  %2126 = vmatmul.bf16.gmra.mxu1 %v6915_v38  ;;  %2215 = vmatmul.bf16.gmra.mxu2 %v6921_v10  ;;  %v5189_v30 = vor.u32 %v5962_v17, %v5186_v39  ;;  %v5445_v25 = vor.u32 %v6026_v14, %v5442_v34  ;;  %v5170_v48 = vld [vmem:[#allocation3 + $0x30] sm:$0xf0] }
 0x206   : > { %2304 = vmatmul.bf16.gmra.mxu3 %v6925_v4  ;;  %2324 = vmatpush.bf16.msra.mxu0 %v5205_v47  ;;  %v5317_v47 = vor.u32 %v5994_v26, %v5314_v49  ;;  %v5298_v39 = vld [vmem:[#allocation3 + $0x130] sm:$0xf0] }
 0x207   : > { %v7018_v37 = vpack.c.bf16 %v3424_v53, %v3420_v7  ;;  %2413 = vmatpush.bf16.msra.mxu1 %v5333_v31  ;;  %2502 = vmatpush.bf16.msra.mxu2 %v5461_v20  ;;  %v6058_v7 = vld [vmem:[#allocation3 + $0x344] sm:$0xf]  ;;  %v5570_v53 = vld [vmem:[#allocation3 + $0x350] sm:$0xf0] }
 0x208   : > { %v2176_v56 = vpop.f32.mrf.mxu2  ;;  %v5573_v31 = vor.u32 %v6058_v7, %v5570_v53  ;;  %v5426_v10 = vld [vmem:[#allocation3 + $0x230] sm:$0xf0]  ;;  %v6054_v20 = vld [vmem:[#allocation3 + $0x324] sm:$0xf] }
 0x209   : > { %8099 = vst [vmem:[#allocation60_spill] sm:$0xff] %v7018_v37  ;;  %v2177_v0 = vadd.f32 %v2176_v56, %v2088_v2  ;;  %v2265_v9 = vpop.f32.mrf.mxu3  ;;  %v2000_v11 = vpop.f32.mrf.mxu0  ;;  %v5958_v2 = vld [vmem:[#allocation3 + $0x24] sm:$0xf]  ;;  %v5554_v26 = vld [vmem:[#allocation3 + $0x330] sm:$0xf0] }
 0x20a   : > { %v2001_v4 = vadd.f32 %v2000_v11, %v6960_v60  ;;  %v2089_v35 = vpop.f32.mrf.mxu1  ;;  %2325 = vmatpush.bf16.msra.mxu0 %v5189_v30  ;;  %v5990_v56 = vld [vmem:[#allocation3 + $0x124] sm:$0xf]  ;;  %v5173_v17 = vor.u32 %v5958_v2, %v5170_v48  ;;  %2592 = vmatpush.bf16.msra.mxu3 %v5573_v31  ;;  %v5282_v7 = vld [vmem:[#allocation3 + $0x110] sm:$0xf0] }
 0x20b   : > { %v2266_v12 = vadd.f32 %v2265_v9, %v2177_v0  ;;  %2414 = vmatpush.bf16.msra.mxu1 %v5317_v47  ;;  %v6022_v37 = vld [vmem:[#allocation3 + $0x224] sm:$0xf]  ;;  %2503 = vmatpush.bf16.msra.mxu2 %v5445_v25  ;;  %v5301_v11 = vor.u32 %v5990_v56, %v5298_v39  ;;  %v5557_v0 = vor.u32 %v6054_v20, %v5554_v26  ;;  %v5410_v25 = vld [vmem:[#allocation3 + $0x210] sm:$0xf0] }
 0x20c   : > { %v2090_v3 = vadd.f32 %v2089_v35, %v2001_v4  ;;  %v5429_v49 = vor.u32 %v6022_v37, %v5426_v10  ;;  %v5954_v9 = vld [vmem:[#allocation3 + $0x4] sm:$0xf]  ;;  %v5154_v4 = vld [vmem:[#allocation3 + $0x10] sm:$0xf0] }
 0x20d   : > { %v5986_v30 = vld [vmem:[#allocation3 + $0x104] sm:$0xf]  ;;  %v5157_v47 = vor.u32 %v5954_v9, %v5154_v4  ;;  %v5538_v37 = vld [vmem:[#allocation3 + $0x310] sm:$0xf0] }
 0x20e   : > { %2326 = vmatpush.bf16.msra.mxu0 %v5173_v17  ;;  %v6018_v53 = vld [vmem:[#allocation3 + $0x204] sm:$0xf]  ;;  %v5285_v31 = vor.u32 %v5986_v30, %v5282_v7  ;;  %2593 = vmatpush.bf16.msra.mxu3 %v5557_v0 }
 0x20f   : > { %2415 = vmatpush.bf16.msra.mxu1 %v5301_v11  ;;  %2504 = vmatpush.bf16.msra.mxu2 %v5429_v49  ;;  %v5413_v56 = vor.u32 %v6018_v53, %v5410_v25  ;;  %v6050_v10 = vld [vmem:[#allocation3 + $0x304] sm:$0xf] }
 0x210   : > { %v2178_v62 = vpop.f32.mrf.mxu2  ;;  %v5541_v39 = vor.u32 %v6050_v10, %v5538_v37 }
 0x211   : > { %v2179_v14 = vadd.f32 %v2178_v62, %v2090_v3  ;;  %v2267_v34 = vpop.f32.mrf.mxu3  ;;  %v2003_v35 = vpop.f32.mrf.mxu0  ;;  %v3428_v3 = vmax.f32 %v2266_v12, 0.0 }
 0x212   : > { %v2004_v2 = vadd.f32 %v2003_v35, %v6960_v60  ;;  %v2092_v48 = vpop.f32.mrf.mxu1  ;;  %2327 = vmatpush.bf16.msra.mxu0 %v5157_v47  ;;  %2594 = vmatpush.bf16.msra.mxu3 %v5541_v39 }
 0x213   : > { %v2268_v17 = vadd.f32 %v2267_v34, %v2179_v14  ;;  %2416 = vmatpush.bf16.msra.mxu1 %v5285_v31  ;;  %2505 = vmatpush.bf16.msra.mxu2 %v5413_v56 }
 0x214   : > { %v2093_v11 = vadd.f32 %v2092_v48, %v2004_v2  ;;  %2042 = vmatmul.bf16.gmra.mxu0 %v6932_v36 }
 0x215   : > { %v3432_v20 = vmax.f32 %v2268_v17, 0.0  ;;  %2131 = vmatmul.bf16.gmra.mxu1 %v6935_v27  ;;  %2220 = vmatmul.bf16.gmra.mxu2 %v6941_v23 }
 0x216   : > { %2309 = vmatmul.bf16.gmra.mxu3 %v6945_v55 }
 0x217   : > { %v7026_v26 = vpack.c.bf16 %v3432_v20, %v3428_v3 }
 0x218   : > { %v2181_v49 = vpop.f32.mrf.mxu2 }
 0x219   : > { %8100 = vst [vmem:[#allocation61_spill] sm:$0xff] %v7026_v26  ;;  %v2182_v0 = vadd.f32 %v2181_v49, %v2093_v11  ;;  %v2270_v62 = vpop.f32.mrf.mxu3  ;;  %v2005_v9 = vpop.f32.mrf.mxu0 }
 0x21a   : > { %v2006_v4 = vadd.f32 %v2005_v9, %v6960_v60  ;;  %v2094_v30 = vpop.f32.mrf.mxu1 }
 0x21b   : > { %v2271_v14 = vadd.f32 %v2270_v62, %v2182_v0 }
 0x21c   : > { %v2095_v12 = vadd.f32 %v2094_v30, %v2006_v4 }
 0x21d   : > { %v3436_v31 = vmax.f32 %v2271_v14, 0.0 }
 0x220   : > { %v2183_v34 = vpop.f32.mrf.mxu2 }
 0x221   : > { %v2184_v35 = vadd.f32 %v2183_v34, %v2095_v12  ;;  %v2272_v47 = vpop.f32.mrf.mxu3  ;;  %v2008_v7 = vpop.f32.mrf.mxu0 }
 0x222   : > { %v2009_v53 = vadd.f32 %v2008_v7, %v6960_v60  ;;  %v2097_v25 = vpop.f32.mrf.mxu1 }
 0x223   : > { %v2273_v2 = vadd.f32 %v2272_v47, %v2184_v35 }
 0x224   : > { %v2098_v48 = vadd.f32 %v2097_v25, %v2009_v53  ;;  %2047 = vmatmul.bf16.gmra.mxu0 %v6957_v59 }
 0x225   : > { %v3440_v56 = vmax.f32 %v2273_v2, 0.0  ;;  %2136 = vmatmul.bf16.gmra.mxu1 %v6963_v61  ;;  %2225 = vmatmul.bf16.gmra.mxu2 %v6970_v8 }
 0x226   : > { %2314 = vmatmul.bf16.gmra.mxu3 %v6974_v6 }
 0x227   : > { %v7034_v10 = vpack.c.bf16 %v3440_v56, %v3436_v31 }
 0x228   : > { %v2186_v37 = vpop.f32.mrf.mxu2 }
 0x229   : > { %8101 = vst [vmem:[#allocation62_spill] sm:$0xff] %v7034_v10  ;;  %v2187_v17 = vadd.f32 %v2186_v37, %v2098_v48  ;;  %v2275_v39 = vpop.f32.mrf.mxu3  ;;  %v2010_v11 = vpop.f32.mrf.mxu0 }
 0x22a   : > { %v2011_v3 = vadd.f32 %v2010_v11, %v6960_v60  ;;  %v2099_v20 = vpop.f32.mrf.mxu1 }
 0x22b   : > { %v2276_v49 = vadd.f32 %v2275_v39, %v2187_v17 }
 0x22c   : > { %v2100_v0 = vadd.f32 %v2099_v20, %v2011_v3 }
 0x22d   : > { %v3444_v47 = vmax.f32 %v2276_v49, 0.0 }
 0x230   : > { %v2188_v62 = vpop.f32.mrf.mxu2 }
 0x231   : > { %v2189_v9 = vadd.f32 %v2188_v62, %v2100_v0  ;;  %v2277_v4 = vpop.f32.mrf.mxu3  ;;  %v2013_v30 = vpop.f32.mrf.mxu0 }
 0x232   : > { %v2014_v14 = vadd.f32 %v2013_v30, %v6960_v60  ;;  %v2102_v12 = vpop.f32.mrf.mxu1 }
 0x233   : > { %v2278_v34 = vadd.f32 %v2277_v4, %v2189_v9 }
 0x234   : > { %v2103_v35 = vadd.f32 %v2102_v12, %v2014_v14  ;;  %2328 = vmatmul.bf16.vlgmr.msra.gmra.mxu0 %v6645_v13 }
 0x235   : > { %v3448_v7 = vmax.f32 %v2278_v34, 0.0  ;;  %2417 = vmatmul.bf16.vlgmr.msra.gmra.mxu1 %v6648_v15  ;;  %2506 = vmatmul.bf16.vlgmr.msra.gmra.mxu2 %v6655_v28 }
 0x236   : > { %2595 = vmatmul.bf16.vlgmr.msra.gmra.mxu3 %v6659_v29 }
 0x237   : > { %v7042_v53 = vpack.c.bf16 %v3448_v7, %v3444_v47 }
 0x238   : > { %v2191_v25 = vpop.f32.mrf.mxu2 }
 0x239   : > { %8102 = vst [vmem:[#allocation63_spill] sm:$0xff] %v7042_v53  ;;  %v2192_v2 = vadd.f32 %v2191_v25, %v2103_v35  ;;  %v2280_v48 = vpop.f32.mrf.mxu3  ;;  %v2015_v31 = vpop.f32.mrf.mxu0 }
 0x23a   : > { %v2016_v56 = vadd.f32 %v2015_v31, %v6960_v60  ;;  %v2104_v37 = vpop.f32.mrf.mxu1 }
 0x23b   : > { %v2281_v17 = vadd.f32 %v2280_v48, %v2192_v2 }
 0x23c   : > { %v2105_v39 = vadd.f32 %v2104_v37, %v2016_v56 }
 0x23d   : > { %v3452_v30 = vmax.f32 %v2281_v17, 0.0 }
 0x240   : > { %v2193_v11 = vpop.f32.mrf.mxu2 }
 0x241   : > { %v2194_v3 = vadd.f32 %v2193_v11, %v2105_v39  ;;  %v2282_v20 = vpop.f32.mrf.mxu3  ;;  %v2018_v49 = vpop.f32.mrf.mxu0 }
 0x242   : > { %v2019_v0 = vadd.f32 %v2018_v49, %v6960_v60  ;;  %v2107_v62 = vpop.f32.mrf.mxu1 }
 0x243   : > { %v2283_v9 = vadd.f32 %v2282_v20, %v2194_v3 }
 0x244   : > { %v2108_v4 = vadd.f32 %v2107_v62, %v2019_v0  ;;  %2333 = vmatmul.bf16.gmra.mxu0 %v6666_v42 }
 0x245   : > { %v3456_v14 = vmax.f32 %v2283_v9, 0.0  ;;  %2422 = vmatmul.bf16.gmra.mxu1 %v6669_v44  ;;  %2511 = vmatmul.bf16.gmra.mxu2 %v6676_v57 }
 0x246   : > { %2600 = vmatmul.bf16.gmra.mxu3 %v6680_v58 }
 0x247   : > { %v7050_v12 = vpack.c.bf16 %v3456_v14, %v3452_v30 }
 0x248   : > { %v2196_v34 = vpop.f32.mrf.mxu2 }
 0x249   : > { %8103 = vst [vmem:[#allocation64_spill] sm:$0xff] %v7050_v12  ;;  %v2197_v35 = vadd.f32 %v2196_v34, %v2108_v4  ;;  %v2285_v47 = vpop.f32.mrf.mxu3  ;;  %v2020_v7 = vpop.f32.mrf.mxu0 }
 0x24a   : > { %v2021_v25 = vadd.f32 %v2020_v7, %v6960_v60  ;;  %v2109_v2 = vpop.f32.mrf.mxu1 }
 0x24b   : > { %v2286_v48 = vadd.f32 %v2285_v47, %v2197_v35 }
 0x24c   : > { %v2110_v31 = vadd.f32 %v2109_v2, %v2021_v25 }
 0x24d   : > { %v3460_v0 = vmax.f32 %v2286_v48, 0.0 }
 0x250   : > { %v2198_v56 = vpop.f32.mrf.mxu2 }
 0x251   : > { %v2199_v37 = vadd.f32 %v2198_v56, %v2110_v31  ;;  %v2287_v17 = vpop.f32.mrf.mxu3  ;;  %v2023_v39 = vpop.f32.mrf.mxu0 }
 0x252   : > { %v2024_v11 = vadd.f32 %v2023_v39, %v6960_v60  ;;  %v2112_v3 = vpop.f32.mrf.mxu1 }
 0x253   : > { %v2288_v20 = vadd.f32 %v2287_v17, %v2199_v37 }
 0x254   : > { %v2113_v49 = vadd.f32 %v2112_v3, %v2024_v11  ;;  %2338 = vmatmul.bf16.gmra.mxu0 %v6687_v21  ;;  %v8105_v3 = vld [vmem:[#allocation12_spill] sm:$0xff] }
 0x255   : > { %v3464_v62 = vmax.f32 %v2288_v20, 0.0  ;;  %2427 = vmatmul.bf16.gmra.mxu1 %v6690_v24  ;;  %2516 = vmatmul.bf16.gmra.mxu2 %v6697_v43 }
 0x256   : > { %2605 = vmatmul.bf16.gmra.mxu3 %v6701_v45 }
 0x257   : > { %v7058_v9 = vpack.c.bf16 %v3464_v62, %v3460_v0  ;;  %v8106_v0 = vld [vmem:[#allocation13_spill] sm:$0xff]  ;;  %v8107_v62 = vld [vmem:[#allocation14_spill] sm:$0xff] }
 0x258   : > { %v2201_v4 = vpop.f32.mrf.mxu2 }
 0x259   : > { %8104 = vst [vmem:[#allocation65_spill] sm:$0xff] %v7058_v9  ;;  %v2202_v30 = vadd.f32 %v2201_v4, %v2113_v49  ;;  %v2290_v14 = vpop.f32.mrf.mxu3  ;;  %v2025_v34 = vpop.f32.mrf.mxu0  ;;  %v8108_v4 = vld [vmem:[#allocation15_spill] sm:$0xff] }
 0x25a   : > { %v2026_v35 = vadd.f32 %v2025_v34, %v6960_v60  ;;  %v2114_v47 = vpop.f32.mrf.mxu1 }
 0x25b   : > { %v2291_v7 = vadd.f32 %v2290_v14, %v2202_v30 }
 0x25c   : > { %v2115_v25 = vadd.f32 %v2114_v47, %v2026_v35 }
 0x25d   : > { %v3468_v20 = vmax.f32 %v2291_v7, 0.0 }
 0x260   : > { %v2203_v2 = vpop.f32.mrf.mxu2 }
 0x261   : > { %v2204_v48 = vadd.f32 %v2203_v2, %v2115_v25  ;;  %v2292_v31 = vpop.f32.mrf.mxu3  ;;  %v2028_v56 = vpop.f32.mrf.mxu0 }
 0x262   : > { %v2029_v37 = vadd.f32 %v2028_v56, %v6960_v60  ;;  %v2117_v17 = vpop.f32.mrf.mxu1 }
 0x263   : > { %v2293_v39 = vadd.f32 %v2292_v31, %v2204_v48 }
 0x264   : > { %v2118_v11 = vadd.f32 %v2117_v17, %v2029_v37  ;;  %2343 = vmatmul.bf16.gmra.mxu0 %v8105_v3 }
 0x265   : > { %v3472_v49 = vmax.f32 %v2293_v39, 0.0  ;;  %2432 = vmatmul.bf16.gmra.mxu1 %v8106_v0  ;;  %2521 = vmatmul.bf16.gmra.mxu2 %v8107_v62 }
 0x266   : > { %2610 = vmatmul.bf16.gmra.mxu3 %v8108_v4 }
 0x267   : > { %v7066_v30 = vpack.c.bf16 %v3472_v49, %v3468_v20  ;;  %v8110_v20 = vld [vmem:[#allocation16_spill] sm:$0xff] }
 0x268   : > { %v2206_v14 = vpop.f32.mrf.mxu2 }
 0x269   : > { %8109 = vst [vmem:[#allocation12_spill] sm:$0xff] %v7066_v30  ;;  %v2207_v34 = vadd.f32 %v2206_v14, %v2118_v11  ;;  %v2295_v35 = vpop.f32.mrf.mxu3  ;;  %v2030_v47 = vpop.f32.mrf.mxu0  ;;  %v8111_v14 = vld [vmem:[#allocation17_spill] sm:$0xff]  ;;  %v8112_v30 = vld [vmem:[#allocation18_spill] sm:$0xff] }
 0x26a   : > { %v2031_v25 = vadd.f32 %v2030_v47, %v6960_v60  ;;  %v2119_v2 = vpop.f32.mrf.mxu1  ;;  %v8113_v47 = vld [vmem:[#allocation19_spill] sm:$0xff] }
 0x26b   : > { %v2296_v48 = vadd.f32 %v2295_v35, %v2207_v34 }
 0x26c   : > { %v2120_v31 = vadd.f32 %v2119_v2, %v2031_v25 }
 0x26d   : > { %v3476_v49 = vmax.f32 %v2296_v48, 0.0 }
 0x270   : > { %v2208_v56 = vpop.f32.mrf.mxu2 }
 0x271   : > { %v2209_v7 = vadd.f32 %v2208_v56, %v2120_v31  ;;  %v2297_v37 = vpop.f32.mrf.mxu3  ;;  %v2033_v17 = vpop.f32.mrf.mxu0 }
 0x272   : > { %v2034_v39 = vadd.f32 %v2033_v17, %v6960_v60  ;;  %v2122_v9 = vpop.f32.mrf.mxu1 }
 0x273   : > { %v2298_v12 = vadd.f32 %v2297_v37, %v2209_v7 }
 0x274   : > { %v2123_v53 = vadd.f32 %v2122_v9, %v2034_v39  ;;  %2348 = vmatmul.bf16.gmra.mxu0 %v8110_v20 }
 0x275   : > { %v3480_v11 = vmax.f32 %v2298_v12, 0.0  ;;  %2437 = vmatmul.bf16.gmra.mxu1 %v8111_v14  ;;  %2526 = vmatmul.bf16.gmra.mxu2 %v8112_v30 }
 0x276   : > { %2615 = vmatmul.bf16.gmra.mxu3 %v8113_v47 }
 0x277   : > { %v7074_v34 = vpack.c.bf16 %v3480_v11, %v3476_v49  ;;  %v8115_v49 = vld [vmem:[#allocation20_spill] sm:$0xff] }
 0x278   : > { %v2211_v35 = vpop.f32.mrf.mxu2 }
 0x279   : > { %8114 = vst [vmem:[#allocation13_spill] sm:$0xff] %v7074_v34  ;;  %v2212_v25 = vadd.f32 %v2211_v35, %v2123_v53  ;;  %v2300_v2 = vpop.f32.mrf.mxu3  ;;  %v2035_v31 = vpop.f32.mrf.mxu0  ;;  %v8116_v35 = vld [vmem:[#allocation21_spill] sm:$0xff]  ;;  %v8117_v34 = vld [vmem:[#allocation22_spill] sm:$0xff] }
 0x27a   : > { %v2036_v56 = vadd.f32 %v2035_v31, %v6960_v60  ;;  %v2124_v7 = vpop.f32.mrf.mxu1  ;;  %v8118_v31 = vld [vmem:[#allocation23_spill] sm:$0xff] }
 0x27b   : > { %v2301_v9 = vadd.f32 %v2300_v2, %v2212_v25 }
 0x27c   : > { %v2125_v37 = vadd.f32 %v2124_v7, %v2036_v56 }
 0x27d   : > { %v3484_v11 = vmax.f32 %v2301_v9, 0.0 }
 0x280   : > { %v2213_v17 = vpop.f32.mrf.mxu2 }
 0x281   : > { %v2214_v48 = vadd.f32 %v2213_v17, %v2125_v37  ;;  %v2302_v12 = vpop.f32.mrf.mxu3  ;;  %v2038_v39 = vpop.f32.mrf.mxu0 }
 0x282   : > { %v2039_v10 = vadd.f32 %v2038_v39, %v6960_v60  ;;  %v2127_v26 = vpop.f32.mrf.mxu1 }
 0x283   : > { %v2303_v30 = vadd.f32 %v2302_v12, %v2214_v48 }
 0x284   : > { %v2128_v47 = vadd.f32 %v2127_v26, %v2039_v10  ;;  %2353 = vmatmul.bf16.gmra.mxu0 %v8115_v49 }
 0x285   : > { %v3488_v53 = vmax.f32 %v2303_v30, 0.0  ;;  %2442 = vmatmul.bf16.gmra.mxu1 %v8116_v35  ;;  %2531 = vmatmul.bf16.gmra.mxu2 %v8117_v34 }
 0x286   : > { %2620 = vmatmul.bf16.gmra.mxu3 %v8118_v31 }
 0x287   : > { %v7082_v25 = vpack.c.bf16 %v3488_v53, %v3484_v11  ;;  %v8120_v11 = vld [vmem:[#allocation24_spill] sm:$0xff] }
 0x288   : > { %v2216_v2 = vpop.f32.mrf.mxu2 }
 0x289   : > { %8119 = vst [vmem:[#allocation14_spill] sm:$0xff] %v7082_v25  ;;  %v2217_v56 = vadd.f32 %v2216_v2, %v2128_v47  ;;  %v2305_v7 = vpop.f32.mrf.mxu3  ;;  %v2040_v37 = vpop.f32.mrf.mxu0  ;;  %v8121_v2 = vld [vmem:[#allocation25_spill] sm:$0xff]  ;;  %v8122_v25 = vld [vmem:[#allocation26_spill] sm:$0xff] }
 0x28a   : > { %v2041_v17 = vadd.f32 %v2040_v37, %v6960_v60  ;;  %v2129_v48 = vpop.f32.mrf.mxu1  ;;  %v8123_v37 = vld [vmem:[#allocation27_spill] sm:$0xff] }
 0x28b   : > { %v2306_v26 = vadd.f32 %v2305_v7, %v2217_v56 }
 0x28c   : > { %v2130_v10 = vadd.f32 %v2129_v48, %v2041_v17 }
 0x28d   : > { %v3492_v53 = vmax.f32 %v2306_v26, 0.0 }
 0x290   : > { %v2218_v12 = vpop.f32.mrf.mxu2 }
 0x291   : > { %v2219_v9 = vadd.f32 %v2218_v12, %v2130_v10  ;;  %v2307_v30 = vpop.f32.mrf.mxu3  ;;  %v2043_v39 = vpop.f32.mrf.mxu0 }
 0x292   : > { %v2044_v35 = vadd.f32 %v2043_v39, %v6960_v60  ;;  %v2132_v34 = vpop.f32.mrf.mxu1 }
 0x293   : > { %v2308_v49 = vadd.f32 %v2307_v30, %v2219_v9 }
 0x294   : > { %v2133_v31 = vadd.f32 %v2132_v34, %v2044_v35  ;;  %2358 = vmatmul.bf16.gmra.mxu0 %v8120_v11 }
 0x295   : > { %v3496_v47 = vmax.f32 %v2308_v49, 0.0  ;;  %2447 = vmatmul.bf16.gmra.mxu1 %v8121_v2  ;;  %2536 = vmatmul.bf16.gmra.mxu2 %v8122_v25 }
 0x296   : > { %2625 = vmatmul.bf16.gmra.mxu3 %v8123_v37 }
 0x297   : > { %v7090_v56 = vpack.c.bf16 %v3496_v47, %v3492_v53  ;;  %v8125_v47 = vld [vmem:[#allocation28_spill] sm:$0xff] }
 0x298   : > { %v2221_v7 = vpop.f32.mrf.mxu2 }
 0x299   : > { %8124 = vst [vmem:[#allocation15_spill] sm:$0xff] %v7090_v56  ;;  %v2222_v17 = vadd.f32 %v2221_v7, %v2133_v31  ;;  %v2310_v48 = vpop.f32.mrf.mxu3  ;;  %v2045_v10 = vpop.f32.mrf.mxu0  ;;  %v8126_v7 = vld [vmem:[#allocation29_spill] sm:$0xff] }
 0x29a   : > { %v2046_v12 = vadd.f32 %v2045_v10, %v6960_v60  ;;  %v2134_v9 = vpop.f32.mrf.mxu1  ;;  %v8127_v10 = vld [vmem:[#allocation30_spill] sm:$0xff] }
 0x29b   : > { %v2311_v34 = vadd.f32 %v2310_v48, %v2222_v17 }
 0x29c   : > { %v2135_v35 = vadd.f32 %v2134_v9, %v2046_v12 }
 0x29d   : > { %v3500_v53 = vmax.f32 %v2311_v34, 0.0 }
 0x2a0   : > { %v2223_v30 = vpop.f32.mrf.mxu2 }
 0x2a1   : > { %v2224_v26 = vadd.f32 %v2223_v30, %v2135_v35  ;;  %v2312_v49 = vpop.f32.mrf.mxu3  ;;  %v2048_v39 = vpop.f32.mrf.mxu0 }
 0x2a2   : > { %v2049_v2 = vadd.f32 %v2048_v39, %v6960_v60  ;;  %v2137_v25 = vpop.f32.mrf.mxu1 }
 0x2a3   : > { %v2313_v11 = vadd.f32 %v2312_v49, %v2224_v26  ;;  %v8129_v49 = vld [vmem:[#allocation55_spill] sm:$0xff] }
 0x2a4   : > { %v2138_v37 = vadd.f32 %v2137_v25, %v2049_v2  ;;  %2363 = vmatmul.bf16.gmra.mxu0 %v6792_v51  ;;  %v7102_v34 = vperm.slane %v8129_v49, 1 }
 0x2a5   : > { %v3504_v31 = vmax.f32 %v2313_v11, 0.0  ;;  %2452 = vmatmul.bf16.gmra.mxu1 %v8125_v47  ;;  %2541 = vmatmul.bf16.gmra.mxu2 %v8126_v7 }
 0x2a6   : > { %2630 = vmatmul.bf16.gmra.mxu3 %v8127_v10 }
 0x2a7   : > { %v7098_v17 = vpack.c.bf16 %v3504_v31, %v3500_v53 }
 0x2a8   : > { %v2226_v48 = vpop.f32.mrf.mxu2 }
 0x2a9   : > { %8128 = vst [vmem:[#allocation16_spill] sm:$0xff] %v7098_v17  ;;  %v2227_v12 = vadd.f32 %v2226_v48, %v2138_v37  ;;  %v2315_v9 = vpop.f32.mrf.mxu3  ;;  %v2050_v35 = vpop.f32.mrf.mxu0 }
 0x2aa   : > { %v2051_v30 = vadd.f32 %v2050_v35, %v6960_v60  ;;  %v2139_v26 = vpop.f32.mrf.mxu1 }
 0x2ab   : > { %v2316_v25 = vadd.f32 %v2315_v9, %v2227_v12 }
 0x2ac   : > { %v2140_v2 = vadd.f32 %v2139_v26, %v2051_v30 }
 0x2ad   : > { %v3508_v37 = vmax.f32 %v2316_v25, 0.0 }
 0x2b0   : > { %v2228_v11 = vpop.f32.mrf.mxu2 }
 0x2b1   : > { %v2229_v39 = vadd.f32 %v2228_v11, %v2140_v2  ;;  %v2317_v56 = vpop.f32.mrf.mxu3  ;;  %v2329_v7 = vpop.f32.mrf.mxu0 }
 0x2b2   : > { %v2330_v10 = vadd.f32 %v2329_v7, %v7102_v34  ;;  %v2418_v53 = vpop.f32.mrf.mxu1 }
 0x2b3   : > { %v2318_v31 = vadd.f32 %v2317_v56, %v2229_v39 }
 0x2b4   : > { %v2419_v17 = vadd.f32 %v2418_v53, %v2330_v10  ;;  %2368 = vmatmul.bf16.gmra.mxu0 %v6812_v40 }
 0x2b5   : > { %v3512_v48 = vmax.f32 %v2318_v31, 0.0  ;;  %2457 = vmatmul.bf16.gmra.mxu1 %v6815_v46  ;;  %2546 = vmatmul.bf16.gmra.mxu2 %v6821_v16 }
 0x2b6   : > { %2635 = vmatmul.bf16.gmra.mxu3 %v6825_v19 }
 0x2b7   : > { %v7109_v60 = vpack.c.bf16 %v3512_v48, %v3508_v37  ;;  %v8131_v48 = vld [vmem:[#allocation37_spill] sm:$0xff] }
 0x2b8   : > { %v2507_v12 = vpop.f32.mrf.mxu2 }
 0x2b9   : > { %8130 = vst [vmem:[#allocation17_spill] sm:$0xff] %v7109_v60  ;;  %v2508_v9 = vadd.f32 %v2507_v12, %v2419_v17  ;;  %v2596_v35 = vpop.f32.mrf.mxu3  ;;  %v2331_v30 = vpop.f32.mrf.mxu0  ;;  %v8132_v12 = vld [vmem:[#allocation38_spill] sm:$0xff] }
 0x2ba   : > { %v2332_v7 = vadd.f32 %v2331_v30, %v7102_v34  ;;  %v2420_v56 = vpop.f32.mrf.mxu1 }
 0x2bb   : > { %v2597_v10 = vadd.f32 %v2596_v35, %v2508_v9 }
 0x2bc   : > { %v2421_v26 = vadd.f32 %v2420_v56, %v2332_v7 }
 0x2bd   : > { %v3389_v37 = vmax.f32 %v2597_v10, 0.0 }
 0x2c0   : > { %v2509_v2 = vpop.f32.mrf.mxu2 }
 0x2c1   : > { %v2510_v25 = vadd.f32 %v2509_v2, %v2421_v26  ;;  %v2598_v49 = vpop.f32.mrf.mxu3  ;;  %v2334_v11 = vpop.f32.mrf.mxu0 }
 0x2c2   : > { %v2335_v39 = vadd.f32 %v2334_v11, %v7102_v34  ;;  %v2423_v53 = vpop.f32.mrf.mxu1 }
 0x2c3   : > { %v2599_v31 = vadd.f32 %v2598_v49, %v2510_v25 }
 0x2c4   : > { %v2424_v19 = vadd.f32 %v2423_v53, %v2335_v39  ;;  %2373 = vmatmul.bf16.gmra.mxu0 %v6832_v41 }
 0x2c5   : > { %v3393_v17 = vmax.f32 %v2599_v31, 0.0  ;;  %2462 = vmatmul.bf16.gmra.mxu1 %v6835_v52  ;;  %2551 = vmatmul.bf16.gmra.mxu2 %v8131_v48 }
 0x2c6   : > { %2640 = vmatmul.bf16.gmra.mxu3 %v8132_v12 }
 0x2c7   : > { %v7117_v9 = vpack.c.bf16 %v3393_v17, %v3389_v37  ;;  %v8134_v17 = vld [vmem:[#allocation41_spill] sm:$0xff] }
 0x2c8   : > { %v2512_v35 = vpop.f32.mrf.mxu2 }
 0x2c9   : > { %8133 = vst [vmem:[#allocation28_spill] sm:$0xff] %v7117_v9  ;;  %v2513_v30 = vadd.f32 %v2512_v35, %v2424_v19  ;;  %v2601_v7 = vpop.f32.mrf.mxu3  ;;  %v2336_v56 = vpop.f32.mrf.mxu0  ;;  %v8135_v35 = vld [vmem:[#allocation42_spill] sm:$0xff] }
 0x2ca   : > { %v2337_v26 = vadd.f32 %v2336_v56, %v7102_v34  ;;  %v2425_v2 = vpop.f32.mrf.mxu1 }
 0x2cb   : > { %v2602_v25 = vadd.f32 %v2601_v7, %v2513_v30  ;;  %v5528_v30 = vld [vmem:[#allocation3 + $0x2e8] sm:$0xf]  ;;  %v6049_v7 = vld [vmem:[#allocation3 + $0x2f4] sm:$0xf0] }
 0x2cc   : > { %v2426_v49 = vadd.f32 %v2425_v2, %v2337_v26  ;;  %v5529_v56 = vor.u32 %v6049_v7, %v5528_v30  ;;  %v6017_v30 = vld [vmem:[#allocation3 + $0x1f4] sm:$0xf0] }
 0x2cd   : > { %v3397_v37 = vmax.f32 %v2602_v25, 0.0 }
 0x2ce   : > { %2854 = vmatpush.bf16.msrb.mxu2 %v5529_v56 }
 0x2d0   : > { %v2514_v11 = vpop.f32.mrf.mxu2 }
 0x2d1   : > { %v2515_v10 = vadd.f32 %v2514_v11, %v2426_v49  ;;  %v2603_v39 = vpop.f32.mrf.mxu3  ;;  %v2339_v53 = vpop.f32.mrf.mxu0 }
 0x2d2   : > { %v2340_v31 = vadd.f32 %v2339_v53, %v7102_v34  ;;  %v2428_v60 = vpop.f32.mrf.mxu1  ;;  %v5272_v53 = vld [vmem:[#allocation3 + $0xe8] sm:$0xf] }
 0x2d3   : > { %v2604_v48 = vadd.f32 %v2603_v39, %v2515_v10 }
 0x2d4   : > { %v2429_v12 = vadd.f32 %v2428_v60, %v2340_v31  ;;  %2378 = vmatmul.bf16.gmra.mxu0 %v6852_v1  ;;  %v5985_v31 = vld [vmem:[#allocation3 + $0xf4] sm:$0xf0] }
 0x2d5   : > { %v3401_v19 = vmax.f32 %v2604_v48, 0.0  ;;  %2467 = vmatmul.bf16.gmra.mxu1 %v6855_v5  ;;  %2556 = vmatmul.bf16.gmra.mxu2 %v8134_v17  ;;  %v5273_v9 = vor.u32 %v5985_v31, %v5272_v53  ;;  %v5656_v17 = vld [vmem:[#allocation3 + $0x3e8] sm:$0xf] }
 0x2d6   : > { %2645 = vmatmul.bf16.gmra.mxu3 %v8135_v35  ;;  %v6081_v35 = vld [vmem:[#allocation3 + $0x3f4] sm:$0xf0]  ;;  %v5400_v5 = vld [vmem:[#allocation3 + $0x1e8] sm:$0xf] }
 0x2d7   : > { %v7125_v26 = vpack.c.bf16 %v3401_v19, %v3397_v37  ;;  %v5657_v1 = vor.u32 %v6081_v35, %v5656_v17  ;;  %2676 = vmatpush.bf16.msrb.mxu0 %v5273_v9  ;;  %v5401_v19 = vor.u32 %v6017_v30, %v5400_v5 }
 0x2d8   : > { %v2517_v2 = vpop.f32.mrf.mxu2 }
 0x2d9   : > { %8136 = vst [vmem:[#allocation55_spill] sm:$0xff] %v7125_v26  ;;  %v2518_v49 = vadd.f32 %v2517_v2, %v2429_v12  ;;  %v2606_v11 = vpop.f32.mrf.mxu3  ;;  %v2341_v10 = vpop.f32.mrf.mxu0  ;;  %2943 = vmatpush.bf16.msrb.mxu3 %v5657_v1  ;;  %2765 = vmatpush.bf16.msrb.mxu1 %v5401_v19 }
 0x2da   : > { %v2342_v60 = vadd.f32 %v2341_v10, %v7102_v34  ;;  %v2430_v25 = vpop.f32.mrf.mxu1 }
 0x2db   : > { %v2607_v48 = vadd.f32 %v2606_v11, %v2518_v49 }
 0x2dc   : > { %v2431_v39 = vadd.f32 %v2430_v25, %v2342_v60 }
 0x2dd   : > { %v3405_v60 = vmax.f32 %v2607_v48, 0.0 }
 0x2e0   : > { %v2519_v37 = vpop.f32.mrf.mxu2 }
 0x2e1   : > { %v2520_v12 = vadd.f32 %v2519_v37, %v2431_v39  ;;  %v2608_v7 = vpop.f32.mrf.mxu3  ;;  %v2344_v2 = vpop.f32.mrf.mxu0 }
 0x2e2   : > { %v2345_v56 = vadd.f32 %v2344_v2, %v7102_v34  ;;  %v2433_v10 = vpop.f32.mrf.mxu1 }
 0x2e3   : > { %v2609_v49 = vadd.f32 %v2608_v7, %v2520_v12 }
 0x2e4   : > { %v2434_v11 = vadd.f32 %v2433_v10, %v2345_v56  ;;  %2383 = vmatmul.bf16.gmra.mxu0 %v6872_v32 }
 0x2e5   : > { %v3409_v25 = vmax.f32 %v2609_v49, 0.0  ;;  %2472 = vmatmul.bf16.gmra.mxu1 %v6875_v18  ;;  %2561 = vmatmul.bf16.gmra.mxu2 %v6881_v22 }
 0x2e6   : > { %2650 = vmatmul.bf16.gmra.mxu3 %v6885_v54 }
 0x2e7   : > { %v7133_v5 = vpack.c.bf16 %v3409_v25, %v3405_v60  ;;  %v8138_v60 = vld [vmem:[#allocation49_spill] sm:$0xff]  ;;  %v8139_v25 = vld [vmem:[#allocation50_spill] sm:$0xff] }
 0x2e8   : > { %v2522_v9 = vpop.f32.mrf.mxu2 }
 0x2e9   : > { %8137 = vst [vmem:[#allocation66_spill] sm:$0xff] %v7133_v5  ;;  %v2523_v1 = vadd.f32 %v2522_v9, %v2434_v11  ;;  %v2611_v17 = vpop.f32.mrf.mxu3  ;;  %v2346_v35 = vpop.f32.mrf.mxu0  ;;  %v5512_v9 = vld [vmem:[#allocation3 + $0x2c8] sm:$0xf] }
 0x2ea   : > { %v2347_v39 = vadd.f32 %v2346_v35, %v7102_v34  ;;  %v2435_v53 = vpop.f32.mrf.mxu1 }
 0x2eb   : > { %v2612_v31 = vadd.f32 %v2611_v17, %v2523_v1  ;;  %v6045_v1 = vld [vmem:[#allocation3 + $0x2d4] sm:$0xf0] }
 0x2ec   : > { %v2436_v30 = vadd.f32 %v2435_v53, %v2347_v39  ;;  %v5513_v17 = vor.u32 %v6045_v1, %v5512_v9  ;;  %v5256_v53 = vld [vmem:[#allocation3 + $0xc8] sm:$0xf] }
 0x2ed   : > { %v3413_v49 = vmax.f32 %v2612_v31, 0.0  ;;  %v5368_v1 = vld [vmem:[#allocation3 + $0x1a8] sm:$0xf] }
 0x2ee   : > { %2855 = vmatpush.bf16.msrb.mxu2 %v5513_v17  ;;  %v6009_v17 = vld [vmem:[#allocation3 + $0x1b4] sm:$0xf0] }
 0x2f0   : > { %v2524_v37 = vpop.f32.mrf.mxu2 }
 0x2f1   : > { %v2525_v48 = vadd.f32 %v2524_v37, %v2436_v30  ;;  %v2613_v19 = vpop.f32.mrf.mxu3  ;;  %v2349_v12 = vpop.f32.mrf.mxu0  ;;  %v5981_v30 = vld [vmem:[#allocation3 + $0xd4] sm:$0xf0]  ;;  %v5640_v37 = vld [vmem:[#allocation3 + $0x3c8] sm:$0xf] }
 0x2f2   : > { %v2350_v7 = vadd.f32 %v2349_v12, %v7102_v34  ;;  %v2438_v2 = vpop.f32.mrf.mxu1  ;;  %v5257_v31 = vor.u32 %v5981_v30, %v5256_v53  ;;  %v5496_v53 = vld [vmem:[#allocation3 + $0x2a8] sm:$0xf]  ;;  %v5369_v30 = vor.u32 %v6009_v17, %v5368_v1 }
 0x2f3   : > { %v2614_v56 = vadd.f32 %v2613_v19, %v2525_v48 }
 0x2f4   : > { %v2439_v10 = vadd.f32 %v2438_v2, %v2350_v7  ;;  %2388 = vmatmul.bf16.gmra.mxu0 %v6892_v63  ;;  %v6077_v7 = vld [vmem:[#allocation3 + $0x3d4] sm:$0xf0]  ;;  %v5384_v2 = vld [vmem:[#allocation3 + $0x1c8] sm:$0xf] }
 0x2f5   : > { %v3417_v11 = vmax.f32 %v2614_v56, 0.0  ;;  %2477 = vmatmul.bf16.gmra.mxu1 %v6895_v50  ;;  %2566 = vmatmul.bf16.gmra.mxu2 %v8138_v60  ;;  %v6013_v56 = vld [vmem:[#allocation3 + $0x1d4] sm:$0xf0]  ;;  %v5624_v50 = vld [vmem:[#allocation3 + $0x3a8] sm:$0xf] }
 0x2f6   : > { %2655 = vmatmul.bf16.gmra.mxu3 %v8139_v25  ;;  %v5641_v25 = vor.u32 %v6077_v7, %v5640_v37  ;;  %v5385_v60 = vor.u32 %v6013_v56, %v5384_v2  ;;  %2677 = vmatpush.bf16.msrb.mxu0 %v5257_v31  ;;  %v6073_v63 = vld [vmem:[#allocation3 + $0x3b4] sm:$0xf0]  ;;  %v5480_v56 = vld [vmem:[#allocation3 + $0x288] sm:$0xf] }
 0x2f7   : > { %v7141_v35 = vpack.c.bf16 %v3417_v11, %v3413_v49  ;;  %v5240_v11 = vld [vmem:[#allocation3 + $0xa8] sm:$0xf]  ;;  %v5625_v37 = vor.u32 %v6073_v63, %v5624_v50  ;;  %v6005_v2 = vld [vmem:[#allocation3 + $0x194] sm:$0xf0] }
 0x2f8   : > { %v2527_v39 = vpop.f32.mrf.mxu2  ;;  %2944 = vmatpush.bf16.msrb.mxu3 %v5641_v25  ;;  %2766 = vmatpush.bf16.msrb.mxu1 %v5385_v60  ;;  %v5608_v50 = vld [vmem:[#allocation3 + $0x388] sm:$0xf]  ;;  %v6069_v63 = vld [vmem:[#allocation3 + $0x394] sm:$0xf0] }
 0x2f9   : > { %8140 = vst [vmem:[#allocation67_spill] sm:$0xff] %v7141_v35  ;;  %v2528_v48 = vadd.f32 %v2527_v39, %v2439_v10  ;;  %v2616_v19 = vpop.f32.mrf.mxu3  ;;  %v2351_v12 = vpop.f32.mrf.mxu0  ;;  %v5977_v10 = vld [vmem:[#allocation3 + $0xb4] sm:$0xf0] }
 0x2fa   : > { %v2352_v5 = vadd.f32 %v2351_v12, %v7102_v34  ;;  %v2440_v26 = vpop.f32.mrf.mxu1  ;;  %v5241_v39 = vor.u32 %v5977_v10, %v5240_v11  ;;  %v6041_v35 = vld [vmem:[#allocation3 + $0x2b4] sm:$0xf0] }
 0x2fb   : > { %v7144_v9 = vadd.f32 %v2616_v19, %v2528_v48  ;;  %v5497_v12 = vor.u32 %v6041_v35, %v5496_v53  ;;  %v5224_v48 = vld [vmem:[#allocation3 + $0x88] sm:$0xf]  ;;  %v5973_v19 = vld [vmem:[#allocation3 + $0x94] sm:$0xf0]  ;;  %v5609_v53 = vor.u32 %v6069_v63, %v5608_v50 }
 0x2fc   : > { %v2441_v49 = vadd.f32 %v2440_v26, %v2352_v5  ;;  %2678 = vmatpush.bf16.msrb.mxu0 %v5241_v39  ;;  %2767 = vmatpush.bf16.msrb.mxu1 %v5369_v30  ;;  %v5352_v26 = vld [vmem:[#allocation3 + $0x188] sm:$0xf]  ;;  %v5225_v31 = vor.u32 %v5973_v19, %v5224_v48  ;;  %v6037_v11 = vld [vmem:[#allocation3 + $0x294] sm:$0xf0]  ;;  %v8141_v19 = vld [vmem:[#allocation53_spill] sm:$0xff] }
 0x2fd   : > { %2856 = vmatpush.bf16.msrb.mxu2 %v5497_v12  ;;  %2945 = vmatpush.bf16.msrb.mxu3 %v5625_v37  ;;  %v5353_v39 = vor.u32 %v6005_v2, %v5352_v26  ;;  %v5481_v35 = vor.u32 %v6037_v11, %v5480_v56  ;;  %v5969_v12 = vld [vmem:[#allocation3 + $0x74] sm:$0xf0]  ;;  %v5336_v37 = vld [vmem:[#allocation3 + $0x168] sm:$0xf] }
 0x2fe   : > { %v5464_v2 = vld [vmem:[#allocation3 + $0x268] sm:$0xf]  ;;  %v6065_v11 = vld [vmem:[#allocation3 + $0x374] sm:$0xf0] }
 0x2ff   : > { %v5592_v56 = vld [vmem:[#allocation3 + $0x368] sm:$0xf]  ;;  %v5965_v63 = vld [vmem:[#allocation3 + $0x54] sm:$0xf0] }
 0x300   : > { %v2529_v7 = vpop.f32.mrf.mxu2  ;;  %2679 = vmatpush.bf16.msrb.mxu0 %v5225_v31  ;;  %2768 = vmatpush.bf16.msrb.mxu1 %v5353_v39  ;;  %v6033_v31 = vld [vmem:[#allocation3 + $0x274] sm:$0xf0]  ;;  %v5192_v50 = vld [vmem:[#allocation3 + $0x48] sm:$0xf] }
 0x301   : > { %v2530_v5 = vadd.f32 %v2529_v7, %v2441_v49  ;;  %v2618_v60 = vpop.f32.mrf.mxu3  ;;  %v2354_v25 = vpop.f32.mrf.mxu0  ;;  %v5208_v49 = vld [vmem:[#allocation3 + $0x68] sm:$0xf]  ;;  %v3421_v7 = vmax.f32 %v7144_v9, 0.0  ;;  %2857 = vmatpush.bf16.msrb.mxu2 %v5481_v35  ;;  %2946 = vmatpush.bf16.msrb.mxu3 %v5609_v53  ;;  %v5997_v35 = vld [vmem:[#allocation3 + $0x154] sm:$0xf0] }
 0x302   : > { %v2355_v10 = vadd.f32 %v2354_v25, %v7102_v34  ;;  %v2443_v1 = vpop.f32.mrf.mxu1  ;;  %v5209_v26 = vor.u32 %v5969_v12, %v5208_v49  ;;  %v6001_v25 = vld [vmem:[#allocation3 + $0x174] sm:$0xf0] }
 0x303   : > { %v2619_v17 = vadd.f32 %v2618_v60, %v2530_v5  ;;  %v8142_v5 = vld [vmem:[#allocation54_spill] sm:$0xff]  ;;  %v5337_v60 = vor.u32 %v6001_v25, %v5336_v37  ;;  %v5448_v37 = vld [vmem:[#allocation3 + $0x248] sm:$0xf] }
 0x304   : > { %v2444_v30 = vadd.f32 %v2443_v1, %v2355_v10  ;;  %2393 = vmatmul.bf16.gmra.mxu0 %v6912_v33  ;;  %v5465_v10 = vor.u32 %v6033_v31, %v5464_v2  ;;  %v5593_v1 = vor.u32 %v6065_v11, %v5592_v56  ;;  %v6029_v25 = vld [vmem:[#allocation3 + $0x254] sm:$0xf0] }
 0x305   : > { %v3425_v48 = vmax.f32 %v2619_v17, 0.0  ;;  %2482 = vmatmul.bf16.gmra.mxu1 %v6915_v38  ;;  %2571 = vmatmul.bf16.gmra.mxu2 %v8141_v19  ;;  %v5320_v17 = vld [vmem:[#allocation3 + $0x148] sm:$0xf]  ;;  %v5449_v2 = vor.u32 %v6029_v25, %v5448_v37  ;;  %v5961_v11 = vld [vmem:[#allocation3 + $0x34] sm:$0xf0] }
 0x306   : > { %2660 = vmatmul.bf16.gmra.mxu3 %v8142_v5  ;;  %2680 = vmatpush.bf16.msrb.mxu0 %v5209_v26  ;;  %v5193_v5 = vor.u32 %v5965_v63, %v5192_v50  ;;  %v5321_v26 = vor.u32 %v5997_v35, %v5320_v17  ;;  %v5993_v63 = vld [vmem:[#allocation3 + $0x134] sm:$0xf0] }
 0x307   : > { %v7152_v9 = vpack.c.bf16 %v3425_v48, %v3421_v7  ;;  %2769 = vmatpush.bf16.msrb.mxu1 %v5337_v60  ;;  %2858 = vmatpush.bf16.msrb.mxu2 %v5465_v10  ;;  %v5576_v7 = vld [vmem:[#allocation3 + $0x348] sm:$0xf]  ;;  %v6061_v48 = vld [vmem:[#allocation3 + $0x354] sm:$0xf0] }
 0x308   : > { %v2532_v39 = vpop.f32.mrf.mxu2  ;;  %2947 = vmatpush.bf16.msrb.mxu3 %v5593_v1  ;;  %v5577_v60 = vor.u32 %v6061_v48, %v5576_v7  ;;  %v6025_v33 = vld [vmem:[#allocation3 + $0x234] sm:$0xf0]  ;;  %v5560_v10 = vld [vmem:[#allocation3 + $0x328] sm:$0xf] }
 0x309   : > { %8143 = vst [vmem:[#allocation68_spill] sm:$0xff] %v7152_v9  ;;  %v2533_v49 = vadd.f32 %v2532_v39, %v2444_v30  ;;  %v2621_v12 = vpop.f32.mrf.mxu3  ;;  %v2356_v19 = vpop.f32.mrf.mxu0  ;;  %v5176_v30 = vld [vmem:[#allocation3 + $0x28] sm:$0xf]  ;;  %v6057_v17 = vld [vmem:[#allocation3 + $0x334] sm:$0xf0] }
 0x30a   : > { %v2357_v38 = vadd.f32 %v2356_v19, %v7102_v34  ;;  %v2445_v53 = vpop.f32.mrf.mxu1  ;;  %2681 = vmatpush.bf16.msrb.mxu0 %v5193_v5  ;;  %v5304_v39 = vld [vmem:[#allocation3 + $0x128] sm:$0xf]  ;;  %v5177_v50 = vor.u32 %v5961_v11, %v5176_v30  ;;  %v5989_v7 = vld [vmem:[#allocation3 + $0x114] sm:$0xf0] }
 0x30b   : > { %v2622_v31 = vadd.f32 %v2621_v12, %v2533_v49  ;;  %2770 = vmatpush.bf16.msrb.mxu1 %v5321_v26  ;;  %v5432_v9 = vld [vmem:[#allocation3 + $0x228] sm:$0xf]  ;;  %2859 = vmatpush.bf16.msrb.mxu2 %v5449_v2  ;;  %v5305_v19 = vor.u32 %v5993_v63, %v5304_v39  ;;  %v5561_v49 = vor.u32 %v6057_v17, %v5560_v10  ;;  %v6021_v2 = vld [vmem:[#allocation3 + $0x214] sm:$0xf0] }
 0x30c   : > { %v2446_v56 = vadd.f32 %v2445_v53, %v2357_v38  ;;  %2948 = vmatpush.bf16.msrb.mxu3 %v5577_v60  ;;  %v5433_v35 = vor.u32 %v6025_v33, %v5432_v9  ;;  %v5160_v5 = vld [vmem:[#allocation3 + $0x8] sm:$0xf]  ;;  %v5957_v38 = vld [vmem:[#allocation3 + $0x14] sm:$0xf0] }
 0x30d   : > { %v5288_v12 = vld [vmem:[#allocation3 + $0x108] sm:$0xf]  ;;  %v5161_v26 = vor.u32 %v5957_v38, %v5160_v5  ;;  %v6053_v9 = vld [vmem:[#allocation3 + $0x314] sm:$0xf0] }
 0x30e   : > { %2682 = vmatpush.bf16.msrb.mxu0 %v5177_v50  ;;  %v5416_v48 = vld [vmem:[#allocation3 + $0x208] sm:$0xf]  ;;  %v5289_v60 = vor.u32 %v5989_v7, %v5288_v12 }
 0x30f   : > { %2771 = vmatpush.bf16.msrb.mxu1 %v5305_v19  ;;  %2860 = vmatpush.bf16.msrb.mxu2 %v5433_v35  ;;  %v5417_v39 = vor.u32 %v6021_v2, %v5416_v48  ;;  %v5544_v33 = vld [vmem:[#allocation3 + $0x308] sm:$0xf] }
 0x310   : > { %v2534_v1 = vpop.f32.mrf.mxu2  ;;  %2949 = vmatpush.bf16.msrb.mxu3 %v5561_v49  ;;  %v5545_v63 = vor.u32 %v6053_v9, %v5544_v33 }
 0x311   : > { %v2535_v37 = vadd.f32 %v2534_v1, %v2446_v56  ;;  %v2623_v25 = vpop.f32.mrf.mxu3  ;;  %v2359_v53 = vpop.f32.mrf.mxu0  ;;  %v3429_v56 = vmax.f32 %v2622_v31, 0.0 }
 0x312   : > { %v2360_v30 = vadd.f32 %v2359_v53, %v7102_v34  ;;  %v2448_v11 = vpop.f32.mrf.mxu1  ;;  %2683 = vmatpush.bf16.msrb.mxu0 %v5161_v26 }
 0x313   : > { %v2624_v50 = vadd.f32 %v2623_v25, %v2535_v37  ;;  %2772 = vmatpush.bf16.msrb.mxu1 %v5289_v60  ;;  %2861 = vmatpush.bf16.msrb.mxu2 %v5417_v39 }
 0x314   : > { %v2449_v19 = vadd.f32 %v2448_v11, %v2360_v30  ;;  %2398 = vmatmul.bf16.gmra.mxu0 %v6932_v36  ;;  %2950 = vmatpush.bf16.msrb.mxu3 %v5545_v63 }
 0x315   : > { %v3433_v10 = vmax.f32 %v2624_v50, 0.0  ;;  %2487 = vmatmul.bf16.gmra.mxu1 %v6935_v27  ;;  %2576 = vmatmul.bf16.gmra.mxu2 %v6941_v23 }
 0x316   : > { %2665 = vmatmul.bf16.gmra.mxu3 %v6945_v55 }
 0x317   : > { %v7160_v17 = vpack.c.bf16 %v3433_v10, %v3429_v56 }
 0x318   : > { %v2537_v35 = vpop.f32.mrf.mxu2 }
 0x319   : > { %8144 = vst [vmem:[#allocation69_spill] sm:$0xff] %v7160_v17  ;;  %v2538_v49 = vadd.f32 %v2537_v35, %v2449_v19  ;;  %v2626_v1 = vpop.f32.mrf.mxu3  ;;  %v2361_v5 = vpop.f32.mrf.mxu0 }
 0x31a   : > { %v2362_v38 = vadd.f32 %v2361_v5, %v7102_v34  ;;  %v2450_v12 = vpop.f32.mrf.mxu1 }
 0x31b   : > { %v2627_v37 = vadd.f32 %v2626_v1, %v2538_v49 }
 0x31c   : > { %v2451_v31 = vadd.f32 %v2450_v12, %v2362_v38 }
 0x31d   : > { %v3437_v60 = vmax.f32 %v2627_v37, 0.0 }
 0x320   : > { %v2539_v25 = vpop.f32.mrf.mxu2 }
 0x321   : > { %v2540_v53 = vadd.f32 %v2539_v25, %v2451_v31  ;;  %v2628_v26 = vpop.f32.mrf.mxu3  ;;  %v2364_v7 = vpop.f32.mrf.mxu0 }
 0x322   : > { %v2365_v48 = vadd.f32 %v2364_v7, %v7102_v34  ;;  %v2453_v2 = vpop.f32.mrf.mxu1 }
 0x323   : > { %v2629_v30 = vadd.f32 %v2628_v26, %v2540_v53 }
 0x324   : > { %v2454_v11 = vadd.f32 %v2453_v2, %v2365_v48  ;;  %2403 = vmatmul.bf16.gmra.mxu0 %v6957_v59 }
 0x325   : > { %v3441_v39 = vmax.f32 %v2629_v30, 0.0  ;;  %2492 = vmatmul.bf16.gmra.mxu1 %v6963_v61  ;;  %2581 = vmatmul.bf16.gmra.mxu2 %v6970_v8 }
 0x326   : > { %2670 = vmatmul.bf16.gmra.mxu3 %v6974_v6 }
 0x327   : > { %v7168_v33 = vpack.c.bf16 %v3441_v39, %v3437_v60 }
 0x328   : > { %v2542_v9 = vpop.f32.mrf.mxu2 }
 0x329   : > { %8145 = vst [vmem:[#allocation70_spill] sm:$0xff] %v7168_v33  ;;  %v2543_v50 = vadd.f32 %v2542_v9, %v2454_v11  ;;  %v2631_v63 = vpop.f32.mrf.mxu3  ;;  %v2366_v19 = vpop.f32.mrf.mxu0 }
 0x32a   : > { %v2367_v56 = vadd.f32 %v2366_v19, %v7102_v34  ;;  %v2455_v10 = vpop.f32.mrf.mxu1 }
 0x32b   : > { %v2632_v35 = vadd.f32 %v2631_v63, %v2543_v50 }
 0x32c   : > { %v2456_v49 = vadd.f32 %v2455_v10, %v2367_v56 }
 0x32d   : > { %v3445_v26 = vmax.f32 %v2632_v35, 0.0 }
 0x330   : > { %v2544_v1 = vpop.f32.mrf.mxu2 }
 0x331   : > { %v2545_v5 = vadd.f32 %v2544_v1, %v2456_v49  ;;  %v2633_v38 = vpop.f32.mrf.mxu3  ;;  %v2369_v12 = vpop.f32.mrf.mxu0 }
 0x332   : > { %v2370_v37 = vadd.f32 %v2369_v12, %v7102_v34  ;;  %v2458_v31 = vpop.f32.mrf.mxu1 }
 0x333   : > { %v2634_v25 = vadd.f32 %v2633_v38, %v2545_v5 }
 0x334   : > { %v2459_v53 = vadd.f32 %v2458_v31, %v2370_v37  ;;  %2684 = vmatmul.bf16.vlgmr.msrb.gmra.mxu0 %v6645_v13 }
 0x335   : > { %v3449_v7 = vmax.f32 %v2634_v25, 0.0  ;;  %2773 = vmatmul.bf16.vlgmr.msrb.gmra.mxu1 %v6648_v15  ;;  %2862 = vmatmul.bf16.vlgmr.msrb.gmra.mxu2 %v6655_v28 }
 0x336   : > { %2951 = vmatmul.bf16.vlgmr.msrb.gmra.mxu3 %v6659_v29 }
 0x337   : > { %v7176_v48 = vpack.c.bf16 %v3449_v7, %v3445_v26 }
 0x338   : > { %v2547_v2 = vpop.f32.mrf.mxu2 }
 0x339   : > { %8146 = vst [vmem:[#allocation71_spill] sm:$0xff] %v7176_v48  ;;  %v2548_v30 = vadd.f32 %v2547_v2, %v2459_v53  ;;  %v2636_v11 = vpop.f32.mrf.mxu3  ;;  %v2371_v60 = vpop.f32.mrf.mxu0 }
 0x33a   : > { %v2372_v39 = vadd.f32 %v2371_v60, %v7102_v34  ;;  %v2460_v9 = vpop.f32.mrf.mxu1 }
 0x33b   : > { %v2637_v50 = vadd.f32 %v2636_v11, %v2548_v30 }
 0x33c   : > { %v2461_v63 = vadd.f32 %v2460_v9, %v2372_v39 }
 0x33d   : > { %v3453_v12 = vmax.f32 %v2637_v50, 0.0 }
 0x340   : > { %v2549_v19 = vpop.f32.mrf.mxu2 }
 0x341   : > { %v2550_v56 = vadd.f32 %v2549_v19, %v2461_v63  ;;  %v2638_v10 = vpop.f32.mrf.mxu3  ;;  %v2374_v35 = vpop.f32.mrf.mxu0 }
 0x342   : > { %v2375_v49 = vadd.f32 %v2374_v35, %v7102_v34  ;;  %v2463_v1 = vpop.f32.mrf.mxu1 }
 0x343   : > { %v2639_v5 = vadd.f32 %v2638_v10, %v2550_v56 }
 0x344   : > { %v2464_v38 = vadd.f32 %v2463_v1, %v2375_v49  ;;  %2689 = vmatmul.bf16.gmra.mxu0 %v6666_v42 }
 0x345   : > { %v3457_v37 = vmax.f32 %v2639_v5, 0.0  ;;  %2778 = vmatmul.bf16.gmra.mxu1 %v6669_v44  ;;  %2867 = vmatmul.bf16.gmra.mxu2 %v6676_v57 }
 0x346   : > { %2956 = vmatmul.bf16.gmra.mxu3 %v6680_v58 }
 0x347   : > { %v7184_v31 = vpack.c.bf16 %v3457_v37, %v3453_v12 }
 0x348   : > { %v2552_v25 = vpop.f32.mrf.mxu2 }
 0x349   : > { %8147 = vst [vmem:[#allocation72_spill] sm:$0xff] %v7184_v31  ;;  %v2553_v53 = vadd.f32 %v2552_v25, %v2464_v38  ;;  %v2641_v26 = vpop.f32.mrf.mxu3  ;;  %v2376_v7 = vpop.f32.mrf.mxu0 }
 0x34a   : > { %v2377_v2 = vadd.f32 %v2376_v7, %v7102_v34  ;;  %v2465_v30 = vpop.f32.mrf.mxu1 }
 0x34b   : > { %v2642_v11 = vadd.f32 %v2641_v26, %v2553_v53 }
 0x34c   : > { %v2466_v60 = vadd.f32 %v2465_v30, %v2377_v2 }
 0x34d   : > { %v3461_v49 = vmax.f32 %v2642_v11, 0.0 }
 0x350   : > { %v2554_v39 = vpop.f32.mrf.mxu2 }
 0x351   : > { %v2555_v9 = vadd.f32 %v2554_v39, %v2466_v60  ;;  %v2643_v50 = vpop.f32.mrf.mxu3  ;;  %v2379_v63 = vpop.f32.mrf.mxu0 }
 0x352   : > { %v2380_v19 = vadd.f32 %v2379_v63, %v7102_v34  ;;  %v2468_v56 = vpop.f32.mrf.mxu1 }
 0x353   : > { %v2644_v10 = vadd.f32 %v2643_v50, %v2555_v9 }
 0x354   : > { %v2469_v35 = vadd.f32 %v2468_v56, %v2380_v19  ;;  %2694 = vmatmul.bf16.gmra.mxu0 %v6687_v21 }
 0x355   : > { %v3465_v1 = vmax.f32 %v2644_v10, 0.0  ;;  %2783 = vmatmul.bf16.gmra.mxu1 %v6690_v24  ;;  %2872 = vmatmul.bf16.gmra.mxu2 %v6697_v43 }
 0x356   : > { %2961 = vmatmul.bf16.gmra.mxu3 %v6701_v45 }
 0x357   : > { %v7192_v5 = vpack.c.bf16 %v3465_v1, %v3461_v49 }
 0x358   : > { %v2557_v38 = vpop.f32.mrf.mxu2 }
 0x359   : > { %8148 = vst [vmem:[#allocation73_spill] sm:$0xff] %v7192_v5  ;;  %v2558_v12 = vadd.f32 %v2557_v38, %v2469_v35  ;;  %v2646_v37 = vpop.f32.mrf.mxu3  ;;  %v2381_v25 = vpop.f32.mrf.mxu0 }
 0x35a   : > { %v2382_v53 = vadd.f32 %v2381_v25, %v7102_v34  ;;  %v2470_v26 = vpop.f32.mrf.mxu1 }
 0x35b   : > { %v2647_v7 = vadd.f32 %v2646_v37, %v2558_v12 }
 0x35c   : > { %v2471_v2 = vadd.f32 %v2470_v26, %v2382_v53 }
 0x35d   : > { %v3469_v56 = vmax.f32 %v2647_v7, 0.0 }
 0x360   : > { %v2559_v30 = vpop.f32.mrf.mxu2 }
 0x361   : > { %v2560_v11 = vadd.f32 %v2559_v30, %v2471_v2  ;;  %v2648_v60 = vpop.f32.mrf.mxu3  ;;  %v2384_v39 = vpop.f32.mrf.mxu0 }
 0x362   : > { %v2385_v9 = vadd.f32 %v2384_v39, %v7102_v34  ;;  %v2473_v50 = vpop.f32.mrf.mxu1 }
 0x363   : > { %v2649_v63 = vadd.f32 %v2648_v60, %v2560_v11 }
 0x364   : > { %v2474_v19 = vadd.f32 %v2473_v50, %v2385_v9  ;;  %2699 = vmatmul.bf16.gmra.mxu0 %v8105_v3 }
 0x365   : > { %v3473_v10 = vmax.f32 %v2649_v63, 0.0  ;;  %2788 = vmatmul.bf16.gmra.mxu1 %v8106_v0  ;;  %2877 = vmatmul.bf16.gmra.mxu2 %v8107_v62 }
 0x366   : > { %2966 = vmatmul.bf16.gmra.mxu3 %v8108_v4 }
 0x367   : > { %v7200_v35 = vpack.c.bf16 %v3473_v10, %v3469_v56  ;;  %v8150_v56 = vld [vmem:[#allocation18_spill] sm:$0xff]  ;;  %v8151_v10 = vld [vmem:[#allocation19_spill] sm:$0xff] }
 0x368   : > { %v2562_v49 = vpop.f32.mrf.mxu2 }
 0x369   : > { %8149 = vst [vmem:[#allocation74_spill] sm:$0xff] %v7200_v35  ;;  %v2563_v1 = vadd.f32 %v2562_v49, %v2474_v19  ;;  %v2651_v38 = vpop.f32.mrf.mxu3  ;;  %v2386_v12 = vpop.f32.mrf.mxu0 }
 0x36a   : > { %v2387_v37 = vadd.f32 %v2386_v12, %v7102_v34  ;;  %v2475_v25 = vpop.f32.mrf.mxu1 }
 0x36b   : > { %v2652_v53 = vadd.f32 %v2651_v38, %v2563_v1 }
 0x36c   : > { %v2476_v26 = vadd.f32 %v2475_v25, %v2387_v37 }
 0x36d   : > { %v3477_v63 = vmax.f32 %v2652_v53, 0.0 }
 0x370   : > { %v2564_v2 = vpop.f32.mrf.mxu2 }
 0x371   : > { %v2565_v7 = vadd.f32 %v2564_v2, %v2476_v26  ;;  %v2653_v30 = vpop.f32.mrf.mxu3  ;;  %v2389_v11 = vpop.f32.mrf.mxu0 }
 0x372   : > { %v2390_v60 = vadd.f32 %v2389_v11, %v7102_v34  ;;  %v2478_v39 = vpop.f32.mrf.mxu1 }
 0x373   : > { %v2654_v9 = vadd.f32 %v2653_v30, %v2565_v7 }
 0x374   : > { %v2479_v50 = vadd.f32 %v2478_v39, %v2390_v60  ;;  %2704 = vmatmul.bf16.gmra.mxu0 %v8110_v20 }
 0x375   : > { %v3481_v19 = vmax.f32 %v2654_v9, 0.0  ;;  %2793 = vmatmul.bf16.gmra.mxu1 %v8111_v14  ;;  %2882 = vmatmul.bf16.gmra.mxu2 %v8150_v56 }
 0x376   : > { %2971 = vmatmul.bf16.gmra.mxu3 %v8151_v10 }
 0x377   : > { %v7208_v49 = vpack.c.bf16 %v3481_v19, %v3477_v63  ;;  %v8153_v63 = vld [vmem:[#allocation20_spill] sm:$0xff] }
 0x378   : > { %v2567_v1 = vpop.f32.mrf.mxu2 }
 0x379   : > { %8152 = vst [vmem:[#allocation18_spill] sm:$0xff] %v7208_v49  ;;  %v2568_v38 = vadd.f32 %v2567_v1, %v2479_v50  ;;  %v2656_v12 = vpop.f32.mrf.mxu3  ;;  %v2391_v37 = vpop.f32.mrf.mxu0  ;;  %v8154_v1 = vld [vmem:[#allocation21_spill] sm:$0xff]  ;;  %v8155_v49 = vld [vmem:[#allocation22_spill] sm:$0xff] }
 0x37a   : > { %v2392_v25 = vadd.f32 %v2391_v37, %v7102_v34  ;;  %v2480_v26 = vpop.f32.mrf.mxu1  ;;  %v8156_v37 = vld [vmem:[#allocation23_spill] sm:$0xff] }
 0x37b   : > { %v2657_v2 = vadd.f32 %v2656_v12, %v2568_v38 }
 0x37c   : > { %v2481_v7 = vadd.f32 %v2480_v26, %v2392_v25 }
 0x37d   : > { %v3485_v19 = vmax.f32 %v2657_v2, 0.0 }
 0x380   : > { %v2569_v30 = vpop.f32.mrf.mxu2 }
 0x381   : > { %v2570_v53 = vadd.f32 %v2569_v30, %v2481_v7  ;;  %v2658_v11 = vpop.f32.mrf.mxu3  ;;  %v2394_v60 = vpop.f32.mrf.mxu0 }
 0x382   : > { %v2395_v39 = vadd.f32 %v2394_v60, %v7102_v34  ;;  %v2483_v9 = vpop.f32.mrf.mxu1 }
 0x383   : > { %v2659_v35 = vadd.f32 %v2658_v11, %v2570_v53 }
 0x384   : > { %v2484_v5 = vadd.f32 %v2483_v9, %v2395_v39  ;;  %2709 = vmatmul.bf16.gmra.mxu0 %v8153_v63 }
 0x385   : > { %v3489_v50 = vmax.f32 %v2659_v35, 0.0  ;;  %2798 = vmatmul.bf16.gmra.mxu1 %v8154_v1  ;;  %2887 = vmatmul.bf16.gmra.mxu2 %v8155_v49 }
 0x386   : > { %2976 = vmatmul.bf16.gmra.mxu3 %v8156_v37 }
 0x387   : > { %v7216_v38 = vpack.c.bf16 %v3489_v50, %v3485_v19  ;;  %v8158_v19 = vld [vmem:[#allocation24_spill] sm:$0xff] }
 0x388   : > { %v2572_v12 = vpop.f32.mrf.mxu2 }
 0x389   : > { %8157 = vst [vmem:[#allocation19_spill] sm:$0xff] %v7216_v38  ;;  %v2573_v25 = vadd.f32 %v2572_v12, %v2484_v5  ;;  %v2661_v26 = vpop.f32.mrf.mxu3  ;;  %v2396_v7 = vpop.f32.mrf.mxu0  ;;  %v8159_v12 = vld [vmem:[#allocation25_spill] sm:$0xff]  ;;  %v8160_v38 = vld [vmem:[#allocation26_spill] sm:$0xff] }
 0x38a   : > { %v2397_v30 = vadd.f32 %v2396_v7, %v7102_v34  ;;  %v2485_v53 = vpop.f32.mrf.mxu1  ;;  %v8161_v7 = vld [vmem:[#allocation27_spill] sm:$0xff] }
 0x38b   : > { %v2662_v11 = vadd.f32 %v2661_v26, %v2573_v25 }
 0x38c   : > { %v2486_v60 = vadd.f32 %v2485_v53, %v2397_v30 }
 0x38d   : > { %v3493_v50 = vmax.f32 %v2662_v11, 0.0 }
 0x390   : > { %v2574_v39 = vpop.f32.mrf.mxu2 }
 0x391   : > { %v2575_v2 = vadd.f32 %v2574_v39, %v2486_v60  ;;  %v2663_v35 = vpop.f32.mrf.mxu3  ;;  %v2399_v9 = vpop.f32.mrf.mxu0 }
 0x392   : > { %v2400_v31 = vadd.f32 %v2399_v9, %v7102_v34  ;;  %v2488_v48 = vpop.f32.mrf.mxu1 }
 0x393   : > { %v2664_v33 = vadd.f32 %v2663_v35, %v2575_v2 }
 0x394   : > { %v2489_v17 = vadd.f32 %v2488_v48, %v2400_v31  ;;  %2714 = vmatmul.bf16.gmra.mxu0 %v8158_v19 }
 0x395   : > { %v3497_v5 = vmax.f32 %v2664_v33, 0.0  ;;  %2803 = vmatmul.bf16.gmra.mxu1 %v8159_v12  ;;  %2892 = vmatmul.bf16.gmra.mxu2 %v8160_v38 }
 0x396   : > { %2981 = vmatmul.bf16.gmra.mxu3 %v8161_v7 }
 0x397   : > { %v7224_v25 = vpack.c.bf16 %v3497_v5, %v3493_v50  ;;  %v8163_v5 = vld [vmem:[#allocation29_spill] sm:$0xff] }
 0x398   : > { %v2577_v26 = vpop.f32.mrf.mxu2 }
 0x399   : > { %8162 = vst [vmem:[#allocation20_spill] sm:$0xff] %v7224_v25  ;;  %v2578_v30 = vadd.f32 %v2577_v26, %v2489_v17  ;;  %v2666_v53 = vpop.f32.mrf.mxu3  ;;  %v2401_v60 = vpop.f32.mrf.mxu0  ;;  %v8164_v26 = vld [vmem:[#allocation30_spill] sm:$0xff] }
 0x39a   : > { %v2402_v39 = vadd.f32 %v2401_v60, %v7102_v34  ;;  %v2490_v2 = vpop.f32.mrf.mxu1 }
 0x39b   : > { %v2667_v48 = vadd.f32 %v2666_v53, %v2578_v30 }
 0x39c   : > { %v2491_v31 = vadd.f32 %v2490_v2, %v2402_v39 }
 0x39d   : > { %v3501_v50 = vmax.f32 %v2667_v48, 0.0 }
 0x3a0   : > { %v2579_v35 = vpop.f32.mrf.mxu2 }
 0x3a1   : > { %v2580_v11 = vadd.f32 %v2579_v35, %v2491_v31  ;;  %v2668_v33 = vpop.f32.mrf.mxu3  ;;  %v2404_v9 = vpop.f32.mrf.mxu0 }
 0x3a2   : > { %v2405_v12 = vadd.f32 %v2404_v9, %v7102_v34  ;;  %v2493_v38 = vpop.f32.mrf.mxu1 }
 0x3a3   : > { %v2669_v19 = vadd.f32 %v2668_v33, %v2580_v11 }
 0x3a4   : > { %v2494_v7 = vadd.f32 %v2493_v38, %v2405_v12  ;;  %2719 = vmatmul.bf16.gmra.mxu0 %v6792_v51 }
 0x3a5   : > { %v3505_v17 = vmax.f32 %v2669_v19, 0.0  ;;  %2808 = vmatmul.bf16.gmra.mxu1 %v8125_v47  ;;  %2897 = vmatmul.bf16.gmra.mxu2 %v8163_v5  ;;  %v7238_v19 = vld [vmem:[%s7903_s4] sm:$0xf] }
 0x3a6   : > { %2986 = vmatmul.bf16.gmra.mxu3 %v8164_v26  ;;  %v7241_v48 = vperm.slane %v7238_v19, 2 }
 0x3a7   : > { %v7232_v30 = vpack.c.bf16 %v3505_v17, %v3501_v50 }
 0x3a8   : > { %v2582_v53 = vpop.f32.mrf.mxu2 }
 0x3a9   : > { %8165 = vst [vmem:[#allocation21_spill] sm:$0xff] %v7232_v30  ;;  %v2583_v60 = vadd.f32 %v2582_v53, %v2494_v7  ;;  %v2671_v39 = vpop.f32.mrf.mxu3  ;;  %v2406_v2 = vpop.f32.mrf.mxu0 }
 0x3aa   : > { %v2407_v31 = vadd.f32 %v2406_v2, %v7102_v34  ;;  %v2495_v35 = vpop.f32.mrf.mxu1  ;;  %v8166_v2 = vld [vmem:[#allocation34_spill] sm:$0xff] }
 0x3ab   : > { %v2672_v38 = vadd.f32 %v2671_v39, %v2583_v60 }
 0x3ac   : > { %v2496_v12 = vadd.f32 %v2495_v35, %v2407_v31 }
 0x3ad   : > { %v3509_v60 = vmax.f32 %v2672_v38, 0.0 }
 0x3b0   : > { %v2584_v11 = vpop.f32.mrf.mxu2 }
 0x3b1   : > { %v2585_v33 = vadd.f32 %v2584_v11, %v2496_v12  ;;  %v2673_v9 = vpop.f32.mrf.mxu3  ;;  %v2685_v50 = vpop.f32.mrf.mxu0 }
 0x3b2   : > { %v2686_v7 = vadd.f32 %v2685_v50, %v7241_v48  ;;  %v2774_v17 = vpop.f32.mrf.mxu1 }
 0x3b3   : > { %v2674_v53 = vadd.f32 %v2673_v9, %v2585_v33 }
 0x3b4   : > { %v2775_v34 = vadd.f32 %v2774_v17, %v2686_v7  ;;  %2724 = vmatmul.bf16.gmra.mxu0 %v6812_v40 }
 0x3b5   : > { %v3513_v39 = vmax.f32 %v2674_v53, 0.0  ;;  %2813 = vmatmul.bf16.gmra.mxu1 %v6815_v46  ;;  %2902 = vmatmul.bf16.gmra.mxu2 %v6821_v16 }
 0x3b6   : > { %2991 = vmatmul.bf16.gmra.mxu3 %v8166_v2 }
 0x3b7   : > { %v7248_v31 = vpack.c.bf16 %v3513_v39, %v3509_v60  ;;  %v8168_v39 = vld [vmem:[#allocation37_spill] sm:$0xff] }
 0x3b8   : > { %v2863_v35 = vpop.f32.mrf.mxu2 }
 0x3b9   : > { %8167 = vst [vmem:[#allocation22_spill] sm:$0xff] %v7248_v31  ;;  %v2864_v12 = vadd.f32 %v2863_v35, %v2775_v34  ;;  %v2952_v11 = vpop.f32.mrf.mxu3  ;;  %v2687_v30 = vpop.f32.mrf.mxu0 }
 0x3ba   : > { %v2688_v50 = vadd.f32 %v2687_v30, %v7241_v48  ;;  %v2776_v33 = vpop.f32.mrf.mxu1  ;;  %v8169_v30 = vld [vmem:[#allocation38_spill] sm:$0xff] }
 0x3bb   : > { %v2953_v9 = vadd.f32 %v2952_v11, %v2864_v12 }
 0x3bc   : > { %v2777_v7 = vadd.f32 %v2776_v33, %v2688_v50 }
 0x3bd   : > { %v3390_v60 = vmax.f32 %v2953_v9, 0.0 }
 0x3c0   : > { %v2865_v17 = vpop.f32.mrf.mxu2 }
 0x3c1   : > { %v2866_v38 = vadd.f32 %v2865_v17, %v2777_v7  ;;  %v2954_v53 = vpop.f32.mrf.mxu3  ;;  %v2690_v25 = vpop.f32.mrf.mxu0 }
 0x3c2   : > { %v2691_v46 = vadd.f32 %v2690_v25, %v7241_v48  ;;  %v2779_v16 = vpop.f32.mrf.mxu1 }
 0x3c3   : > { %v2955_v40 = vadd.f32 %v2954_v53, %v2866_v38 }
 0x3c4   : > { %v2780_v2 = vadd.f32 %v2779_v16, %v2691_v46  ;;  %2729 = vmatmul.bf16.gmra.mxu0 %v6832_v41 }
 0x3c5   : > { %v3394_v34 = vmax.f32 %v2955_v40, 0.0  ;;  %2818 = vmatmul.bf16.gmra.mxu1 %v6835_v52  ;;  %2907 = vmatmul.bf16.gmra.mxu2 %v8168_v39  ;;  %v6015_v52 = vld [vmem:[#allocation3 + $0x1ec] sm:$0xf] }
 0x3c6   : > { %2996 = vmatmul.bf16.gmra.mxu3 %v8169_v30 }
 0x3c7   : > { %v7256_v35 = vpack.c.bf16 %v3394_v34, %v3390_v60  ;;  %v8171_v60 = vld [vmem:[#allocation39_spill] sm:$0xff] }
 0x3c8   : > { %v2868_v12 = vpop.f32.mrf.mxu2 }
 0x3c9   : > { %8170 = vst [vmem:[#allocation23_spill] sm:$0xff] %v7256_v35  ;;  %v2869_v11 = vadd.f32 %v2868_v12, %v2780_v2  ;;  %v2957_v50 = vpop.f32.mrf.mxu3  ;;  %v2692_v33 = vpop.f32.mrf.mxu0  ;;  %v8172_v12 = vld [vmem:[#allocation40_spill] sm:$0xff]  ;;  %v8173_v35 = vld [vmem:[#allocation41_spill] sm:$0xff] }
 0x3ca   : > { %v2693_v25 = vadd.f32 %v2692_v33, %v7241_v48  ;;  %v2781_v7 = vpop.f32.mrf.mxu1  ;;  %v8174_v33 = vld [vmem:[#allocation42_spill] sm:$0xff] }
 0x3cb   : > { %v2958_v46 = vadd.f32 %v2957_v50, %v2869_v11  ;;  %v6047_v11 = vld [vmem:[#allocation3 + $0x2ec] sm:$0xf]  ;;  %v5530_v50 = vld [vmem:[#allocation3 + $0x2f8] sm:$0xf0] }
 0x3cc   : > { %v2782_v16 = vadd.f32 %v2781_v7, %v2693_v25  ;;  %v5533_v25 = vor.u32 %v6047_v11, %v5530_v50  ;;  %v5402_v11 = vld [vmem:[#allocation3 + $0x1f8] sm:$0xf0] }
 0x3cd   : > { %v3398_v34 = vmax.f32 %v2958_v46, 0.0 }
 0x3ce   : > { %3210 = vmatpush.bf16.msra.mxu2 %v5533_v25 }
 0x3d0   : > { %v2870_v17 = vpop.f32.mrf.mxu2 }
 0x3d1   : > { %v2871_v9 = vadd.f32 %v2870_v17, %v2782_v16  ;;  %v2959_v40 = vpop.f32.mrf.mxu3  ;;  %v2695_v38 = vpop.f32.mrf.mxu0 }
 0x3d2   : > { %v2696_v53 = vadd.f32 %v2695_v38, %v7241_v48  ;;  %v2784_v31 = vpop.f32.mrf.mxu1 }
 0x3d3   : > { %v2960_v39 = vadd.f32 %v2959_v40, %v2871_v9 }
 0x3d4   : > { %v2785_v30 = vadd.f32 %v2784_v31, %v2696_v53  ;;  %2734 = vmatmul.bf16.gmra.mxu0 %v8171_v60  ;;  %v5983_v53 = vld [vmem:[#allocation3 + $0xec] sm:$0xf] }
 0x3d5   : > { %v3402_v2 = vmax.f32 %v2960_v39, 0.0  ;;  %2823 = vmatmul.bf16.gmra.mxu1 %v8172_v12  ;;  %2912 = vmatmul.bf16.gmra.mxu2 %v8173_v35  ;;  %v5274_v12 = vld [vmem:[#allocation3 + $0xf8] sm:$0xf0]  ;;  %v6079_v60 = vld [vmem:[#allocation3 + $0x3ec] sm:$0xf] }
 0x3d6   : > { %3001 = vmatmul.bf16.gmra.mxu3 %v8174_v33  ;;  %v5277_v35 = vor.u32 %v5983_v53, %v5274_v12  ;;  %v5658_v33 = vld [vmem:[#allocation3 + $0x3f8] sm:$0xf0] }
 0x3d7   : > { %v7264_v7 = vpack.c.bf16 %v3402_v2, %v3398_v34  ;;  %v5661_v41 = vor.u32 %v6079_v60, %v5658_v33  ;;  %v5405_v2 = vor.u32 %v6015_v52, %v5402_v11 }
 0x3d8   : > { %v2873_v16 = vpop.f32.mrf.mxu2  ;;  %3032 = vmatpush.bf16.msra.mxu0 %v5277_v35 }
 0x3d9   : > { %8175 = vst [vmem:[#allocation29_spill] sm:$0xff] %v7264_v7  ;;  %v2874_v17 = vadd.f32 %v2873_v16, %v2785_v30  ;;  %v2962_v38 = vpop.f32.mrf.mxu3  ;;  %v2697_v9 = vpop.f32.mrf.mxu0  ;;  %3299 = vmatpush.bf16.msra.mxu3 %v5661_v41  ;;  %3121 = vmatpush.bf16.msra.mxu1 %v5405_v2  ;;  %v5386_v7 = vld [vmem:[#allocation3 + $0x1d8] sm:$0xf0] }
 0x3da   : > { %v2698_v31 = vadd.f32 %v2697_v9, %v7241_v48  ;;  %v2786_v46 = vpop.f32.mrf.mxu1 }
 0x3db   : > { %v2963_v39 = vadd.f32 %v2962_v38, %v2874_v17 }
 0x3dc   : > { %v2787_v40 = vadd.f32 %v2786_v46, %v2698_v31 }
 0x3dd   : > { %v3406_v12 = vmax.f32 %v2963_v39, 0.0 }
 0x3e0   : > { %v2875_v34 = vpop.f32.mrf.mxu2 }
 0x3e1   : > { %v2876_v30 = vadd.f32 %v2875_v34, %v2787_v40  ;;  %v2964_v50 = vpop.f32.mrf.mxu3  ;;  %v2700_v16 = vpop.f32.mrf.mxu0 }
 0x3e2   : > { %v2701_v25 = vadd.f32 %v2700_v16, %v7241_v48  ;;  %v2789_v9 = vpop.f32.mrf.mxu1 }
 0x3e3   : > { %v2965_v17 = vadd.f32 %v2964_v50, %v2876_v30 }
 0x3e4   : > { %v2790_v38 = vadd.f32 %v2789_v9, %v2701_v25  ;;  %2739 = vmatmul.bf16.gmra.mxu0 %v6872_v32  ;;  %v5434_v32 = vld [vmem:[#allocation3 + $0x238] sm:$0xf0] }
 0x3e5   : > { %v3410_v31 = vmax.f32 %v2965_v17, 0.0  ;;  %2828 = vmatmul.bf16.gmra.mxu1 %v6875_v18  ;;  %2917 = vmatmul.bf16.gmra.mxu2 %v6881_v22  ;;  %v8177_v17 = vld [vmem:[#allocation47_spill] sm:$0xff]  ;;  %v8183_v18 = vld [vmem:[#allocation52_spill] sm:$0xff] }
 0x3e6   : > { %3006 = vmatmul.bf16.gmra.mxu3 %v6885_v54  ;;  %v6071_v54 = vld [vmem:[#allocation3 + $0x3ac] sm:$0xf]  ;;  %v5626_v22 = vld [vmem:[#allocation3 + $0x3b8] sm:$0xf0] }
 0x3e7   : > { %v7272_v52 = vpack.c.bf16 %v3410_v31, %v3406_v12  ;;  %v8178_v31 = vld [vmem:[#allocation48_spill] sm:$0xff] }
 0x3e8   : > { %v2878_v35 = vpop.f32.mrf.mxu2 }
 0x3e9   : > { %8176 = vst [vmem:[#allocation30_spill] sm:$0xff] %v7272_v52  ;;  %v2879_v41 = vadd.f32 %v2878_v35, %v2790_v38  ;;  %v2967_v60 = vpop.f32.mrf.mxu3  ;;  %v2702_v33 = vpop.f32.mrf.mxu0  ;;  %v8179_v35 = vld [vmem:[#allocation49_spill] sm:$0xff] }
 0x3ea   : > { %v2703_v46 = vadd.f32 %v2702_v33, %v7241_v48  ;;  %v2791_v40 = vpop.f32.mrf.mxu1  ;;  %v8180_v33 = vld [vmem:[#allocation50_spill] sm:$0xff]  ;;  %v6011_v52 = vld [vmem:[#allocation3 + $0x1cc] sm:$0xf] }
 0x3eb   : > { %v2968_v53 = vadd.f32 %v2967_v60, %v2879_v41  ;;  %v6043_v41 = vld [vmem:[#allocation3 + $0x2cc] sm:$0xf]  ;;  %v5514_v60 = vld [vmem:[#allocation3 + $0x2d8] sm:$0xf0] }
 0x3ec   : > { %v2792_v11 = vadd.f32 %v2791_v40, %v2703_v46  ;;  %v5517_v46 = vor.u32 %v6043_v41, %v5514_v60  ;;  %v6007_v60 = vld [vmem:[#allocation3 + $0x1ac] sm:$0xf] }
 0x3ed   : > { %v3414_v12 = vmax.f32 %v2968_v53, 0.0 }
 0x3ee   : > { %3211 = vmatpush.bf16.msra.mxu2 %v5517_v46  ;;  %v5370_v46 = vld [vmem:[#allocation3 + $0x1b8] sm:$0xf0] }
 0x3f0   : > { %v2880_v34 = vpop.f32.mrf.mxu2 }
 0x3f1   : > { %v2881_v39 = vadd.f32 %v2880_v34, %v2792_v11  ;;  %v2969_v2 = vpop.f32.mrf.mxu3  ;;  %v2705_v30 = vpop.f32.mrf.mxu0  ;;  %v5979_v34 = vld [vmem:[#allocation3 + $0xcc] sm:$0xf] }
 0x3f2   : > { %v2706_v50 = vadd.f32 %v2705_v30, %v7241_v48  ;;  %v2794_v16 = vpop.f32.mrf.mxu1  ;;  %v5258_v30 = vld [vmem:[#allocation3 + $0xd8] sm:$0xf0] }
 0x3f3   : > { %v2970_v25 = vadd.f32 %v2969_v2, %v2881_v39  ;;  %v6075_v39 = vld [vmem:[#allocation3 + $0x3cc] sm:$0xf]  ;;  %v5261_v53 = vor.u32 %v5979_v34, %v5258_v30  ;;  %v5373_v30 = vor.u32 %v6007_v60, %v5370_v46 }
 0x3f4   : > { %v2795_v9 = vadd.f32 %v2794_v16, %v2706_v50  ;;  %2744 = vmatmul.bf16.gmra.mxu0 %v8177_v17  ;;  %v5389_v17 = vor.u32 %v6011_v52, %v5386_v7  ;;  %v6039_v34 = vld [vmem:[#allocation3 + $0x2ac] sm:$0xf] }
 0x3f5   : > { %v3418_v38 = vmax.f32 %v2970_v25, 0.0  ;;  %2833 = vmatmul.bf16.gmra.mxu1 %v8178_v31  ;;  %2922 = vmatmul.bf16.gmra.mxu2 %v8179_v35  ;;  %v5642_v25 = vld [vmem:[#allocation3 + $0x3d8] sm:$0xf0]  ;;  %v5971_v52 = vld [vmem:[#allocation3 + $0x8c] sm:$0xf] }
 0x3f6   : > { %3011 = vmatmul.bf16.gmra.mxu3 %v8180_v33  ;;  %v5645_v31 = vor.u32 %v6075_v39, %v5642_v25  ;;  %3033 = vmatpush.bf16.msra.mxu0 %v5261_v53  ;;  %v5629_v39 = vor.u32 %v6071_v54, %v5626_v22  ;;  %v5354_v53 = vld [vmem:[#allocation3 + $0x198] sm:$0xf0]  ;;  %v6035_v25 = vld [vmem:[#allocation3 + $0x28c] sm:$0xf] }
 0x3f7   : > { %v7280_v40 = vpack.c.bf16 %v3418_v38, %v3414_v12  ;;  %3122 = vmatpush.bf16.msra.mxu1 %v5389_v17  ;;  %v5975_v38 = vld [vmem:[#allocation3 + $0xac] sm:$0xf]  ;;  %v5610_v54 = vld [vmem:[#allocation3 + $0x398] sm:$0xf0] }
 0x3f8   : > { %v2883_v11 = vpop.f32.mrf.mxu2  ;;  %3300 = vmatpush.bf16.msra.mxu3 %v5645_v31  ;;  %v6067_v22 = vld [vmem:[#allocation3 + $0x38c] sm:$0xf] }
 0x3f9   : > { %8181 = vst [vmem:[#allocation75_spill] sm:$0xff] %v7280_v40  ;;  %v2884_v2 = vadd.f32 %v2883_v11, %v2795_v9  ;;  %v2972_v50 = vpop.f32.mrf.mxu3  ;;  %v2707_v16 = vpop.f32.mrf.mxu0  ;;  %v5242_v9 = vld [vmem:[#allocation3 + $0xb8] sm:$0xf0] }
 0x3fa   : > { %v2708_v35 = vadd.f32 %v2707_v16, %v7241_v48  ;;  %v2796_v33 = vpop.f32.mrf.mxu1  ;;  %v5245_v11 = vor.u32 %v5975_v38, %v5242_v9  ;;  %v5498_v40 = vld [vmem:[#allocation3 + $0x2b8] sm:$0xf0] }
 0x3fb   : > { %v7283_v41 = vadd.f32 %v2972_v50, %v2884_v2  ;;  %v5501_v16 = vor.u32 %v6039_v34, %v5498_v40  ;;  %3123 = vmatpush.bf16.msra.mxu1 %v5373_v30  ;;  %v5226_v2 = vld [vmem:[#allocation3 + $0x98] sm:$0xf0]  ;;  %v5613_v34 = vor.u32 %v6067_v22, %v5610_v54  ;;  %v5963_v54 = vld [vmem:[#allocation3 + $0x4c] sm:$0xf] }
 0x3fc   : > { %v2797_v12 = vadd.f32 %v2796_v33, %v2708_v35  ;;  %3034 = vmatpush.bf16.msra.mxu0 %v5245_v11  ;;  %v6003_v35 = vld [vmem:[#allocation3 + $0x18c] sm:$0xf]  ;;  %3301 = vmatpush.bf16.msra.mxu3 %v5629_v39  ;;  %v5229_v50 = vor.u32 %v5971_v52, %v5226_v2  ;;  %v5482_v38 = vld [vmem:[#allocation3 + $0x298] sm:$0xf0] }
 0x3fd   : > { %3212 = vmatpush.bf16.msra.mxu2 %v5501_v16  ;;  %v5357_v11 = vor.u32 %v6003_v35, %v5354_v53  ;;  %v5485_v40 = vor.u32 %v6035_v25, %v5482_v38  ;;  %v5967_v16 = vld [vmem:[#allocation3 + $0x6c] sm:$0xf]  ;;  %v5210_v39 = vld [vmem:[#allocation3 + $0x78] sm:$0xf0]  ;;  %v3422_v52 = vmax.f32 %v7283_v41, 0.0 }
 0x3fe   : > { %v5213_v35 = vor.u32 %v5967_v16, %v5210_v39  ;;  %v5338_v53 = vld [vmem:[#allocation3 + $0x178] sm:$0xf0]  ;;  %v6031_v25 = vld [vmem:[#allocation3 + $0x26c] sm:$0xf] }
 0x3ff   : > { %3124 = vmatpush.bf16.msra.mxu1 %v5357_v11  ;;  %v6063_v38 = vld [vmem:[#allocation3 + $0x36c] sm:$0xf] }
 0x400   : > { %v2885_v7 = vpop.f32.mrf.mxu2  ;;  %3035 = vmatpush.bf16.msra.mxu0 %v5229_v50  ;;  %v5466_v50 = vld [vmem:[#allocation3 + $0x278] sm:$0xf0]  ;;  %3302 = vmatpush.bf16.msra.mxu3 %v5613_v34  ;;  %v5995_v16 = vld [vmem:[#allocation3 + $0x14c] sm:$0xf] }
 0x401   : > { %v2886_v31 = vadd.f32 %v2885_v7, %v2797_v12  ;;  %v2974_v17 = vpop.f32.mrf.mxu3  ;;  %v2710_v33 = vpop.f32.mrf.mxu0  ;;  %v8182_v12 = vld [vmem:[#allocation51_spill] sm:$0xff]  ;;  %v5999_v7 = vld [vmem:[#allocation3 + $0x16c] sm:$0xf]  ;;  %3213 = vmatpush.bf16.msra.mxu2 %v5485_v40 }
 0x402   : > { %v2711_v9 = vadd.f32 %v2710_v33, %v7241_v48  ;;  %v2799_v60 = vpop.f32.mrf.mxu1  ;;  %v8184_v33 = vld [vmem:[#allocation53_spill] sm:$0xff]  ;;  %v5322_v40 = vld [vmem:[#allocation3 + $0x158] sm:$0xf0] }
 0x403   : > { %v2975_v46 = vadd.f32 %v2974_v17, %v2886_v31  ;;  %v8185_v31 = vld [vmem:[#allocation54_spill] sm:$0xff]  ;;  %v5341_v17 = vor.u32 %v5999_v7, %v5338_v53  ;;  %v6027_v7 = vld [vmem:[#allocation3 + $0x24c] sm:$0xf]  ;;  %v5450_v53 = vld [vmem:[#allocation3 + $0x258] sm:$0xf0] }
 0x404   : > { %v2800_v30 = vadd.f32 %v2799_v60, %v2711_v9  ;;  %2749 = vmatmul.bf16.gmra.mxu0 %v8182_v12  ;;  %v5594_v9 = vld [vmem:[#allocation3 + $0x378] sm:$0xf0]  ;;  %v5469_v60 = vor.u32 %v6031_v25, %v5466_v50  ;;  %v5453_v25 = vor.u32 %v6027_v7, %v5450_v53 }
 0x405   : > { %v3426_v2 = vmax.f32 %v2975_v46, 0.0  ;;  %2838 = vmatmul.bf16.gmra.mxu1 %v8183_v18  ;;  %2927 = vmatmul.bf16.gmra.mxu2 %v8184_v33  ;;  %v5597_v11 = vor.u32 %v6063_v38, %v5594_v9  ;;  %v5194_v46 = vld [vmem:[#allocation3 + $0x58] sm:$0xf0] }
 0x406   : > { %3016 = vmatmul.bf16.gmra.mxu3 %v8185_v31  ;;  %3036 = vmatpush.bf16.msra.mxu0 %v5213_v35  ;;  %v5197_v31 = vor.u32 %v5963_v54, %v5194_v46  ;;  %v5325_v35 = vor.u32 %v5995_v16, %v5322_v40  ;;  %v5178_v9 = vld [vmem:[#allocation3 + $0x38] sm:$0xf0] }
 0x407   : > { %v7291_v41 = vpack.c.bf16 %v3426_v2, %v3422_v52  ;;  %3125 = vmatpush.bf16.msra.mxu1 %v5341_v17  ;;  %3214 = vmatpush.bf16.msra.mxu2 %v5469_v60  ;;  %v6059_v52 = vld [vmem:[#allocation3 + $0x34c] sm:$0xf]  ;;  %v5578_v2 = vld [vmem:[#allocation3 + $0x358] sm:$0xf0] }
 0x408   : > { %v2888_v22 = vpop.f32.mrf.mxu2  ;;  %3303 = vmatpush.bf16.msra.mxu3 %v5597_v11  ;;  %v5581_v17 = vor.u32 %v6059_v52, %v5578_v2  ;;  %v5306_v46 = vld [vmem:[#allocation3 + $0x138] sm:$0xf0]  ;;  %v6055_v60 = vld [vmem:[#allocation3 + $0x32c] sm:$0xf] }
 0x409   : > { %8186 = vst [vmem:[#allocation76_spill] sm:$0xff] %v7291_v41  ;;  %v2889_v39 = vadd.f32 %v2888_v22, %v2800_v30  ;;  %v2977_v33 = vpop.f32.mrf.mxu3  ;;  %v2712_v18 = vpop.f32.mrf.mxu0  ;;  %v5959_v30 = vld [vmem:[#allocation3 + $0x2c] sm:$0xf]  ;;  %v5562_v16 = vld [vmem:[#allocation3 + $0x338] sm:$0xf0] }
 0x40a   : > { %v2713_v12 = vadd.f32 %v2712_v18, %v7241_v48  ;;  %v2801_v34 = vpop.f32.mrf.mxu1  ;;  %3037 = vmatpush.bf16.msra.mxu0 %v5197_v31  ;;  %v5991_v22 = vld [vmem:[#allocation3 + $0x12c] sm:$0xf]  ;;  %v5181_v54 = vor.u32 %v5959_v30, %v5178_v9  ;;  %v5290_v52 = vld [vmem:[#allocation3 + $0x118] sm:$0xf0] }
 0x40b   : > { %v2978_v50 = vadd.f32 %v2977_v33, %v2889_v39  ;;  %3126 = vmatpush.bf16.msra.mxu1 %v5325_v35  ;;  %v6023_v41 = vld [vmem:[#allocation3 + $0x22c] sm:$0xf]  ;;  %3215 = vmatpush.bf16.msra.mxu2 %v5453_v25  ;;  %v5309_v18 = vor.u32 %v5991_v22, %v5306_v46  ;;  %v5565_v33 = vor.u32 %v6055_v60, %v5562_v16  ;;  %v5418_v25 = vld [vmem:[#allocation3 + $0x218] sm:$0xf0] }
 0x40c   : > { %v2802_v38 = vadd.f32 %v2801_v34, %v2713_v12  ;;  %3304 = vmatpush.bf16.msra.mxu3 %v5581_v17  ;;  %v5437_v40 = vor.u32 %v6023_v41, %v5434_v32  ;;  %v5955_v31 = vld [vmem:[#allocation3 + $0xc] sm:$0xf]  ;;  %v5162_v12 = vld [vmem:[#allocation3 + $0x18] sm:$0xf0] }
 0x40d   : > { %v5987_v39 = vld [vmem:[#allocation3 + $0x10c] sm:$0xf]  ;;  %v5165_v35 = vor.u32 %v5955_v31, %v5162_v12  ;;  %v5546_v41 = vld [vmem:[#allocation3 + $0x318] sm:$0xf0] }
 0x40e   : > { %3038 = vmatpush.bf16.msra.mxu0 %v5181_v54  ;;  %v6019_v2 = vld [vmem:[#allocation3 + $0x20c] sm:$0xf]  ;;  %v5293_v17 = vor.u32 %v5987_v39, %v5290_v52 }
 0x40f   : > { %3127 = vmatpush.bf16.msra.mxu1 %v5309_v18  ;;  %3216 = vmatpush.bf16.msra.mxu2 %v5437_v40  ;;  %v5421_v22 = vor.u32 %v6019_v2, %v5418_v25  ;;  %v6051_v32 = vld [vmem:[#allocation3 + $0x30c] sm:$0xf] }
 0x410   : > { %v2890_v11 = vpop.f32.mrf.mxu2  ;;  %3305 = vmatpush.bf16.msra.mxu3 %v5565_v33  ;;  %v5549_v46 = vor.u32 %v6051_v32, %v5546_v41 }
 0x411   : > { %v2891_v7 = vadd.f32 %v2890_v11, %v2802_v38  ;;  %v2979_v53 = vpop.f32.mrf.mxu3  ;;  %v2715_v34 = vpop.f32.mrf.mxu0  ;;  %v3430_v38 = vmax.f32 %v2978_v50, 0.0 }
 0x412   : > { %v2716_v30 = vadd.f32 %v2715_v34, %v7241_v48  ;;  %v2804_v9 = vpop.f32.mrf.mxu1  ;;  %3039 = vmatpush.bf16.msra.mxu0 %v5165_v35 }
 0x413   : > { %v2980_v54 = vadd.f32 %v2979_v53, %v2891_v7  ;;  %3128 = vmatpush.bf16.msra.mxu1 %v5293_v17  ;;  %3217 = vmatpush.bf16.msra.mxu2 %v5421_v22 }
 0x414   : > { %v2805_v18 = vadd.f32 %v2804_v9, %v2716_v30  ;;  %2754 = vmatmul.bf16.gmra.mxu0 %v6932_v36  ;;  %3306 = vmatpush.bf16.msra.mxu3 %v5549_v46 }
 0x415   : > { %v3434_v60 = vmax.f32 %v2980_v54, 0.0  ;;  %2843 = vmatmul.bf16.gmra.mxu1 %v6935_v27  ;;  %2932 = vmatmul.bf16.gmra.mxu2 %v6941_v23 }
 0x416   : > { %3021 = vmatmul.bf16.gmra.mxu3 %v6945_v55 }
 0x417   : > { %v7299_v16 = vpack.c.bf16 %v3434_v60, %v3430_v38 }
 0x418   : > { %v2893_v40 = vpop.f32.mrf.mxu2 }
 0x419   : > { %8187 = vst [vmem:[#allocation77_spill] sm:$0xff] %v7299_v16  ;;  %v2894_v33 = vadd.f32 %v2893_v40, %v2805_v18  ;;  %v2982_v11 = vpop.f32.mrf.mxu3  ;;  %v2717_v31 = vpop.f32.mrf.mxu0 }
 0x41a   : > { %v2718_v12 = vadd.f32 %v2717_v31, %v7241_v48  ;;  %v2806_v39 = vpop.f32.mrf.mxu1 }
 0x41b   : > { %v2983_v7 = vadd.f32 %v2982_v11, %v2894_v33 }
 0x41c   : > { %v2807_v50 = vadd.f32 %v2806_v39, %v2718_v12 }
 0x41d   : > { %v3438_v17 = vmax.f32 %v2983_v7, 0.0 }
 0x420   : > { %v2895_v53 = vpop.f32.mrf.mxu2 }
 0x421   : > { %v2896_v34 = vadd.f32 %v2895_v53, %v2807_v50  ;;  %v2984_v35 = vpop.f32.mrf.mxu3  ;;  %v2720_v52 = vpop.f32.mrf.mxu0 }
 0x422   : > { %v2721_v2 = vadd.f32 %v2720_v52, %v7241_v48  ;;  %v2809_v25 = vpop.f32.mrf.mxu1 }
 0x423   : > { %v2985_v30 = vadd.f32 %v2984_v35, %v2896_v34 }
 0x424   : > { %v2810_v9 = vadd.f32 %v2809_v25, %v2721_v2  ;;  %2759 = vmatmul.bf16.gmra.mxu0 %v6957_v59 }
 0x425   : > { %v3442_v22 = vmax.f32 %v2985_v30, 0.0  ;;  %2848 = vmatmul.bf16.gmra.mxu1 %v6963_v61  ;;  %2937 = vmatmul.bf16.gmra.mxu2 %v6970_v8 }
 0x426   : > { %3026 = vmatmul.bf16.gmra.mxu3 %v6974_v6 }
 0x427   : > { %v7307_v32 = vpack.c.bf16 %v3442_v22, %v3438_v17 }
 0x428   : > { %v2898_v41 = vpop.f32.mrf.mxu2 }
 0x429   : > { %8188 = vst [vmem:[#allocation78_spill] sm:$0xff] %v7307_v32  ;;  %v2899_v54 = vadd.f32 %v2898_v41, %v2810_v9  ;;  %v2987_v46 = vpop.f32.mrf.mxu3  ;;  %v2722_v18 = vpop.f32.mrf.mxu0 }
 0x42a   : > { %v2723_v38 = vadd.f32 %v2722_v18, %v7241_v48  ;;  %v2811_v60 = vpop.f32.mrf.mxu1 }
 0x42b   : > { %v2988_v40 = vadd.f32 %v2987_v46, %v2899_v54 }
 0x42c   : > { %v2812_v33 = vadd.f32 %v2811_v60, %v2723_v38 }
 0x42d   : > { %v3446_v35 = vmax.f32 %v2988_v40, 0.0 }
 0x430   : > { %v2900_v11 = vpop.f32.mrf.mxu2 }
 0x431   : > { %v2901_v31 = vadd.f32 %v2900_v11, %v2812_v33  ;;  %v2989_v12 = vpop.f32.mrf.mxu3  ;;  %v2725_v39 = vpop.f32.mrf.mxu0 }
 0x432   : > { %v2726_v7 = vadd.f32 %v2725_v39, %v7241_v48  ;;  %v2814_v50 = vpop.f32.mrf.mxu1 }
 0x433   : > { %v2990_v53 = vadd.f32 %v2989_v12, %v2901_v31 }
 0x434   : > { %v2815_v34 = vadd.f32 %v2814_v50, %v2726_v7  ;;  %3040 = vmatmul.bf16.vlgmr.msra.gmra.mxu0 %v6645_v13 }
 0x435   : > { %v3450_v52 = vmax.f32 %v2990_v53, 0.0  ;;  %3129 = vmatmul.bf16.vlgmr.msra.gmra.mxu1 %v6648_v15  ;;  %3218 = vmatmul.bf16.vlgmr.msra.gmra.mxu2 %v6655_v28 }
 0x436   : > { %3307 = vmatmul.bf16.vlgmr.msra.gmra.mxu3 %v6659_v29 }
 0x437   : > { %v7315_v2 = vpack.c.bf16 %v3450_v52, %v3446_v35 }
 0x438   : > { %v2903_v25 = vpop.f32.mrf.mxu2 }
 0x439   : > { %8189 = vst [vmem:[#allocation79_spill] sm:$0xff] %v7315_v2  ;;  %v2904_v30 = vadd.f32 %v2903_v25, %v2815_v34  ;;  %v2992_v9 = vpop.f32.mrf.mxu3  ;;  %v2727_v17 = vpop.f32.mrf.mxu0 }
 0x43a   : > { %v2728_v22 = vadd.f32 %v2727_v17, %v7241_v48  ;;  %v2816_v41 = vpop.f32.mrf.mxu1 }
 0x43b   : > { %v2993_v54 = vadd.f32 %v2992_v9, %v2904_v30 }
 0x43c   : > { %v2817_v46 = vadd.f32 %v2816_v41, %v2728_v22 }
 0x43d   : > { %v3454_v33 = vmax.f32 %v2993_v54, 0.0 }
 0x440   : > { %v2905_v13 = vpop.f32.mrf.mxu2 }
 0x441   : > { %v2906_v18 = vadd.f32 %v2905_v13, %v2817_v46  ;;  %v2994_v38 = vpop.f32.mrf.mxu3  ;;  %v2730_v60 = vpop.f32.mrf.mxu0 }
 0x442   : > { %v2731_v15 = vadd.f32 %v2730_v60, %v7241_v48  ;;  %v2819_v28 = vpop.f32.mrf.mxu1 }
 0x443   : > { %v2995_v40 = vadd.f32 %v2994_v38, %v2906_v18 }
 0x444   : > { %v2820_v29 = vadd.f32 %v2819_v28, %v2731_v15  ;;  %3045 = vmatmul.bf16.gmra.mxu0 %v6666_v42 }
 0x445   : > { %v3458_v11 = vmax.f32 %v2995_v40, 0.0  ;;  %3134 = vmatmul.bf16.gmra.mxu1 %v6669_v44  ;;  %3223 = vmatmul.bf16.gmra.mxu2 %v6676_v57 }
 0x446   : > { %3312 = vmatmul.bf16.gmra.mxu3 %v6680_v58 }
 0x447   : > { %v7323_v31 = vpack.c.bf16 %v3458_v11, %v3454_v33 }
 0x448   : > { %v2908_v12 = vpop.f32.mrf.mxu2 }
 0x449   : > { %8190 = vst [vmem:[#allocation80_spill] sm:$0xff] %v7323_v31  ;;  %v2909_v39 = vadd.f32 %v2908_v12, %v2820_v29  ;;  %v2997_v7 = vpop.f32.mrf.mxu3  ;;  %v2732_v50 = vpop.f32.mrf.mxu0 }
 0x44a   : > { %v2733_v53 = vadd.f32 %v2732_v50, %v7241_v48  ;;  %v2821_v34 = vpop.f32.mrf.mxu1 }
 0x44b   : > { %v2998_v35 = vadd.f32 %v2997_v7, %v2909_v39 }
 0x44c   : > { %v2822_v52 = vadd.f32 %v2821_v34, %v2733_v53 }
 0x44d   : > { %v3462_v22 = vmax.f32 %v2998_v35, 0.0 }
 0x450   : > { %v2910_v42 = vpop.f32.mrf.mxu2 }
 0x451   : > { %v2911_v25 = vadd.f32 %v2910_v42, %v2822_v52  ;;  %v2999_v30 = vpop.f32.mrf.mxu3  ;;  %v2735_v9 = vpop.f32.mrf.mxu0 }
 0x452   : > { %v2736_v44 = vadd.f32 %v2735_v9, %v7241_v48  ;;  %v2824_v57 = vpop.f32.mrf.mxu1 }
 0x453   : > { %v3000_v17 = vadd.f32 %v2999_v30, %v2911_v25 }
 0x454   : > { %v2825_v58 = vadd.f32 %v2824_v57, %v2736_v44  ;;  %3050 = vmatmul.bf16.gmra.mxu0 %v6687_v21 }
 0x455   : > { %v3466_v41 = vmax.f32 %v3000_v17, 0.0  ;;  %3139 = vmatmul.bf16.gmra.mxu1 %v6690_v24  ;;  %3228 = vmatmul.bf16.gmra.mxu2 %v6697_v43 }
 0x456   : > { %3317 = vmatmul.bf16.gmra.mxu3 %v6701_v45 }
 0x457   : > { %v7331_v54 = vpack.c.bf16 %v3466_v41, %v3462_v22 }
 0x458   : > { %v2913_v46 = vpop.f32.mrf.mxu2 }
 0x459   : > { %8191 = vst [vmem:[#allocation81_spill] sm:$0xff] %v7331_v54  ;;  %v2914_v13 = vadd.f32 %v2913_v46, %v2825_v58  ;;  %v3002_v18 = vpop.f32.mrf.mxu3  ;;  %v2737_v38 = vpop.f32.mrf.mxu0 }
 0x45a   : > { %v2738_v60 = vadd.f32 %v2737_v38, %v7241_v48  ;;  %v2826_v15 = vpop.f32.mrf.mxu1 }
 0x45b   : > { %v3003_v28 = vadd.f32 %v3002_v18, %v2914_v13 }
 0x45c   : > { %v2827_v40 = vadd.f32 %v2826_v15, %v2738_v60 }
 0x45d   : > { %v3470_v39 = vmax.f32 %v3003_v28, 0.0 }
 0x460   : > { %v2915_v21 = vpop.f32.mrf.mxu2 }
 0x461   : > { %v2916_v29 = vadd.f32 %v2915_v21, %v2827_v40  ;;  %v3004_v33 = vpop.f32.mrf.mxu3  ;;  %v2740_v11 = vpop.f32.mrf.mxu0 }
 0x462   : > { %v2741_v24 = vadd.f32 %v2740_v11, %v7241_v48  ;;  %v2829_v43 = vpop.f32.mrf.mxu1 }
 0x463   : > { %v3005_v12 = vadd.f32 %v3004_v33, %v2916_v29 }
 0x464   : > { %v2830_v45 = vadd.f32 %v2829_v43, %v2741_v24  ;;  %3055 = vmatmul.bf16.gmra.mxu0 %v8105_v3 }
 0x465   : > { %v3474_v7 = vmax.f32 %v3005_v12, 0.0  ;;  %3144 = vmatmul.bf16.gmra.mxu1 %v8106_v0  ;;  %3233 = vmatmul.bf16.gmra.mxu2 %v8107_v62 }
 0x466   : > { %3322 = vmatmul.bf16.gmra.mxu3 %v8108_v4 }
 0x467   : > { %v7339_v50 = vpack.c.bf16 %v3474_v7, %v3470_v39 }
 0x468   : > { %v2918_v53 = vpop.f32.mrf.mxu2 }
 0x469   : > { %8192 = vst [vmem:[#allocation82_spill] sm:$0xff] %v7339_v50  ;;  %v2919_v34 = vadd.f32 %v2918_v53, %v2830_v45  ;;  %v3007_v35 = vpop.f32.mrf.mxu3  ;;  %v2742_v52 = vpop.f32.mrf.mxu0 }
 0x46a   : > { %v2743_v42 = vadd.f32 %v2742_v52, %v7241_v48  ;;  %v2831_v25 = vpop.f32.mrf.mxu1 }
 0x46b   : > { %v3008_v30 = vadd.f32 %v3007_v35, %v2919_v34 }
 0x46c   : > { %v2832_v9 = vadd.f32 %v2831_v25, %v2743_v42 }
 0x46d   : > { %v3478_v22 = vmax.f32 %v3008_v30, 0.0 }
 0x470   : > { %v2920_v3 = vpop.f32.mrf.mxu2 }
 0x471   : > { %v2921_v44 = vadd.f32 %v2920_v3, %v2832_v9  ;;  %v3009_v57 = vpop.f32.mrf.mxu3  ;;  %v2745_v17 = vpop.f32.mrf.mxu0 }
 0x472   : > { %v2746_v0 = vadd.f32 %v2745_v17, %v7241_v48  ;;  %v2834_v62 = vpop.f32.mrf.mxu1 }
 0x473   : > { %v3010_v58 = vadd.f32 %v3009_v57, %v2921_v44  ;;  %v8195_v57 = vld [vmem:[#allocation24_spill] sm:$0xff] }
 0x474   : > { %v2835_v4 = vadd.f32 %v2834_v62, %v2746_v0  ;;  %3060 = vmatmul.bf16.gmra.mxu0 %v8110_v20  ;;  %v8196_v62 = vld [vmem:[#allocation25_spill] sm:$0xff] }
 0x475   : > { %v3482_v41 = vmax.f32 %v3010_v58, 0.0  ;;  %3149 = vmatmul.bf16.gmra.mxu1 %v8111_v14  ;;  %3238 = vmatmul.bf16.gmra.mxu2 %v8150_v56  ;;  %v8197_v58 = vld [vmem:[#allocation26_spill] sm:$0xff] }
 0x476   : > { %3327 = vmatmul.bf16.gmra.mxu3 %v8151_v10 }
 0x477   : > { %v7347_v46 = vpack.c.bf16 %v3482_v41, %v3478_v22 }
 0x478   : > { %v2923_v13 = vpop.f32.mrf.mxu2 }
 0x479   : > { %8193 = vst [vmem:[#allocation83_spill] sm:$0xff] %v7347_v46  ;;  %v2924_v18 = vadd.f32 %v2923_v13, %v2835_v4  ;;  %v3012_v38 = vpop.f32.mrf.mxu3  ;;  %v2747_v60 = vpop.f32.mrf.mxu0  ;;  %v8198_v4 = vld [vmem:[#allocation27_spill] sm:$0xff] }
 0x47a   : > { %v2748_v15 = vadd.f32 %v2747_v60, %v7241_v48  ;;  %v2836_v28 = vpop.f32.mrf.mxu1 }
 0x47b   : > { %v3013_v40 = vadd.f32 %v3012_v38, %v2924_v18 }
 0x47c   : > { %v2837_v21 = vadd.f32 %v2836_v28, %v2748_v15 }
 0x47d   : > { %v3486_v43 = vmax.f32 %v3013_v40, 0.0 }
 0x480   : > { %v2925_v20 = vpop.f32.mrf.mxu2 }
 0x481   : > { %v2926_v29 = vadd.f32 %v2925_v20, %v2837_v21  ;;  %v3014_v33 = vpop.f32.mrf.mxu3  ;;  %v2750_v11 = vpop.f32.mrf.mxu0 }
 0x482   : > { %v2751_v14 = vadd.f32 %v2750_v11, %v7241_v48  ;;  %v2839_v56 = vpop.f32.mrf.mxu1 }
 0x483   : > { %v3015_v24 = vadd.f32 %v3014_v33, %v2926_v29 }
 0x484   : > { %v2840_v10 = vadd.f32 %v2839_v56, %v2751_v14  ;;  %3065 = vmatmul.bf16.gmra.mxu0 %v8153_v63 }
 0x485   : > { %v3490_v12 = vmax.f32 %v3015_v24, 0.0  ;;  %3154 = vmatmul.bf16.gmra.mxu1 %v8154_v1  ;;  %3243 = vmatmul.bf16.gmra.mxu2 %v8155_v49 }
 0x486   : > { %3332 = vmatmul.bf16.gmra.mxu3 %v8156_v37 }
 0x487   : > { %v7355_v45 = vpack.c.bf16 %v3490_v12, %v3486_v43 }
 0x488   : > { %v2928_v39 = vpop.f32.mrf.mxu2 }
 0x489   : > { %8194 = vst [vmem:[#allocation84_spill] sm:$0xff] %v7355_v45  ;;  %v2929_v7 = vadd.f32 %v2928_v39, %v2840_v10  ;;  %v3017_v53 = vpop.f32.mrf.mxu3  ;;  %v2752_v34 = vpop.f32.mrf.mxu0 }
 0x48a   : > { %v2753_v35 = vadd.f32 %v2752_v34, %v7241_v48  ;;  %v2841_v52 = vpop.f32.mrf.mxu1 }
 0x48b   : > { %v3018_v42 = vadd.f32 %v3017_v53, %v2929_v7 }
 0x48c   : > { %v2842_v25 = vadd.f32 %v2841_v52, %v2753_v35 }
 0x48d   : > { %v3494_v17 = vmax.f32 %v3018_v42, 0.0 }
 0x490   : > { %v2930_v63 = vpop.f32.mrf.mxu2 }
 0x491   : > { %v2931_v30 = vadd.f32 %v2930_v63, %v2842_v25  ;;  %v3019_v9 = vpop.f32.mrf.mxu3  ;;  %v2755_v3 = vpop.f32.mrf.mxu0 }
 0x492   : > { %v2756_v1 = vadd.f32 %v2755_v3, %v7241_v48  ;;  %v2844_v49 = vpop.f32.mrf.mxu1 }
 0x493   : > { %v3020_v44 = vadd.f32 %v3019_v9, %v2931_v30 }
 0x494   : > { %v2845_v37 = vadd.f32 %v2844_v49, %v2756_v1  ;;  %3070 = vmatmul.bf16.gmra.mxu0 %v8195_v57  ;;  %v8201_v49 = vld [vmem:[#allocation31_spill] sm:$0xff]  ;;  %v8203_v57 = vld [vmem:[#allocation33_spill] sm:$0xff] }
 0x495   : > { %v3498_v0 = vmax.f32 %v3020_v44, 0.0  ;;  %3159 = vmatmul.bf16.gmra.mxu1 %v8196_v62  ;;  %3248 = vmatmul.bf16.gmra.mxu2 %v8197_v58 }
 0x496   : > { %3337 = vmatmul.bf16.gmra.mxu3 %v8198_v4 }
 0x497   : > { %v7363_v22 = vpack.c.bf16 %v3498_v0, %v3494_v17  ;;  %v8204_v17 = vld [vmem:[#allocation34_spill] sm:$0xff] }
 0x498   : > { %v2933_v41 = vpop.f32.mrf.mxu2 }
 0x499   : > { %8199 = vst [vmem:[#allocation24_spill] sm:$0xff] %v7363_v22  ;;  %v2934_v13 = vadd.f32 %v2933_v41, %v2845_v37  ;;  %v3022_v18 = vpop.f32.mrf.mxu3  ;;  %v2757_v38 = vpop.f32.mrf.mxu0 }
 0x49a   : > { %v2758_v60 = vadd.f32 %v2757_v38, %v7241_v48  ;;  %v2846_v15 = vpop.f32.mrf.mxu1 }
 0x49b   : > { %v3023_v28 = vadd.f32 %v3022_v18, %v2934_v13 }
 0x49c   : > { %v2847_v40 = vadd.f32 %v2846_v15, %v2758_v60 }
 0x49d   : > { %v3502_v10 = vmax.f32 %v3023_v28, 0.0 }
 0x4a0   : > { %v2935_v21 = vpop.f32.mrf.mxu2 }
 0x4a1   : > { %v2936_v20 = vadd.f32 %v2935_v21, %v2847_v40  ;;  %v3024_v29 = vpop.f32.mrf.mxu3  ;;  %v2760_v33 = vpop.f32.mrf.mxu0 }
 0x4a2   : > { %v2761_v11 = vadd.f32 %v2760_v33, %v7241_v48  ;;  %v2849_v14 = vpop.f32.mrf.mxu1 }
 0x4a3   : > { %v3025_v56 = vadd.f32 %v3024_v29, %v2936_v20 }
 0x4a4   : > { %v2850_v24 = vadd.f32 %v2849_v14, %v2761_v11  ;;  %3075 = vmatmul.bf16.gmra.mxu0 %v6792_v51  ;;  %v7375_v51 = vperm.slane %v7238_v19, 3  ;;  %v8206_v11 = vld [vmem:[#allocation35_spill] sm:$0xff] }
 0x4a5   : > { %v3506_v43 = vmax.f32 %v3025_v56, 0.0  ;;  %3164 = vmatmul.bf16.gmra.mxu1 %v8125_v47  ;;  %3253 = vmatmul.bf16.gmra.mxu2 %v8163_v5 }
 0x4a6   : > { %3342 = vmatmul.bf16.gmra.mxu3 %v8164_v26 }
 0x4a7   : > { %v7371_v12 = vpack.c.bf16 %v3506_v43, %v3502_v10  ;;  %v8208_v10 = vld [vmem:[#allocation37_spill] sm:$0xff]  ;;  %v8209_v43 = vld [vmem:[#allocation38_spill] sm:$0xff] }
 0x4a8   : > { %v2938_v39 = vpop.f32.mrf.mxu2 }
 0x4a9   : > { %8200 = vst [vmem:[#allocation25_spill] sm:$0xff] %v7371_v12  ;;  %v2939_v7 = vadd.f32 %v2938_v39, %v2850_v24  ;;  %v3027_v53 = vpop.f32.mrf.mxu3  ;;  %v2762_v34 = vpop.f32.mrf.mxu0  ;;  %v8207_v24 = vld [vmem:[#allocation36_spill] sm:$0xff] }
 0x4aa   : > { %v2763_v35 = vadd.f32 %v2762_v34, %v7241_v48  ;;  %v2851_v52 = vpop.f32.mrf.mxu1  ;;  %v8202_v48 = vld [vmem:[#allocation32_spill] sm:$0xff] }
 0x4ab   : > { %v3028_v42 = vadd.f32 %v3027_v53, %v2939_v7 }
 0x4ac   : > { %v2852_v25 = vadd.f32 %v2851_v52, %v2763_v35 }
 0x4ad   : > { %v3510_v44 = vmax.f32 %v3028_v42, 0.0 }
 0x4b0   : > { %v2940_v63 = vpop.f32.mrf.mxu2 }
 0x4b1   : > { %v2941_v47 = vadd.f32 %v2940_v63, %v2852_v25  ;;  %v3029_v30 = vpop.f32.mrf.mxu3  ;;  %v3041_v5 = vpop.f32.mrf.mxu0 }
 0x4b2   : > { %v3042_v26 = vadd.f32 %v3041_v5, %v7375_v51  ;;  %v3130_v9 = vpop.f32.mrf.mxu1 }
 0x4b3   : > { %v3030_v3 = vadd.f32 %v3029_v30, %v2941_v47 }
 0x4b4   : > { %v3131_v1 = vadd.f32 %v3130_v9, %v3042_v26  ;;  %3080 = vmatmul.bf16.gmra.mxu0 %v8201_v49 }
 0x4b5   : > { %v3514_v37 = vmax.f32 %v3030_v3, 0.0  ;;  %3169 = vmatmul.bf16.gmra.mxu1 %v8202_v48  ;;  %3258 = vmatmul.bf16.gmra.mxu2 %v8203_v57  ;;  %v8211_v57 = vld [vmem:[#allocation40_spill] sm:$0xff] }
 0x4b6   : > { %3347 = vmatmul.bf16.gmra.mxu3 %v8204_v17  ;;  %v8212_v17 = vld [vmem:[#allocation41_spill] sm:$0xff] }
 0x4b7   : > { %v7382_v19 = vpack.c.bf16 %v3514_v37, %v3510_v44  ;;  %v8210_v44 = vld [vmem:[#allocation39_spill] sm:$0xff] }
 0x4b8   : > { %v3219_v0 = vpop.f32.mrf.mxu2 }
 0x4b9   : > { %8205 = vst [vmem:[#allocation26_spill] sm:$0xff] %v7382_v19  ;;  %v3220_v62 = vadd.f32 %v3219_v0, %v3131_v1  ;;  %v3308_v58 = vpop.f32.mrf.mxu3  ;;  %v3043_v4 = vpop.f32.mrf.mxu0  ;;  %v8213_v0 = vld [vmem:[#allocation42_spill] sm:$0xff] }
 0x4ba   : > { %v3044_v41 = vadd.f32 %v3043_v4, %v7375_v51  ;;  %v3132_v13 = vpop.f32.mrf.mxu1 }
 0x4bb   : > { %v3309_v18 = vadd.f32 %v3308_v58, %v3220_v62  ;;  %v5848_v62 = vld [vmem:[#allocation6 + $0x170] sm:$0xf]  ;;  %v6129_v58 = vld [vmem:[#allocation6 + $0x174] sm:$0xf0] }
 0x4bc   : > { %v3133_v38 = vadd.f32 %v3132_v13, %v3044_v41  ;;  %v5849_v4 = vor.u32 %v6129_v58, %v5848_v62 }
 0x4bd   : > { %v3391_v14 = vmax.f32 %v3309_v18, 0.0 }
 0x4be   : > { %4148 = vmatpush.bf16.msrb.mxu2 %v5849_v4 }
 0x4c0   : > { %v3221_v60 = vpop.f32.mrf.mxu2 }
 0x4c1   : > { %v3222_v15 = vadd.f32 %v3221_v60, %v3133_v38  ;;  %v3310_v28 = vpop.f32.mrf.mxu3  ;;  %v3046_v40 = vpop.f32.mrf.mxu0 }
 0x4c2   : > { %v3047_v21 = vadd.f32 %v3046_v40, %v7375_v51  ;;  %v3135_v20 = vpop.f32.mrf.mxu1 }
 0x4c3   : > { %v3311_v29 = vadd.f32 %v3310_v28, %v3222_v15 }
 0x4c4   : > { %v3136_v33 = vadd.f32 %v3135_v20, %v3047_v21  ;;  %3085 = vmatmul.bf16.gmra.mxu0 %v8206_v11  ;;  %v5720_v20 = vld [vmem:[#allocation6 + $0x70] sm:$0xf] }
 0x4c5   : > { %v3395_v56 = vmax.f32 %v3311_v29, 0.0  ;;  %3174 = vmatmul.bf16.gmra.mxu1 %v8207_v24  ;;  %3263 = vmatmul.bf16.gmra.mxu2 %v8208_v10  ;;  %v6097_v29 = vld [vmem:[#allocation6 + $0x74] sm:$0xf0]  ;;  %v5912_v11 = vld [vmem:[#allocation6 + $0x1f0] sm:$0xf] }
 0x4c6   : > { %3352 = vmatmul.bf16.gmra.mxu3 %v8209_v43  ;;  %v6113_v10 = vld [vmem:[#allocation6 + $0xf4] sm:$0xf0] }
 0x4c7   : > { %v7390_v39 = vpack.c.bf16 %v3395_v56, %v3391_v14  ;;  %v6145_v14 = vld [vmem:[#allocation6 + $0x1f4] sm:$0xf0]  ;;  %v5784_v56 = vld [vmem:[#allocation6 + $0xf0] sm:$0xf] }
 0x4c8   : > { %v3224_v7 = vpop.f32.mrf.mxu2  ;;  %v5913_v24 = vor.u32 %v6145_v14, %v5912_v11  ;;  %v8221_v11 = vld [vmem:[#allocation50_spill] sm:$0xff]  ;;  %v5840_v14 = vld [vmem:[#allocation6 + $0x160] sm:$0xf] }
 0x4c9   : > { %v3225_v53 = vadd.f32 %v3224_v7, %v3136_v33  ;;  %v3313_v34 = vpop.f32.mrf.mxu3  ;;  %v3048_v35 = vpop.f32.mrf.mxu0  ;;  %v5721_v33 = vor.u32 %v6097_v29, %v5720_v20  ;;  %v5785_v7 = vor.u32 %v6113_v10, %v5784_v56  ;;  %v8219_v29 = vld [vmem:[#allocation48_spill] sm:$0xff] }
 0x4ca   : > { %v3049_v52 = vadd.f32 %v3048_v35, %v7375_v51  ;;  %v3137_v42 = vpop.f32.mrf.mxu1  ;;  %4237 = vmatpush.bf16.msrb.mxu3 %v5913_v24  ;;  %v6127_v56 = vld [vmem:[#allocation6 + $0x164] sm:$0xf0] }
 0x4cb   : > { %v3314_v25 = vadd.f32 %v3313_v34, %v3225_v53  ;;  %3970 = vmatpush.bf16.msrb.mxu0 %v5721_v33  ;;  %4059 = vmatpush.bf16.msrb.mxu1 %v5785_v7  ;;  %v8220_v33 = vld [vmem:[#allocation49_spill] sm:$0xff]  ;;  %v5841_v24 = vor.u32 %v6127_v56, %v5840_v14  ;;  %v5712_v7 = vld [vmem:[#allocation6 + $0x60] sm:$0xf]  ;;  %v6107_v14 = vld [vmem:[#allocation6 + $0xc4] sm:$0xf0] }
 0x4cc   : > { %v3138_v63 = vadd.f32 %v3137_v42, %v3049_v52  ;;  %v5824_v56 = vld [vmem:[#allocation6 + $0x140] sm:$0xf] }
 0x4cd   : > { %v3399_v37 = vmax.f32 %v3314_v25, 0.0  ;;  %4149 = vmatpush.bf16.msrb.mxu2 %v5841_v24  ;;  %v6123_v24 = vld [vmem:[#allocation6 + $0x144] sm:$0xf0] }
 0x4d0   : > { %v3226_v47 = vpop.f32.mrf.mxu2 }
 0x4d1   : > { %v3227_v30 = vadd.f32 %v3226_v47, %v3138_v63  ;;  %v3315_v5 = vpop.f32.mrf.mxu3  ;;  %v3051_v26 = vpop.f32.mrf.mxu0  ;;  %v8214_v47 = vld [vmem:[#allocation43_spill] sm:$0xff] }
 0x4d2   : > { %v3052_v9 = vadd.f32 %v3051_v26, %v7375_v51  ;;  %v3140_v3 = vpop.f32.mrf.mxu1  ;;  %v8215_v26 = vld [vmem:[#allocation44_spill] sm:$0xff] }
 0x4d3   : > { %v3316_v1 = vadd.f32 %v3315_v5, %v3227_v30 }
 0x4d4   : > { %v3141_v49 = vadd.f32 %v3140_v3, %v3052_v9  ;;  %3090 = vmatmul.bf16.gmra.mxu0 %v8210_v44  ;;  %v8216_v9 = vld [vmem:[#allocation45_spill] sm:$0xff]  ;;  %v8217_v3 = vld [vmem:[#allocation46_spill] sm:$0xff] }
 0x4d5   : > { %v3403_v48 = vmax.f32 %v3316_v1, 0.0  ;;  %3179 = vmatmul.bf16.gmra.mxu1 %v8211_v57  ;;  %3268 = vmatmul.bf16.gmra.mxu2 %v8212_v17 }
 0x4d6   : > { %3357 = vmatmul.bf16.gmra.mxu3 %v8213_v0 }
 0x4d7   : > { %v7398_v41 = vpack.c.bf16 %v3403_v48, %v3399_v37 }
 0x4d8   : > { %v3229_v13 = vpop.f32.mrf.mxu2 }
 0x4d9   : > { %v3230_v18 = vadd.f32 %v3229_v13, %v3141_v49  ;;  %v3318_v38 = vpop.f32.mrf.mxu3  ;;  %v3053_v60 = vpop.f32.mrf.mxu0 }
 0x4da   : > { %v3054_v15 = vadd.f32 %v3053_v60, %v7375_v51  ;;  %v3142_v28 = vpop.f32.mrf.mxu1 }
 0x4db   : > { %v3319_v40 = vadd.f32 %v3318_v38, %v3230_v18 }
 0x4dc   : > { %v3143_v21 = vadd.f32 %v3142_v28, %v3054_v15 }
 0x4dd   : > { %v3407_v30 = vmax.f32 %v3319_v40, 0.0  ;;  %v8218_v40 = vld [vmem:[#allocation47_spill] sm:$0xff] }
 0x4e0   : > { %v3231_v43 = vpop.f32.mrf.mxu2 }
 0x4e1   : > { %v3232_v53 = vadd.f32 %v3231_v43, %v3143_v21  ;;  %v3320_v34 = vpop.f32.mrf.mxu3  ;;  %v3056_v35 = vpop.f32.mrf.mxu0 }
 0x4e2   : > { %v3057_v52 = vadd.f32 %v3056_v35, %v7375_v51  ;;  %v3145_v42 = vpop.f32.mrf.mxu1 }
 0x4e3   : > { %v3321_v25 = vadd.f32 %v3320_v34, %v3232_v53  ;;  %v6095_v53 = vld [vmem:[#allocation6 + $0x64] sm:$0xf0]  ;;  %v5904_v34 = vld [vmem:[#allocation6 + $0x1e0] sm:$0xf] }
 0x4e4   : > { %v3146_v63 = vadd.f32 %v3145_v42, %v3057_v52  ;;  %3095 = vmatmul.bf16.gmra.mxu0 %v8214_v47  ;;  %v5776_v47 = vld [vmem:[#allocation6 + $0xe0] sm:$0xf] }
 0x4e5   : > { %v3411_v5 = vmax.f32 %v3321_v25, 0.0  ;;  %3184 = vmatmul.bf16.gmra.mxu1 %v8215_v26  ;;  %3273 = vmatmul.bf16.gmra.mxu2 %v8216_v9  ;;  %v5713_v25 = vor.u32 %v6095_v53, %v5712_v7 }
 0x4e6   : > { %3362 = vmatmul.bf16.gmra.mxu3 %v8217_v3 }
 0x4e7   : > { %v7406_v1 = vpack.c.bf16 %v3411_v5, %v3407_v30  ;;  %v6111_v30 = vld [vmem:[#allocation6 + $0xe4] sm:$0xf0]  ;;  %3971 = vmatpush.bf16.msrb.mxu0 %v5713_v25 }
 0x4e8   : > { %v3234_v49 = vpop.f32.mrf.mxu2  ;;  %v5777_v3 = vor.u32 %v6111_v30, %v5776_v47  ;;  %v8222_v47 = vld [vmem:[#allocation51_spill] sm:$0xff]  ;;  %v5688_v30 = vld [vmem:[#allocation6 + $0x30] sm:$0xf] }
 0x4e9   : > { %v3235_v44 = vadd.f32 %v3234_v49, %v3146_v63  ;;  %v3323_v37 = vpop.f32.mrf.mxu3  ;;  %v3058_v48 = vpop.f32.mrf.mxu0  ;;  %v6143_v63 = vld [vmem:[#allocation6 + $0x1e4] sm:$0xf0] }
 0x4ea   : > { %v3059_v57 = vadd.f32 %v3058_v48, %v7375_v51  ;;  %v3147_v17 = vpop.f32.mrf.mxu1  ;;  %v5905_v9 = vor.u32 %v6143_v63, %v5904_v34  ;;  %4060 = vmatpush.bf16.msrb.mxu1 %v5777_v3  ;;  %v6093_v48 = vld [vmem:[#allocation6 + $0x54] sm:$0xf0]  ;;  %v5825_v34 = vor.u32 %v6123_v24, %v5824_v56  ;;  %v6119_v56 = vld [vmem:[#allocation6 + $0x124] sm:$0xf0] }
 0x4eb   : > { %v3324_v0 = vadd.f32 %v3323_v37, %v3235_v44  ;;  %v5704_v37 = vld [vmem:[#allocation6 + $0x50] sm:$0xf] }
 0x4ec   : > { %v3148_v62 = vadd.f32 %v3147_v17, %v3059_v57  ;;  %4238 = vmatpush.bf16.msrb.mxu3 %v5905_v9  ;;  %v5768_v57 = vld [vmem:[#allocation6 + $0xd0] sm:$0xf]  ;;  %v5705_v17 = vor.u32 %v6093_v48, %v5704_v37 }
 0x4ed   : > { %v3415_v21 = vmax.f32 %v3324_v0, 0.0  ;;  %v6109_v0 = vld [vmem:[#allocation6 + $0xd4] sm:$0xf0]  ;;  %v8224_v37 = vld [vmem:[#allocation53_spill] sm:$0xff] }
 0x4ee   : > { %3972 = vmatpush.bf16.msrb.mxu0 %v5705_v17  ;;  %v5816_v17 = vld [vmem:[#allocation6 + $0x130] sm:$0xf] }
 0x4f0   : > { %v3236_v58 = vpop.f32.mrf.mxu2 }
 0x4f1   : > { %v3237_v4 = vadd.f32 %v3236_v58, %v3148_v62  ;;  %v3325_v13 = vpop.f32.mrf.mxu3  ;;  %v3061_v18 = vpop.f32.mrf.mxu0  ;;  %v5832_v62 = vld [vmem:[#allocation6 + $0x150] sm:$0xf]  ;;  %v5769_v58 = vor.u32 %v6109_v0, %v5768_v57  ;;  %v6105_v57 = vld [vmem:[#allocation6 + $0xb4] sm:$0xf0] }
 0x4f2   : > { %v3062_v38 = vadd.f32 %v3061_v18, %v7375_v51  ;;  %v3150_v60 = vpop.f32.mrf.mxu1  ;;  %v6141_v18 = vld [vmem:[#allocation6 + $0x1d4] sm:$0xf0] }
 0x4f3   : > { %v3326_v15 = vadd.f32 %v3325_v13, %v3237_v4  ;;  %v6125_v4 = vld [vmem:[#allocation6 + $0x154] sm:$0xf0]  ;;  %v5896_v13 = vld [vmem:[#allocation6 + $0x1d0] sm:$0xf]  ;;  %4061 = vmatpush.bf16.msrb.mxu1 %v5769_v58 }
 0x4f4   : > { %v3151_v28 = vadd.f32 %v3150_v60, %v3062_v38  ;;  %3100 = vmatmul.bf16.gmra.mxu0 %v8218_v40  ;;  %v5833_v38 = vor.u32 %v6125_v4, %v5832_v62  ;;  %v5897_v60 = vor.u32 %v6141_v18, %v5896_v13  ;;  %v6091_v40 = vld [vmem:[#allocation6 + $0x44] sm:$0xf0]  ;;  %v8225_v0 = vld [vmem:[#allocation54_spill] sm:$0xff]  ;;  %v5880_v4 = vld [vmem:[#allocation6 + $0x1b0] sm:$0xf] }
 0x4f5   : > { %v3419_v20 = vmax.f32 %v3326_v15, 0.0  ;;  %3189 = vmatmul.bf16.gmra.mxu1 %v8219_v29  ;;  %3278 = vmatmul.bf16.gmra.mxu2 %v8220_v33  ;;  %v6121_v58 = vld [vmem:[#allocation6 + $0x134] sm:$0xf0] }
 0x4f6   : > { %3367 = vmatmul.bf16.gmra.mxu3 %v8221_v11  ;;  %4150 = vmatpush.bf16.msrb.mxu2 %v5833_v38  ;;  %v6137_v13 = vld [vmem:[#allocation6 + $0x1b4] sm:$0xf0]  ;;  %v5817_v18 = vor.u32 %v6121_v58, %v5816_v17  ;;  %v6083_v58 = vld [vmem:[#allocation6 + $0x4] sm:$0xf0] }
 0x4f7   : > { %v7414_v10 = vpack.c.bf16 %v3419_v20, %v3415_v21  ;;  %v5760_v21 = vld [vmem:[#allocation6 + $0xc0] sm:$0xf]  ;;  %4239 = vmatpush.bf16.msrb.mxu3 %v5897_v60  ;;  %v5881_v38 = vor.u32 %v6137_v13, %v5880_v4 }
 0x4f8   : > { %v3239_v43 = vpop.f32.mrf.mxu2  ;;  %v5761_v53 = vor.u32 %v6107_v14, %v5760_v21  ;;  %v5808_v14 = vld [vmem:[#allocation6 + $0x120] sm:$0xf] }
 0x4f9   : > { %v3240_v35 = vadd.f32 %v3239_v43, %v3151_v28  ;;  %v3328_v52 = vpop.f32.mrf.mxu3  ;;  %v3063_v42 = vpop.f32.mrf.mxu0  ;;  %v5696_v28 = vld [vmem:[#allocation6 + $0x40] sm:$0xf] }
 0x4fa   : > { %v3064_v5 = vadd.f32 %v3063_v42, %v7375_v51  ;;  %v3152_v26 = vpop.f32.mrf.mxu1  ;;  %v5697_v11 = vor.u32 %v6091_v40, %v5696_v28  ;;  %4062 = vmatpush.bf16.msrb.mxu1 %v5761_v53  ;;  %4151 = vmatpush.bf16.msrb.mxu2 %v5825_v34  ;;  %v6087_v28 = vld [vmem:[#allocation6 + $0x24] sm:$0xf0]  ;;  %v5744_v40 = vld [vmem:[#allocation6 + $0xa0] sm:$0xf]  ;;  %v5809_v53 = vor.u32 %v6119_v56, %v5808_v14 }
 0x4fb   : > { %v7417_v49 = vadd.f32 %v3328_v52, %v3240_v35  ;;  %v5888_v35 = vld [vmem:[#allocation6 + $0x1c0] sm:$0xf]  ;;  %v6139_v52 = vld [vmem:[#allocation6 + $0x1c4] sm:$0xf0] }
 0x4fc   : > { %v3153_v44 = vadd.f32 %v3152_v26, %v3064_v5  ;;  %3973 = vmatpush.bf16.msrb.mxu0 %v5697_v11  ;;  %v5889_v25 = vor.u32 %v6139_v52, %v5888_v35  ;;  %v6089_v5 = vld [vmem:[#allocation6 + $0x34] sm:$0xf0]  ;;  %v5752_v26 = vld [vmem:[#allocation6 + $0xb0] sm:$0xf]  ;;  %v6103_v11 = vld [vmem:[#allocation6 + $0xa4] sm:$0xf0] }
 0x4fd   : > { %v3423_v9 = vmax.f32 %v7417_v49, 0.0  ;;  %v5689_v48 = vor.u32 %v6089_v5, %v5688_v30  ;;  %v5753_v62 = vor.u32 %v6105_v57, %v5752_v26  ;;  %v5872_v34 = vld [vmem:[#allocation6 + $0x1a0] sm:$0xf]  ;;  %v6135_v35 = vld [vmem:[#allocation6 + $0x1a4] sm:$0xf0] }
 0x4fe   : > { %4240 = vmatpush.bf16.msrb.mxu3 %v5889_v25  ;;  %4152 = vmatpush.bf16.msrb.mxu2 %v5817_v18  ;;  %v5736_v30 = vld [vmem:[#allocation6 + $0x90] sm:$0xf]  ;;  %v6101_v26 = vld [vmem:[#allocation6 + $0x94] sm:$0xf0]  ;;  %v5728_v4 = vld [vmem:[#allocation6 + $0x80] sm:$0xf] }
 0x4ff   : > { %4063 = vmatpush.bf16.msrb.mxu1 %v5753_v62  ;;  %v5664_v62 = vld [vmem:[#allocation6] sm:$0xf]  ;;  %v6131_v14 = vld [vmem:[#allocation6 + $0x184] sm:$0xf0] }
 0x500   : > { %v3241_v15 = vpop.f32.mrf.mxu2  ;;  %3974 = vmatpush.bf16.msrb.mxu0 %v5689_v48  ;;  %v6133_v48 = vld [vmem:[#allocation6 + $0x194] sm:$0xf0] }
 0x501   : > { %v3242_v20 = vadd.f32 %v3241_v15, %v3153_v44  ;;  %v3330_v29 = vpop.f32.mrf.mxu3  ;;  %v3066_v33 = vpop.f32.mrf.mxu0  ;;  %v8223_v44 = vld [vmem:[#allocation52_spill] sm:$0xff]  ;;  %v5680_v15 = vld [vmem:[#allocation6 + $0x20] sm:$0xf] }
 0x502   : > { %v3067_v43 = vadd.f32 %v3066_v33, %v7375_v51  ;;  %v3155_v7 = vpop.f32.mrf.mxu1  ;;  %v5681_v33 = vor.u32 %v6087_v28, %v5680_v15  ;;  %4241 = vmatpush.bf16.msrb.mxu3 %v5881_v38  ;;  %4153 = vmatpush.bf16.msrb.mxu2 %v5809_v53  ;;  %v6099_v15 = vld [vmem:[#allocation6 + $0x84] sm:$0xf0]  ;;  %v5792_v28 = vld [vmem:[#allocation6 + $0x100] sm:$0xf] }
 0x503   : > { %v3331_v42 = vadd.f32 %v3330_v29, %v3242_v20 }
 0x504   : > { %v3156_v63 = vadd.f32 %v3155_v7, %v3067_v43  ;;  %3105 = vmatmul.bf16.gmra.mxu0 %v8222_v47  ;;  %v5745_v7 = vor.u32 %v6103_v11, %v5744_v40  ;;  %v6085_v47 = vld [vmem:[#allocation6 + $0x14] sm:$0xf0]  ;;  %v6115_v40 = vld [vmem:[#allocation6 + $0x104] sm:$0xf0]  ;;  %v5856_v11 = vld [vmem:[#allocation6 + $0x180] sm:$0xf] }
 0x505   : > { %v3427_v3 = vmax.f32 %v3331_v42, 0.0  ;;  %3194 = vmatmul.bf16.gmra.mxu1 %v8223_v44  ;;  %3283 = vmatmul.bf16.gmra.mxu2 %v8224_v37  ;;  %v5873_v42 = vor.u32 %v6135_v35, %v5872_v34  ;;  %v6117_v44 = vld [vmem:[#allocation6 + $0x114] sm:$0xf0]  ;;  %v5864_v37 = vld [vmem:[#allocation6 + $0x190] sm:$0xf] }
 0x506   : > { %3372 = vmatmul.bf16.gmra.mxu3 %v8225_v0  ;;  %3975 = vmatpush.bf16.msrb.mxu0 %v5681_v33  ;;  %v5865_v17 = vor.u32 %v6133_v48, %v5864_v37  ;;  %v5793_v33 = vor.u32 %v6115_v40, %v5792_v28 }
 0x507   : > { %v7425_v49 = vpack.c.bf16 %v3427_v3, %v3423_v9  ;;  %4064 = vmatpush.bf16.msrb.mxu1 %v5745_v7  ;;  %v5800_v9 = vld [vmem:[#allocation6 + $0x110] sm:$0xf]  ;;  %v5737_v3 = vor.u32 %v6101_v26, %v5736_v30  ;;  %4242 = vmatpush.bf16.msrb.mxu3 %v5873_v42 }
 0x508   : > { %v3244_v60 = vpop.f32.mrf.mxu2  ;;  %v5801_v57 = vor.u32 %v6117_v44, %v5800_v9 }
 0x509   : > { %8226 = vst [vmem:[#allocation27_spill] sm:$0xff] %v7425_v49  ;;  %v3245_v21 = vadd.f32 %v3244_v60, %v3156_v63  ;;  %v3333_v20 = vpop.f32.mrf.mxu3  ;;  %v3068_v29 = vpop.f32.mrf.mxu0  ;;  %v5672_v63 = vld [vmem:[#allocation6 + $0x10] sm:$0xf]  ;;  %v5665_v60 = vor.u32 %v6083_v58, %v5664_v62 }
 0x50a   : > { %v3069_v24 = vadd.f32 %v3068_v29, %v7375_v51  ;;  %v3157_v43 = vpop.f32.mrf.mxu1  ;;  %v5673_v5 = vor.u32 %v6085_v47, %v5672_v63  ;;  %4154 = vmatpush.bf16.msrb.mxu2 %v5801_v57  ;;  %v5729_v29 = vor.u32 %v6099_v15, %v5728_v4 }
 0x50b   : > { %v3334_v52 = vadd.f32 %v3333_v20, %v3245_v21  ;;  %4065 = vmatpush.bf16.msrb.mxu1 %v5737_v3  ;;  %4243 = vmatpush.bf16.msrb.mxu3 %v5865_v17 }
 0x50c   : > { %v3158_v25 = vadd.f32 %v3157_v43, %v3069_v24  ;;  %3976 = vmatpush.bf16.msrb.mxu0 %v5673_v5  ;;  %v5857_v24 = vor.u32 %v6131_v14, %v5856_v11  ;;  %v8231_v11 = vld [vmem:[#allocation23_spill] sm:$0xff] }
 0x50d   : > { %v3431_v7 = vmax.f32 %v3334_v52, 0.0 }
 0x50e   : > { %4155 = vmatpush.bf16.msrb.mxu2 %v5793_v33  ;;  %v8230_v33 = vld [vmem:[#allocation28_spill] sm:$0xff] }
 0x50f   : > { %4066 = vmatpush.bf16.msrb.mxu1 %v5729_v29  ;;  %4244 = vmatpush.bf16.msrb.mxu3 %v5857_v24 }
 0x510   : > { %v3246_v0 = vpop.f32.mrf.mxu2  ;;  %3977 = vmatpush.bf16.msrb.mxu0 %v5665_v60 }
 0x511   : > { %v3247_v13 = vadd.f32 %v3246_v0, %v3158_v25  ;;  %v3335_v18 = vpop.f32.mrf.mxu3  ;;  %v3071_v38 = vpop.f32.mrf.mxu0 }
 0x512   : > { %v3072_v21 = vadd.f32 %v3071_v38, %v7375_v51  ;;  %v3160_v20 = vpop.f32.mrf.mxu1 }
 0x513   : > { %v3336_v56 = vadd.f32 %v3335_v18, %v3247_v13 }
 0x514   : > { %v3161_v43 = vadd.f32 %v3160_v20, %v3072_v21  ;;  %3110 = vmatmul.bf16.gmra.mxu0 %v6932_v36  ;;  %v8229_v21 = vld [vmem:[#allocation56_spill] sm:$0xff] }
 0x515   : > { %v3435_v53 = vmax.f32 %v3336_v56, 0.0  ;;  %3199 = vmatmul.bf16.gmra.mxu1 %v6935_v27  ;;  %3288 = vmatmul.bf16.gmra.mxu2 %v6941_v23 }
 0x516   : > { %3377 = vmatmul.bf16.gmra.mxu3 %v6945_v55 }
 0x517   : > { %v7433_v34 = vpack.c.bf16 %v3435_v53, %v3431_v7 }
 0x518   : > { %v3249_v35 = vpop.f32.mrf.mxu2 }
 0x519   : > { %8227 = vst [vmem:[#allocation31_spill] sm:$0xff] %v7433_v34  ;;  %v3250_v42 = vadd.f32 %v3249_v35, %v3161_v43  ;;  %v3338_v25 = vpop.f32.mrf.mxu3  ;;  %v3073_v63 = vpop.f32.mrf.mxu0 }
 0x51a   : > { %v3074_v47 = vadd.f32 %v3073_v63, %v7375_v51  ;;  %v3162_v36 = vpop.f32.mrf.mxu1 }
 0x51b   : > { %v3339_v30 = vadd.f32 %v3338_v25, %v3250_v42 }
 0x51c   : > { %v3163_v52 = vadd.f32 %v3162_v36, %v3074_v47 }
 0x51d   : > { %v3439_v37 = vmax.f32 %v3339_v30, 0.0 }
 0x520   : > { %v3251_v5 = vpop.f32.mrf.mxu2 }
 0x521   : > { %v3252_v26 = vadd.f32 %v3251_v5, %v3163_v52  ;;  %v3340_v27 = vpop.f32.mrf.mxu3  ;;  %v3076_v9 = vpop.f32.mrf.mxu0 }
 0x522   : > { %v3077_v23 = vadd.f32 %v3076_v9, %v7375_v51  ;;  %v3165_v55 = vpop.f32.mrf.mxu1  ;;  %v8233_v9 = vld [vmem:[#allocation57_spill] sm:$0xff] }
 0x523   : > { %v3341_v3 = vadd.f32 %v3340_v27, %v3252_v26 }
 0x524   : > { %v3166_v44 = vadd.f32 %v3165_v55, %v3077_v23  ;;  %3115 = vmatmul.bf16.gmra.mxu0 %v6957_v59 }
 0x525   : > { %v3443_v48 = vmax.f32 %v3341_v3, 0.0  ;;  %3204 = vmatmul.bf16.gmra.mxu1 %v6963_v61  ;;  %3293 = vmatmul.bf16.gmra.mxu2 %v6970_v8  ;;  %v8234_v3 = vld [vmem:[#allocation55_spill] sm:$0xff] }
 0x526   : > { %3382 = vmatmul.bf16.gmra.mxu3 %v6974_v6 }
 0x527   : > { %v7441_v57 = vpack.c.bf16 %v3443_v48, %v3439_v37 }
 0x528   : > { %v3254_v17 = vpop.f32.mrf.mxu2 }
 0x529   : > { %8228 = vst [vmem:[#allocation32_spill] sm:$0xff] %v7441_v57  ;;  %v3255_v0 = vadd.f32 %v3254_v17, %v3166_v44  ;;  %v3343_v62 = vpop.f32.mrf.mxu3  ;;  %v3078_v58 = vpop.f32.mrf.mxu0  ;;  %v8235_v44 = vld [vmem:[#allocation29_spill] sm:$0xff] }
 0x52a   : > { %v3079_v4 = vadd.f32 %v3078_v58, %v7375_v51  ;;  %v3167_v13 = vpop.f32.mrf.mxu1 }
 0x52b   : > { %v3344_v18 = vadd.f32 %v3343_v62, %v3255_v0 }
 0x52c   : > { %v3168_v38 = vadd.f32 %v3167_v13, %v3079_v4 }
 0x52d   : > { %v3447_v20 = vmax.f32 %v3344_v18, 0.0 }
 0x530   : > { %v3256_v59 = vpop.f32.mrf.mxu2 }
 0x531   : > { %v3257_v60 = vadd.f32 %v3256_v59, %v3168_v38  ;;  %v3345_v15 = vpop.f32.mrf.mxu3  ;;  %v3081_v28 = vpop.f32.mrf.mxu0 }
 0x532   : > { %v3082_v61 = vadd.f32 %v3081_v28, %v7375_v51  ;;  %v3170_v8 = vpop.f32.mrf.mxu1 }
 0x533   : > { %v3346_v40 = vadd.f32 %v3345_v15, %v3257_v60 }
 0x534   : > { %v3171_v6 = vadd.f32 %v3170_v8, %v3082_v61  ;;  %3978 = vmatmul.bf16.vlgmr.msrb.gmra.mxu0 %v8229_v21 }
 0x535   : > { %v3451_v29 = vmax.f32 %v3346_v40, 0.0  ;;  %4067 = vmatmul.bf16.vlgmr.msrb.gmra.mxu1 %v8230_v33  ;;  %4156 = vmatmul.bf16.vlgmr.msrb.gmra.mxu2 %v8231_v11 }
 0x536   : > { %4245 = vmatmul.bf16.vlgmr.msrb.gmra.mxu3 %v7390_v39 }
 0x537   : > { %v7449_v14 = vpack.c.bf16 %v3451_v29, %v3447_v20 }
 0x538   : > { %v3259_v56 = vpop.f32.mrf.mxu2 }
 0x539   : > { %8232 = vst [vmem:[#allocation33_spill] sm:$0xff] %v7449_v14  ;;  %v3260_v24 = vadd.f32 %v3259_v56, %v3171_v6  ;;  %v3348_v43 = vpop.f32.mrf.mxu3  ;;  %v3083_v7 = vpop.f32.mrf.mxu0  ;;  %v8237_v6 = vld [vmem:[#allocation58_spill] sm:$0xff] }
 0x53a   : > { %v3084_v53 = vadd.f32 %v3083_v7, %v7375_v51  ;;  %v3172_v35 = vpop.f32.mrf.mxu1  ;;  %v8238_v56 = vld [vmem:[#allocation66_spill] sm:$0xff] }
 0x53b   : > { %v3349_v42 = vadd.f32 %v3348_v43, %v3260_v24  ;;  %v8239_v24 = vld [vmem:[#allocation30_spill] sm:$0xff] }
 0x53c   : > { %v3173_v25 = vadd.f32 %v3172_v35, %v3084_v53 }
 0x53d   : > { %v3455_v23 = vmax.f32 %v3349_v42, 0.0 }
 0x540   : > { %v3261_v63 = vpop.f32.mrf.mxu2 }
 0x541   : > { %v3262_v47 = vadd.f32 %v3261_v63, %v3173_v25  ;;  %v3350_v36 = vpop.f32.mrf.mxu3  ;;  %v3086_v30 = vpop.f32.mrf.mxu0 }
 0x542   : > { %v3087_v52 = vadd.f32 %v3086_v30, %v7375_v51  ;;  %v3175_v5 = vpop.f32.mrf.mxu1 }
 0x543   : > { %v3351_v26 = vadd.f32 %v3350_v36, %v3262_v47 }
 0x544   : > { %v3176_v27 = vadd.f32 %v3175_v5, %v3087_v52  ;;  %3983 = vmatmul.bf16.gmra.mxu0 %v8233_v9 }
 0x545   : > { %v3459_v55 = vmax.f32 %v3351_v26, 0.0  ;;  %4072 = vmatmul.bf16.gmra.mxu1 %v8234_v3  ;;  %4161 = vmatmul.bf16.gmra.mxu2 %v8235_v44 }
 0x546   : > { %4250 = vmatmul.bf16.gmra.mxu3 %v7398_v41 }
 0x547   : > { %v7457_v37 = vpack.c.bf16 %v3459_v55, %v3455_v23 }
 0x548   : > { %v3264_v48 = vpop.f32.mrf.mxu2 }
 0x549   : > { %8236 = vst [vmem:[#allocation34_spill] sm:$0xff] %v7457_v37  ;;  %v3265_v17 = vadd.f32 %v3264_v48, %v3176_v27  ;;  %v3353_v0 = vpop.f32.mrf.mxu3  ;;  %v3088_v62 = vpop.f32.mrf.mxu0 }
 0x54a   : > { %v3089_v58 = vadd.f32 %v3088_v62, %v7375_v51  ;;  %v3177_v4 = vpop.f32.mrf.mxu1 }
 0x54b   : > { %v3354_v13 = vadd.f32 %v3353_v0, %v3265_v17  ;;  %v8241_v17 = vld [vmem:[#allocation59_spill] sm:$0xff] }
 0x54c   : > { %v3178_v18 = vadd.f32 %v3177_v4, %v3089_v58  ;;  %v8242_v58 = vld [vmem:[#allocation67_spill] sm:$0xff] }
 0x54d   : > { %v3463_v20 = vmax.f32 %v3354_v13, 0.0  ;;  %v8243_v4 = vld [vmem:[#allocation75_spill] sm:$0xff] }
 0x550   : > { %v3266_v38 = vpop.f32.mrf.mxu2 }
 0x551   : > { %v3267_v59 = vadd.f32 %v3266_v38, %v3178_v18  ;;  %v3355_v60 = vpop.f32.mrf.mxu3  ;;  %v3091_v15 = vpop.f32.mrf.mxu0 }
 0x552   : > { %v3092_v28 = vadd.f32 %v3091_v15, %v7375_v51  ;;  %v3180_v61 = vpop.f32.mrf.mxu1 }
 0x553   : > { %v3356_v8 = vadd.f32 %v3355_v60, %v3267_v59 }
 0x554   : > { %v3181_v40 = vadd.f32 %v3180_v61, %v3092_v28  ;;  %3988 = vmatmul.bf16.gmra.mxu0 %v8237_v6 }
 0x555   : > { %v3467_v29 = vmax.f32 %v3356_v8, 0.0  ;;  %4077 = vmatmul.bf16.gmra.mxu1 %v8238_v56  ;;  %4166 = vmatmul.bf16.gmra.mxu2 %v8239_v24 }
 0x556   : > { %4255 = vmatmul.bf16.gmra.mxu3 %v7406_v1 }
 0x557   : > { %v7465_v43 = vpack.c.bf16 %v3467_v29, %v3463_v20 }
 0x558   : > { %v3269_v7 = vpop.f32.mrf.mxu2 }
 0x559   : > { %8240 = vst [vmem:[#allocation35_spill] sm:$0xff] %v7465_v43  ;;  %v3270_v53 = vadd.f32 %v3269_v7, %v3181_v40  ;;  %v3358_v35 = vpop.f32.mrf.mxu3  ;;  %v3093_v42 = vpop.f32.mrf.mxu0 }
 0x55a   : > { %v3094_v25 = vadd.f32 %v3093_v42, %v7375_v51  ;;  %v3182_v63 = vpop.f32.mrf.mxu1 }
 0x55b   : > { %v3359_v47 = vadd.f32 %v3358_v35, %v3270_v53 }
 0x55c   : > { %v3183_v36 = vadd.f32 %v3182_v63, %v3094_v25  ;;  %v8245_v63 = vld [vmem:[#allocation60_spill] sm:$0xff] }
 0x55d   : > { %v3471_v0 = vmax.f32 %v3359_v47, 0.0 }
 0x560   : > { %v3271_v30 = vpop.f32.mrf.mxu2 }
 0x561   : > { %v3272_v52 = vadd.f32 %v3271_v30, %v3183_v36  ;;  %v3360_v5 = vpop.f32.mrf.mxu3  ;;  %v3096_v26 = vpop.f32.mrf.mxu0  ;;  %v8246_v30 = vld [vmem:[#allocation68_spill] sm:$0xff] }
 0x562   : > { %v3097_v27 = vadd.f32 %v3096_v26, %v7375_v51  ;;  %v3185_v23 = vpop.f32.mrf.mxu1 }
 0x563   : > { %v3361_v55 = vadd.f32 %v3360_v5, %v3272_v52  ;;  %v8247_v52 = vld [vmem:[#allocation76_spill] sm:$0xff] }
 0x564   : > { %v3186_v48 = vadd.f32 %v3185_v23, %v3097_v27  ;;  %3993 = vmatmul.bf16.gmra.mxu0 %v8241_v17 }
 0x565   : > { %v3475_v62 = vmax.f32 %v3361_v55, 0.0  ;;  %4082 = vmatmul.bf16.gmra.mxu1 %v8242_v58  ;;  %4171 = vmatmul.bf16.gmra.mxu2 %v8243_v4 }
 0x566   : > { %4260 = vmatmul.bf16.gmra.mxu3 %v7414_v10 }
 0x567   : > { %v7473_v13 = vpack.c.bf16 %v3475_v62, %v3471_v0 }
 0x568   : > { %v3274_v18 = vpop.f32.mrf.mxu2 }
 0x569   : > { %8244 = vst [vmem:[#allocation36_spill] sm:$0xff] %v7473_v13  ;;  %v3275_v38 = vadd.f32 %v3274_v18, %v3186_v48  ;;  %v3363_v59 = vpop.f32.mrf.mxu3  ;;  %v3098_v60 = vpop.f32.mrf.mxu0 }
 0x56a   : > { %v3099_v15 = vadd.f32 %v3098_v60, %v7375_v51  ;;  %v3187_v28 = vpop.f32.mrf.mxu1 }
 0x56b   : > { %v3364_v61 = vadd.f32 %v3363_v59, %v3275_v38 }
 0x56c   : > { %v3188_v8 = vadd.f32 %v3187_v28, %v3099_v15 }
 0x56d   : > { %v3479_v47 = vmax.f32 %v3364_v61, 0.0 }
 0x570   : > { %v3276_v40 = vpop.f32.mrf.mxu2 }
 0x571   : > { %v3277_v20 = vadd.f32 %v3276_v40, %v3188_v8  ;;  %v3365_v29 = vpop.f32.mrf.mxu3  ;;  %v3101_v7 = vpop.f32.mrf.mxu0 }
 0x572   : > { %v3102_v53 = vadd.f32 %v3101_v7, %v7375_v51  ;;  %v3190_v35 = vpop.f32.mrf.mxu1 }
 0x573   : > { %v3366_v42 = vadd.f32 %v3365_v29, %v3277_v20  ;;  %v8249_v20 = vld [vmem:[#allocation61_spill] sm:$0xff] }
 0x574   : > { %v3191_v25 = vadd.f32 %v3190_v35, %v3102_v53  ;;  %3998 = vmatmul.bf16.gmra.mxu0 %v8245_v63  ;;  %v8250_v53 = vld [vmem:[#allocation69_spill] sm:$0xff] }
 0x575   : > { %v3483_v36 = vmax.f32 %v3366_v42, 0.0  ;;  %4087 = vmatmul.bf16.gmra.mxu1 %v8246_v30  ;;  %4176 = vmatmul.bf16.gmra.mxu2 %v8247_v52 }
 0x576   : > { %4265 = vmatmul.bf16.gmra.mxu3 %v7425_v49 }
 0x577   : > { %v7481_v5 = vpack.c.bf16 %v3483_v36, %v3479_v47 }
 0x578   : > { %v3279_v26 = vpop.f32.mrf.mxu2 }
 0x579   : > { %8248 = vst [vmem:[#allocation37_spill] sm:$0xff] %v7481_v5  ;;  %v3280_v27 = vadd.f32 %v3279_v26, %v3191_v25  ;;  %v3368_v23 = vpop.f32.mrf.mxu3  ;;  %v3103_v55 = vpop.f32.mrf.mxu0 }
 0x57a   : > { %v3104_v48 = vadd.f32 %v3103_v55, %v7375_v51  ;;  %v3192_v0 = vpop.f32.mrf.mxu1 }
 0x57b   : > { %v3369_v62 = vadd.f32 %v3368_v23, %v3280_v27 }
 0x57c   : > { %v3193_v18 = vadd.f32 %v3192_v0, %v3104_v48 }
 0x57d   : > { %v3487_v29 = vmax.f32 %v3369_v62, 0.0 }
 0x580   : > { %v3281_v38 = vpop.f32.mrf.mxu2 }
 0x581   : > { %v3282_v59 = vadd.f32 %v3281_v38, %v3193_v18  ;;  %v3370_v60 = vpop.f32.mrf.mxu3  ;;  %v3106_v15 = vpop.f32.mrf.mxu0 }
 0x582   : > { %v3107_v28 = vadd.f32 %v3106_v15, %v7375_v51  ;;  %v3195_v61 = vpop.f32.mrf.mxu1 }
 0x583   : > { %v3371_v8 = vadd.f32 %v3370_v60, %v3282_v59 }
 0x584   : > { %v3196_v40 = vadd.f32 %v3195_v61, %v3107_v28  ;;  %4003 = vmatmul.bf16.gmra.mxu0 %v8249_v20  ;;  %v8252_v28 = vld [vmem:[#allocation62_spill] sm:$0xff] }
 0x585   : > { %v3491_v7 = vmax.f32 %v3371_v8, 0.0  ;;  %4092 = vmatmul.bf16.gmra.mxu1 %v8250_v53  ;;  %4181 = vmatmul.bf16.gmra.mxu2 %v7299_v16  ;;  %v6132_v16 = vld [vmem:[#allocation6 + $0x194] sm:$0xf]  ;;  %v5866_v53 = vld [vmem:[#allocation6 + $0x198] sm:$0xf0] }
 0x586   : > { %4270 = vmatmul.bf16.gmra.mxu3 %v7433_v34  ;;  %v5802_v34 = vld [vmem:[#allocation6 + $0x118] sm:$0xf0] }
 0x587   : > { %v7489_v35 = vpack.c.bf16 %v3491_v7, %v3487_v29 }
 0x588   : > { %v3284_v42 = vpop.f32.mrf.mxu2 }
 0x589   : > { %8251 = vst [vmem:[#allocation38_spill] sm:$0xff] %v7489_v35  ;;  %v3285_v25 = vadd.f32 %v3284_v42, %v3196_v40  ;;  %v3373_v47 = vpop.f32.mrf.mxu3  ;;  %v3108_v36 = vpop.f32.mrf.mxu0  ;;  %v8253_v40 = vld [vmem:[#allocation70_spill] sm:$0xff] }
 0x58a   : > { %v3109_v26 = vadd.f32 %v3108_v36, %v7375_v51  ;;  %v3197_v27 = vpop.f32.mrf.mxu1 }
 0x58b   : > { %v3374_v23 = vadd.f32 %v3373_v47, %v3285_v25 }
 0x58c   : > { %v3198_v55 = vadd.f32 %v3197_v27, %v3109_v26 }
 0x58d   : > { %v3495_v61 = vmax.f32 %v3374_v23, 0.0 }
 0x590   : > { %v3286_v48 = vpop.f32.mrf.mxu2 }
 0x591   : > { %v3287_v0 = vadd.f32 %v3286_v48, %v3198_v55  ;;  %v3375_v62 = vpop.f32.mrf.mxu3  ;;  %v3111_v18 = vpop.f32.mrf.mxu0 }
 0x592   : > { %v3112_v38 = vadd.f32 %v3111_v18, %v7375_v51  ;;  %v3200_v59 = vpop.f32.mrf.mxu1 }
 0x593   : > { %v3376_v60 = vadd.f32 %v3375_v62, %v3287_v0 }
 0x594   : > { %v3201_v15 = vadd.f32 %v3200_v59, %v3112_v38  ;;  %4008 = vmatmul.bf16.gmra.mxu0 %v8252_v28  ;;  %v5738_v28 = vld [vmem:[#allocation6 + $0x98] sm:$0xf0] }
 0x595   : > { %v3499_v8 = vmax.f32 %v3376_v60, 0.0  ;;  %4097 = vmatmul.bf16.gmra.mxu1 %v8253_v40  ;;  %4186 = vmatmul.bf16.gmra.mxu2 %v7307_v32  ;;  %v6140_v32 = vld [vmem:[#allocation6 + $0x1d4] sm:$0xf]  ;;  %v5898_v40 = vld [vmem:[#allocation6 + $0x1d8] sm:$0xf0] }
 0x596   : > { %4275 = vmatmul.bf16.gmra.mxu3 %v7441_v57  ;;  %v5834_v57 = vld [vmem:[#allocation6 + $0x158] sm:$0xf0] }
 0x597   : > { %v7497_v29 = vpack.c.bf16 %v3499_v8, %v3495_v61  ;;  %v8255_v61 = vld [vmem:[#allocation63_spill] sm:$0xff] }
 0x598   : > { %v3289_v7 = vpop.f32.mrf.mxu2 }
 0x599   : > { %8254 = vst [vmem:[#allocation39_spill] sm:$0xff] %v7497_v29  ;;  %v3290_v42 = vadd.f32 %v3289_v7, %v3201_v15  ;;  %v3378_v25 = vpop.f32.mrf.mxu3  ;;  %v3113_v47 = vpop.f32.mrf.mxu0  ;;  %v8256_v7 = vld [vmem:[#allocation71_spill] sm:$0xff] }
 0x59a   : > { %v3114_v36 = vadd.f32 %v3113_v47, %v7375_v51  ;;  %v3202_v26 = vpop.f32.mrf.mxu1 }
 0x59b   : > { %v3379_v27 = vadd.f32 %v3378_v25, %v3290_v42 }
 0x59c   : > { %v3203_v55 = vadd.f32 %v3202_v26, %v3114_v36 }
 0x59d   : > { %v3503_v8 = vmax.f32 %v3379_v27, 0.0  ;;  %v7511_v27 = vld [vmem:[%s7905_s6] sm:$0x3] }
 0x59e   : > { %8258 = vst [vmem:[#allocation41_spill] sm:$0xff] %v7511_v27 }
 0x5a0   : > { %v3291_v48 = vpop.f32.mrf.mxu2 }
 0x5a1   : > { %v3292_v23 = vadd.f32 %v3291_v48, %v3203_v55  ;;  %v3380_v0 = vpop.f32.mrf.mxu3  ;;  %v3116_v62 = vpop.f32.mrf.mxu0 }
 0x5a2   : > { %v3117_v18 = vadd.f32 %v3116_v62, %v7375_v51  ;;  %v3205_v38 = vpop.f32.mrf.mxu1  ;;  %v7514_v62 = vperm.slane %v7511_v27, 0 }
 0x5a3   : > { %v3381_v59 = vadd.f32 %v3380_v0, %v3292_v23 }
 0x5a4   : > { %v3206_v60 = vadd.f32 %v3205_v38, %v3117_v18  ;;  %4013 = vmatmul.bf16.gmra.mxu0 %v8255_v61 }
 0x5a5   : > { %v3507_v15 = vmax.f32 %v3381_v59, 0.0  ;;  %4102 = vmatmul.bf16.gmra.mxu1 %v8256_v7  ;;  %4191 = vmatmul.bf16.gmra.mxu2 %v7315_v2  ;;  %v5786_v7 = vld [vmem:[#allocation6 + $0xf8] sm:$0xf0] }
 0x5a6   : > { %4280 = vmatmul.bf16.gmra.mxu3 %v7449_v14  ;;  %v8260_v14 = vld [vmem:[#allocation72_spill] sm:$0xff] }
 0x5a7   : > { %v7505_v42 = vpack.c.bf16 %v3507_v15, %v3503_v8 }
 0x5a8   : > { %v3294_v25 = vpop.f32.mrf.mxu2 }
 0x5a9   : > { %8257 = vst [vmem:[#allocation40_spill] sm:$0xff] %v7505_v42  ;;  %v3295_v47 = vadd.f32 %v3294_v25, %v3206_v60  ;;  %v3383_v36 = vpop.f32.mrf.mxu3  ;;  %v3118_v26 = vpop.f32.mrf.mxu0 }
 0x5aa   : > { %v3119_v55 = vadd.f32 %v3118_v26, %v7375_v51  ;;  %v3207_v48 = vpop.f32.mrf.mxu1  ;;  %v8259_v26 = vld [vmem:[#allocation64_spill] sm:$0xff] }
 0x5ab   : > { %v3384_v23 = vadd.f32 %v3383_v36, %v3295_v47 }
 0x5ac   : > { %v3208_v0 = vadd.f32 %v3207_v48, %v3119_v55 }
 0x5ad   : > { %v3511_v47 = vmax.f32 %v3384_v23, 0.0 }
 0x5b0   : > { %v3296_v18 = vpop.f32.mrf.mxu2 }
 0x5b1   : > { %v3297_v38 = vadd.f32 %v3296_v18, %v3208_v0  ;;  %v3385_v59 = vpop.f32.mrf.mxu3  ;;  %v3979_v8 = vpop.f32.mrf.mxu0 }
 0x5b2   : > { %v3980_v60 = vadd.f32 %v3979_v8, %v7514_v62  ;;  %v4068_v15 = vpop.f32.mrf.mxu1 }
 0x5b3   : > { %v3386_v25 = vadd.f32 %v3385_v59, %v3297_v38 }
 0x5b4   : > { %v4069_v51 = vadd.f32 %v4068_v15, %v3980_v60  ;;  %4018 = vmatmul.bf16.gmra.mxu0 %v8259_v26 }
 0x5b5   : > { %v3515_v36 = vmax.f32 %v3386_v25, 0.0  ;;  %4107 = vmatmul.bf16.gmra.mxu1 %v8260_v14  ;;  %4196 = vmatmul.bf16.gmra.mxu2 %v7323_v31 }
 0x5b6   : > { %4285 = vmatmul.bf16.gmra.mxu3 %v7457_v37 }
 0x5b7   : > { %v7521_v55 = vpack.c.bf16 %v3515_v36, %v3511_v47  ;;  %v8263_v36 = vld [vmem:[#allocation65_spill] sm:$0xff] }
 0x5b8   : > { %v4157_v48 = vpop.f32.mrf.mxu2 }
 0x5b9   : > { %8261 = vst [vmem:[#allocation42_spill] sm:$0xff] %v7521_v55  ;;  %v4158_v0 = vadd.f32 %v4157_v48, %v4069_v51  ;;  %v4246_v18 = vpop.f32.mrf.mxu3  ;;  %v3981_v27 = vpop.f32.mrf.mxu0  ;;  %v8264_v51 = vld [vmem:[#allocation73_spill] sm:$0xff] }
 0x5ba   : > { %v3982_v8 = vadd.f32 %v3981_v27, %v7514_v62  ;;  %v4070_v38 = vpop.f32.mrf.mxu1 }
 0x5bb   : > { %v7524_v59 = vadd.f32 %v4246_v18, %v4158_v0 }
 0x5bc   : > { %v4071_v60 = vadd.f32 %v4070_v38, %v3982_v8 }
 0x5bd   : > { %8262 = vst [vmem:[#allocation43_spill] sm:$0xff] %v7524_v59 }
 0x5c0   : > { %v4159_v23 = vpop.f32.mrf.mxu2 }
 0x5c1   : > { %v4160_v15 = vadd.f32 %v4159_v23, %v4071_v60  ;;  %v4248_v25 = vpop.f32.mrf.mxu3  ;;  %v3984_v14 = vpop.f32.mrf.mxu0 }
 0x5c2   : > { %v3985_v31 = vadd.f32 %v3984_v14, %v7514_v62  ;;  %v4073_v26 = vpop.f32.mrf.mxu1 }
 0x5c3   : > { %v7527_v37 = vadd.f32 %v4248_v25, %v4160_v15 }
 0x5c4   : > { %v4074_v47 = vadd.f32 %v4073_v26, %v3985_v31  ;;  %4023 = vmatmul.bf16.gmra.mxu0 %v8263_v36  ;;  %v8265_v36 = vld [vmem:[#allocation12_spill] sm:$0xff] }
 0x5c5   : > { %4112 = vmatmul.bf16.gmra.mxu1 %v8264_v51  ;;  %4201 = vmatmul.bf16.gmra.mxu2 %v7331_v54 }
 0x5c6   : > { %4290 = vmatmul.bf16.gmra.mxu3 %v7465_v43 }
 0x5c8   : > { %v4162_v27 = vpop.f32.mrf.mxu2 }
 0x5c9   : > { %v4163_v48 = vadd.f32 %v4162_v27, %v4074_v47  ;;  %v4251_v0 = vpop.f32.mrf.mxu3  ;;  %v3986_v18 = vpop.f32.mrf.mxu0  ;;  %v8266_v47 = vld [vmem:[#allocation74_spill] sm:$0xff] }
 0x5ca   : > { %v3987_v8 = vadd.f32 %v3986_v18, %v7514_v62  ;;  %v4075_v38 = vpop.f32.mrf.mxu1  ;;  %v6128_v27 = vld [vmem:[#allocation6 + $0x174] sm:$0xf] }
 0x5cb   : > { %v7534_v14 = vadd.f32 %v4251_v0, %v4163_v48  ;;  %v5850_v48 = vld [vmem:[#allocation6 + $0x178] sm:$0xf0] }
 0x5cc   : > { %v4076_v60 = vadd.f32 %v4075_v38, %v3987_v8  ;;  %v5853_v0 = vor.u32 %v6128_v27, %v5850_v48 }
 0x5ce   : > { %4504 = vmatpush.bf16.msra.mxu2 %v5853_v0 }
 0x5d0   : > { %v4164_v23 = vpop.f32.mrf.mxu2 }
 0x5d1   : > { %v4165_v31 = vadd.f32 %v4164_v23, %v4076_v60  ;;  %v4253_v26 = vpop.f32.mrf.mxu3  ;;  %v3989_v15 = vpop.f32.mrf.mxu0 }
 0x5d2   : > { %v3990_v25 = vadd.f32 %v3989_v15, %v7514_v62  ;;  %v4078_v51 = vpop.f32.mrf.mxu1  ;;  %v6096_v15 = vld [vmem:[#allocation6 + $0x74] sm:$0xf] }
 0x5d3   : > { %v7537_v54 = vadd.f32 %v4253_v26, %v4165_v31 }
 0x5d4   : > { %v4079_v43 = vadd.f32 %v4078_v51, %v3990_v25  ;;  %4028 = vmatmul.bf16.gmra.mxu0 %v8265_v36  ;;  %v5722_v25 = vld [vmem:[#allocation6 + $0x78] sm:$0xf0] }
 0x5d5   : > { %4117 = vmatmul.bf16.gmra.mxu1 %v8266_v47  ;;  %4206 = vmatmul.bf16.gmra.mxu2 %v7339_v50  ;;  %v5725_v47 = vor.u32 %v6096_v15, %v5722_v25  ;;  %v6144_v50 = vld [vmem:[#allocation6 + $0x1f4] sm:$0xf]  ;;  %v5914_v36 = vld [vmem:[#allocation6 + $0x1f8] sm:$0xf0] }
 0x5d6   : > { %4295 = vmatmul.bf16.gmra.mxu3 %v7473_v13  ;;  %v6112_v13 = vld [vmem:[#allocation6 + $0xf4] sm:$0xf]  ;;  %v5917_v2 = vor.u32 %v6144_v50, %v5914_v36 }
 0x5d7   : > { %4326 = vmatpush.bf16.msra.mxu0 %v5725_v47  ;;  %v8268_v15 = vld [vmem:[#allocation18_spill] sm:$0xff] }
 0x5d8   : > { %v4167_v18 = vpop.f32.mrf.mxu2  ;;  %4593 = vmatpush.bf16.msra.mxu3 %v5917_v2 }
 0x5d9   : > { %v4168_v8 = vadd.f32 %v4167_v18, %v4079_v43  ;;  %v4256_v38 = vpop.f32.mrf.mxu3  ;;  %v3991_v60 = vpop.f32.mrf.mxu0  ;;  %v5789_v43 = vor.u32 %v6112_v13, %v5786_v7 }
 0x5da   : > { %v3992_v23 = vadd.f32 %v3991_v60, %v7514_v62  ;;  %v4080_v31 = vpop.f32.mrf.mxu1 }
 0x5db   : > { %v7544_v51 = vadd.f32 %v4256_v38, %v4168_v8  ;;  %4415 = vmatpush.bf16.msra.mxu1 %v5789_v43 }
 0x5dc   : > { %v4081_v26 = vadd.f32 %v4080_v31, %v3992_v23  ;;  %v8267_v31 = vld [vmem:[#allocation13_spill] sm:$0xff] }
 0x5e0   : > { %v4169_v27 = vpop.f32.mrf.mxu2 }
 0x5e1   : > { %v4170_v48 = vadd.f32 %v4169_v27, %v4081_v26  ;;  %v4258_v18 = vpop.f32.mrf.mxu3  ;;  %v3994_v0 = vpop.f32.mrf.mxu0 }
 0x5e2   : > { %v3995_v60 = vadd.f32 %v3994_v0, %v7514_v62  ;;  %v4083_v8 = vpop.f32.mrf.mxu1 }
 0x5e3   : > { %v7547_v38 = vadd.f32 %v4258_v18, %v4170_v48 }
 0x5e4   : > { %v4084_v23 = vadd.f32 %v4083_v8, %v3995_v60  ;;  %4033 = vmatmul.bf16.gmra.mxu0 %v8267_v31 }
 0x5e5   : > { %4122 = vmatmul.bf16.gmra.mxu1 %v8268_v15  ;;  %4211 = vmatmul.bf16.gmra.mxu2 %v7347_v46  ;;  %v8269_v46 = vld [vmem:[#allocation14_spill] sm:$0xff] }
 0x5e6   : > { %4300 = vmatmul.bf16.gmra.mxu3 %v7481_v5 }
 0x5e8   : > { %v4172_v50 = vpop.f32.mrf.mxu2 }
 0x5e9   : > { %v4173_v13 = vadd.f32 %v4172_v50, %v4084_v23  ;;  %v4261_v7 = vpop.f32.mrf.mxu3  ;;  %v3996_v36 = vpop.f32.mrf.mxu0  ;;  %v8270_v23 = vld [vmem:[#allocation19_spill] sm:$0xff]  ;;  %v6126_v50 = vld [vmem:[#allocation6 + $0x164] sm:$0xf] }
 0x5ea   : > { %v3997_v2 = vadd.f32 %v3996_v36, %v7514_v62  ;;  %v4085_v47 = vpop.f32.mrf.mxu1 }
 0x5eb   : > { %v7554_v26 = vadd.f32 %v4261_v7, %v4173_v13  ;;  %v5842_v13 = vld [vmem:[#allocation6 + $0x168] sm:$0xf0] }
 0x5ec   : > { %v4086_v25 = vadd.f32 %v4085_v47, %v3997_v2  ;;  %v5845_v7 = vor.u32 %v6126_v50, %v5842_v13  ;;  %v6094_v2 = vld [vmem:[#allocation6 + $0x64] sm:$0xf]  ;;  %v5714_v47 = vld [vmem:[#allocation6 + $0x68] sm:$0xf0]  ;;  %v6092_v13 = vld [vmem:[#allocation6 + $0x54] sm:$0xf] }
 0x5ee   : > { %4505 = vmatpush.bf16.msra.mxu2 %v5845_v7  ;;  %v5770_v7 = vld [vmem:[#allocation6 + $0xd8] sm:$0xf0] }
 0x5f0   : > { %v4174_v27 = vpop.f32.mrf.mxu2 }
 0x5f1   : > { %v4175_v43 = vadd.f32 %v4174_v27, %v4086_v25  ;;  %v4263_v48 = vpop.f32.mrf.mxu3  ;;  %v3999_v18 = vpop.f32.mrf.mxu0  ;;  %v6142_v25 = vld [vmem:[#allocation6 + $0x1e4] sm:$0xf] }
 0x5f2   : > { %v4000_v0 = vadd.f32 %v3999_v18, %v7514_v62  ;;  %v4088_v60 = vpop.f32.mrf.mxu1 }
 0x5f3   : > { %v7557_v8 = vadd.f32 %v4263_v48, %v4175_v43  ;;  %v5717_v48 = vor.u32 %v6094_v2, %v5714_v47  ;;  %v6124_v2 = vld [vmem:[#allocation6 + $0x154] sm:$0xf] }
 0x5f4   : > { %v4089_v5 = vadd.f32 %v4088_v60, %v4000_v0  ;;  %4038 = vmatmul.bf16.gmra.mxu0 %v8269_v46  ;;  %v5906_v0 = vld [vmem:[#allocation6 + $0x1e8] sm:$0xf0]  ;;  %v6110_v60 = vld [vmem:[#allocation6 + $0xe4] sm:$0xf] }
 0x5f5   : > { %4127 = vmatmul.bf16.gmra.mxu1 %v8270_v23  ;;  %4216 = vmatmul.bf16.gmra.mxu2 %v7355_v45  ;;  %v5778_v46 = vld [vmem:[#allocation6 + $0xe8] sm:$0xf0]  ;;  %v5909_v15 = vor.u32 %v6142_v25, %v5906_v0  ;;  %v5901_v25 = vor.u32 %v6140_v32, %v5898_v40  ;;  %v6138_v32 = vld [vmem:[#allocation6 + $0x1c4] sm:$0xf] }
 0x5f6   : > { %4305 = vmatmul.bf16.gmra.mxu3 %v7489_v35  ;;  %v5781_v35 = vor.u32 %v6110_v60, %v5778_v46  ;;  %4327 = vmatpush.bf16.msra.mxu0 %v5717_v48  ;;  %v5762_v0 = vld [vmem:[#allocation6 + $0xc8] sm:$0xf0]  ;;  %v6122_v60 = vld [vmem:[#allocation6 + $0x144] sm:$0xf] }
 0x5f7   : > { %4594 = vmatpush.bf16.msra.mxu3 %v5909_v15  ;;  %v5890_v40 = vld [vmem:[#allocation6 + $0x1c8] sm:$0xf0] }
 0x5f8   : > { %v4177_v36 = vpop.f32.mrf.mxu2  ;;  %4416 = vmatpush.bf16.msra.mxu1 %v5781_v35 }
 0x5f9   : > { %v4178_v27 = vadd.f32 %v4177_v36, %v4089_v5  ;;  %v4266_v18 = vpop.f32.mrf.mxu3  ;;  %v4001_v43 = vpop.f32.mrf.mxu0  ;;  %v5706_v5 = vld [vmem:[#allocation6 + $0x58] sm:$0xf0]  ;;  %v6108_v36 = vld [vmem:[#allocation6 + $0xd4] sm:$0xf] }
 0x5fa   : > { %v4002_v23 = vadd.f32 %v4001_v43, %v7514_v62  ;;  %v4090_v45 = vpop.f32.mrf.mxu1  ;;  %v5709_v61 = vor.u32 %v6092_v13, %v5706_v5  ;;  %v5773_v47 = vor.u32 %v6108_v36, %v5770_v7  ;;  %v5837_v43 = vor.u32 %v6124_v2, %v5834_v57  ;;  %v5826_v13 = vld [vmem:[#allocation6 + $0x148] sm:$0xf0]  ;;  %v6088_v2 = vld [vmem:[#allocation6 + $0x34] sm:$0xf] }
 0x5fb   : > { %v7564_v31 = vadd.f32 %v4266_v18, %v4178_v27  ;;  %v6090_v27 = vld [vmem:[#allocation6 + $0x44] sm:$0xf]  ;;  %v5698_v18 = vld [vmem:[#allocation6 + $0x48] sm:$0xf0]  ;;  %4595 = vmatpush.bf16.msra.mxu3 %v5901_v25  ;;  %v5829_v57 = vor.u32 %v6122_v60, %v5826_v13  ;;  %v5893_v7 = vor.u32 %v6138_v32, %v5890_v40 }
 0x5fc   : > { %v4091_v50 = vadd.f32 %v4090_v45, %v4002_v23  ;;  %4328 = vmatpush.bf16.msra.mxu0 %v5709_v61  ;;  %4417 = vmatpush.bf16.msra.mxu1 %v5773_v47  ;;  %v6106_v45 = vld [vmem:[#allocation6 + $0xc4] sm:$0xf]  ;;  %v5701_v48 = vor.u32 %v6090_v27, %v5698_v18  ;;  %v5690_v47 = vld [vmem:[#allocation6 + $0x38] sm:$0xf0]  ;;  %v6120_v18 = vld [vmem:[#allocation6 + $0x134] sm:$0xf] }
 0x5fd   : > { %4506 = vmatpush.bf16.msra.mxu2 %v5837_v43  ;;  %v5765_v61 = vor.u32 %v6106_v45, %v5762_v0  ;;  %v6104_v43 = vld [vmem:[#allocation6 + $0xb4] sm:$0xf]  ;;  %v8272_v25 = vld [vmem:[#allocation20_spill] sm:$0xff]  ;;  %v5754_v27 = vld [vmem:[#allocation6 + $0xb8] sm:$0xf0] }
 0x5fe   : > { %v5757_v45 = vor.u32 %v6104_v43, %v5754_v27  ;;  %v5682_v32 = vld [vmem:[#allocation6 + $0x28] sm:$0xf0]  ;;  %v6102_v40 = vld [vmem:[#allocation6 + $0xa4] sm:$0xf] }
 0x5ff   : > { %4596 = vmatpush.bf16.msra.mxu3 %v5893_v7  ;;  %v6118_v43 = vld [vmem:[#allocation6 + $0x124] sm:$0xf]  ;;  %v5810_v27 = vld [vmem:[#allocation6 + $0x128] sm:$0xf0] }
 0x600   : > { %v4179_v46 = vpop.f32.mrf.mxu2  ;;  %4329 = vmatpush.bf16.msra.mxu0 %v5701_v48  ;;  %4418 = vmatpush.bf16.msra.mxu1 %v5765_v61  ;;  %v5882_v48 = vld [vmem:[#allocation6 + $0x1b8] sm:$0xf0]  ;;  %v6086_v61 = vld [vmem:[#allocation6 + $0x24] sm:$0xf] }
 0x601   : > { %v4180_v15 = vadd.f32 %v4179_v46, %v4091_v50  ;;  %v4268_v35 = vpop.f32.mrf.mxu3  ;;  %v7566_v23 = vpop.f32.mrf.mxu0  ;;  %v8271_v50 = vld [vmem:[#allocation15_spill] sm:$0xff]  ;;  %v5693_v46 = vor.u32 %v6088_v2, %v5690_v47  ;;  %4507 = vmatpush.bf16.msra.mxu2 %v5829_v57  ;;  %v5746_v57 = vld [vmem:[#allocation6 + $0xa8] sm:$0xf0] }
 0x602   : > { %v7568_v5 = vpop.f32.mrf.mxu1  ;;  %v5749_v7 = vor.u32 %v6102_v40, %v5746_v57  ;;  %v5869_v40 = vor.u32 %v6132_v16, %v5866_v53  ;;  %v8273_v53 = vld [vmem:[#allocation16_spill] sm:$0xff] }
 0x603   : > { %v7570_v36 = vadd.f32 %v4268_v35, %v4180_v15  ;;  %v5818_v15 = vld [vmem:[#allocation6 + $0x138] sm:$0xf0]  ;;  %v6136_v35 = vld [vmem:[#allocation6 + $0x1b4] sm:$0xf] }
 0x604   : > { %4043 = vmatmul.bf16.gmra.mxu0 %v8271_v50  ;;  %v5821_v0 = vor.u32 %v6120_v18, %v5818_v15  ;;  %v5885_v60 = vor.u32 %v6136_v35, %v5882_v48  ;;  %4419 = vmatpush.bf16.msra.mxu1 %v5757_v45  ;;  %v6134_v18 = vld [vmem:[#allocation6 + $0x1a4] sm:$0xf]  ;;  %v5874_v15 = vld [vmem:[#allocation6 + $0x1a8] sm:$0xf0]  ;;  %v6084_v35 = vld [vmem:[#allocation6 + $0x14] sm:$0xf] }
 0x605   : > { %4132 = vmatmul.bf16.gmra.mxu1 %v8272_v25  ;;  %4221 = vmatmul.bf16.gmra.mxu2 %v7363_v22  ;;  %v5877_v45 = vor.u32 %v6134_v18, %v5874_v15  ;;  %v5674_v48 = vld [vmem:[#allocation6 + $0x18] sm:$0xf0]  ;;  %v6100_v25 = vld [vmem:[#allocation6 + $0x94] sm:$0xf]  ;;  %v5730_v15 = vld [vmem:[#allocation6 + $0x88] sm:$0xf0] }
 0x606   : > { %4310 = vmatmul.bf16.gmra.mxu3 %v7497_v29  ;;  %4330 = vmatpush.bf16.msra.mxu0 %v5693_v46  ;;  %v5685_v29 = vor.u32 %v6086_v61, %v5682_v32  ;;  %v5813_v46 = vor.u32 %v6118_v43, %v5810_v27  ;;  %v5677_v50 = vor.u32 %v6084_v35, %v5674_v48  ;;  %v6116_v61 = vld [vmem:[#allocation6 + $0x114] sm:$0xf]  ;;  %v6098_v43 = vld [vmem:[#allocation6 + $0x84] sm:$0xf]  ;;  %v8274_v48 = vld [vmem:[#allocation21_spill] sm:$0xff] }
 0x607   : > { %4508 = vmatpush.bf16.msra.mxu2 %v5821_v0  ;;  %4597 = vmatpush.bf16.msra.mxu3 %v5885_v60  ;;  %v5741_v32 = vor.u32 %v6100_v25, %v5738_v28  ;;  %v5805_v0 = vor.u32 %v6116_v61, %v5802_v34  ;;  %v5666_v60 = vld [vmem:[#allocation6 + $0x8] sm:$0xf0]  ;;  %v5733_v35 = vor.u32 %v6098_v43, %v5730_v15 }
 0x608   : > { %v7576_v13 = vpop.f32.mrf.mxu2  ;;  %4420 = vmatpush.bf16.msra.mxu1 %v5749_v7  ;;  %v5794_v28 = vld [vmem:[#allocation6 + $0x108] sm:$0xf0] }
 0x609   : > { %v7578_v2 = vpop.f32.mrf.mxu3  ;;  %v7580_v47 = vpop.f32.mrf.mxu0  ;;  %v5858_v34 = vld [vmem:[#allocation6 + $0x188] sm:$0xf0] }
 0x60a   : > { %v7582_v22 = vpop.f32.mrf.mxu1  ;;  %4331 = vmatpush.bf16.msra.mxu0 %v5685_v29  ;;  %v6082_v29 = vld [vmem:[#allocation6 + $0x4] sm:$0xf]  ;;  %v8275_v15 = vld [vmem:[#allocation17_spill] sm:$0xff] }
 0x60b   : > { %4509 = vmatpush.bf16.msra.mxu2 %v5813_v46  ;;  %4598 = vmatpush.bf16.msra.mxu3 %v5877_v45  ;;  %v5669_v18 = vor.u32 %v6082_v29, %v5666_v60  ;;  %v6114_v46 = vld [vmem:[#allocation6 + $0x104] sm:$0xf] }
 0x60c   : > { %4421 = vmatpush.bf16.msra.mxu1 %v5741_v32  ;;  %v5797_v45 = vor.u32 %v6114_v46, %v5794_v28  ;;  %v8276_v46 = vld [vmem:[#allocation22_spill] sm:$0xff] }
 0x60e   : > { %4332 = vmatpush.bf16.msra.mxu0 %v5677_v50  ;;  %v6130_v50 = vld [vmem:[#allocation6 + $0x184] sm:$0xf] }
 0x60f   : > { %4510 = vmatpush.bf16.msra.mxu2 %v5805_v0  ;;  %4599 = vmatpush.bf16.msra.mxu3 %v5869_v40  ;;  %v5861_v16 = vor.u32 %v6130_v50, %v5858_v34 }
 0x610   : > { %v7584_v57 = vpop.f32.mrf.mxu2  ;;  %4422 = vmatpush.bf16.msra.mxu1 %v5733_v35 }
 0x611   : > { %v7586_v27 = vpop.f32.mrf.mxu3  ;;  %v4009_v7 = vpop.f32.mrf.mxu0 }
 0x612   : > { %v4098_v25 = vpop.f32.mrf.mxu1  ;;  %4333 = vmatpush.bf16.msra.mxu0 %v5669_v18  ;;  %v4010_v52 = vadd.f32 %v4009_v7, %v7514_v62 }
 0x613   : > { %4511 = vmatpush.bf16.msra.mxu2 %v5797_v45  ;;  %4600 = vmatpush.bf16.msra.mxu3 %v5861_v16 }
 0x614   : > { %4048 = vmatmul.bf16.gmra.mxu0 %v8273_v53 }
 0x615   : > { %4137 = vmatmul.bf16.gmra.mxu1 %v8274_v48  ;;  %4226 = vmatmul.bf16.gmra.mxu2 %v7371_v12 }
 0x616   : > { %4315 = vmatmul.bf16.gmra.mxu3 %v7505_v42 }
 0x618   : > { %v4187_v61 = vpop.f32.mrf.mxu2 }
 0x619   : > { %v4276_v32 = vpop.f32.mrf.mxu3  ;;  %v4011_v0 = vpop.f32.mrf.mxu0 }
 0x61a   : > { %v4100_v29 = vpop.f32.mrf.mxu1  ;;  %v4012_v42 = vadd.f32 %v4011_v0, %v7514_v62 }
 0x61c   : > { %v4101_v30 = vadd.f32 %v4100_v29, %v4012_v42 }
 0x620   : > { %v4189_v60 = vpop.f32.mrf.mxu2 }
 0x621   : > { %v4278_v43 = vpop.f32.mrf.mxu3  ;;  %v4014_v40 = vpop.f32.mrf.mxu0 }
 0x622   : > { %v4103_v18 = vpop.f32.mrf.mxu1  ;;  %v4015_v34 = vadd.f32 %v4014_v40, %v7514_v62  ;;  %v4190_v40 = vadd.f32 %v4189_v60, %v4101_v30 }
 0x624   : > { %4053 = vmatmul.bf16.gmra.mxu0 %v8275_v15  ;;  %v4104_v12 = vadd.f32 %v4103_v18, %v4015_v34 }
 0x625   : > { %4142 = vmatmul.bf16.gmra.mxu1 %v8276_v46  ;;  %4231 = vmatmul.bf16.gmra.mxu2 %v7382_v19 }
 0x626   : > { %4320 = vmatmul.bf16.gmra.mxu3 %v7521_v55 }
 0x628   : > { %v4192_v28 = vpop.f32.mrf.mxu2 }
 0x629   : > { %v4281_v35 = vpop.f32.mrf.mxu3  ;;  %v4016_v45 = vpop.f32.mrf.mxu0  ;;  %v4193_v15 = vadd.f32 %v4192_v28, %v4104_v12  ;;  %v4007_v12 = vadd.f32 %v7580_v47, %v7514_v62 }
 0x62a   : > { %v4105_v50 = vpop.f32.mrf.mxu1  ;;  %v4017_v16 = vadd.f32 %v4016_v45, %v7514_v62 }
 0x62b   : > { %v4282_v45 = vadd.f32 %v4281_v35, %v4193_v15 }
 0x62c   : > { %v4106_v48 = vadd.f32 %v4105_v50, %v4017_v16 }
 0x630   : > { %v4194_v53 = vpop.f32.mrf.mxu2 }
 0x631   : > { %v4195_v20 = vadd.f32 %v4194_v53, %v4106_v48  ;;  %v4283_v46 = vpop.f32.mrf.mxu3  ;;  %v4019_v49 = vpop.f32.mrf.mxu0 }
 0x632   : > { %v4020_v19 = vadd.f32 %v4019_v49, %v7514_v62  ;;  %v4108_v55 = vpop.f32.mrf.mxu1  ;;  %v4099_v49 = vadd.f32 %v4098_v25, %v4010_v52 }
 0x633   : > { %v4284_v63 = vadd.f32 %v4283_v46, %v4195_v20  ;;  %v4279_v20 = vadd.f32 %v4278_v43, %v4190_v40 }
 0x634   : > { %v4109_v59 = vadd.f32 %v4108_v55, %v4020_v19  ;;  %4334 = vmatmul.bf16.vlgmr.msra.gmra.mxu0 %v8229_v21  ;;  %v4188_v42 = vadd.f32 %v4187_v61, %v4099_v49  ;;  %v4710_v19 = vmax.f32 %v4282_v45, 0.0 }
 0x635   : > { %v4712_v0 = vmax.f32 %v4284_v63, 0.0  ;;  %4423 = vmatmul.bf16.vlgmr.msra.gmra.mxu1 %v8230_v33  ;;  %4512 = vmatmul.bf16.vlgmr.msra.gmra.mxu2 %v8231_v11  ;;  %v4005_v33 = vadd.f32 %v7566_v23, %v7514_v62  ;;  %v4708_v48 = vmax.f32 %v4279_v20, 0.0 }
 0x636   : > { %4601 = vmatmul.bf16.vlgmr.msra.gmra.mxu3 %v7390_v39  ;;  %v4096_v39 = vadd.f32 %v7582_v22, %v4007_v12  ;;  %v4277_v25 = vadd.f32 %v4276_v32, %v4188_v42 }
 0x637   : > { %4759 = vmatpush.xpose.msrb.mxu0 %v4712_v0 }
 0x638   : > { %v4197_v7 = vpop.f32.mrf.mxu2  ;;  %v4185_v47 = vadd.f32 %v7584_v57, %v4096_v39  ;;  %v4706_v43 = vmax.f32 %v4277_v25, 0.0 }
 0x639   : > { %v4198_v55 = vadd.f32 %v4197_v7, %v4109_v59  ;;  %v4286_v21 = vpop.f32.mrf.mxu3  ;;  %v4021_v30 = vpop.f32.mrf.mxu0  ;;  %v4094_v59 = vadd.f32 %v7568_v5, %v4005_v33 }
 0x63a   : > { %v4022_v63 = vadd.f32 %v4021_v30, %v7514_v62  ;;  %v4110_v53 = vpop.f32.mrf.mxu1  ;;  %v4274_v60 = vadd.f32 %v7586_v27, %v4185_v47 }
 0x63b   : > { %v7611_v11 = vadd.f32 %v4286_v21, %v4198_v55  ;;  %4760 = vmatpush.xpose.msrb.mxu0 %v4710_v19  ;;  %v4183_v29 = vadd.f32 %v7576_v13, %v4094_v59  ;;  %v4696_v19 = vmax.f32 %v7557_v8, 0.0  ;;  %v4688_v59 = vmax.f32 %v7537_v54, 0.0 }
 0x63c   : > { %v4111_v52 = vadd.f32 %v4110_v53, %v4022_v63  ;;  %v4704_v32 = vmax.f32 %v4274_v60, 0.0 }
 0x63d   : > { %v4272_v5 = vadd.f32 %v7578_v2, %v4183_v29  ;;  %v4700_v2 = vmax.f32 %v7570_v36, 0.0  ;;  %v4694_v36 = vmax.f32 %v7554_v26, 0.0 }
 0x63f   : > { %4761 = vmatpush.xpose.msrb.mxu0 %v4708_v48  ;;  %v4702_v27 = vmax.f32 %v4272_v5, 0.0 }
 0x640   : > { %v4199_v61 = vpop.f32.mrf.mxu2 }
 0x641   : > { %v4200_v23 = vadd.f32 %v4199_v61, %v4111_v52  ;;  %v4288_v18 = vpop.f32.mrf.mxu3  ;;  %v4024_v22 = vpop.f32.mrf.mxu0 }
 0x642   : > { %v4025_v15 = vadd.f32 %v4024_v22, %v7514_v62  ;;  %v4113_v46 = vpop.f32.mrf.mxu1 }
 0x643   : > { %v7618_v28 = vadd.f32 %v4288_v18, %v4200_v23  ;;  %4762 = vmatpush.xpose.msrb.mxu0 %v4706_v43 }
 0x644   : > { %v4114_v57 = vadd.f32 %v4113_v46, %v4025_v15  ;;  %4339 = vmatmul.bf16.gmra.mxu0 %v8233_v9 }
 0x645   : > { %4428 = vmatmul.bf16.gmra.mxu1 %v8234_v3  ;;  %4517 = vmatmul.bf16.gmra.mxu2 %v8235_v44  ;;  %v4698_v44 = vmax.f32 %v7564_v31, 0.0 }
 0x646   : > { %4606 = vmatmul.bf16.gmra.mxu3 %v7398_v41 }
 0x647   : > { %4763 = vmatpush.xpose.msrb.mxu0 %v4704_v32 }
 0x648   : > { %v4202_v13 = vpop.f32.mrf.mxu2 }
 0x649   : > { %v4203_v35 = vadd.f32 %v4202_v13, %v4114_v57  ;;  %v4291_v50 = vpop.f32.mrf.mxu3  ;;  %v4026_v34 = vpop.f32.mrf.mxu0  ;;  %v8278_v13 = vld [vmem:[#allocation60_spill] sm:$0xff] }
 0x64a   : > { %v4027_v16 = vadd.f32 %v4026_v34, %v7514_v62  ;;  %v4115_v40 = vpop.f32.mrf.mxu1 }
 0x64b   : > { %v7626_v45 = vadd.f32 %v4291_v50, %v4203_v35  ;;  %4764 = vmatpush.xpose.msrb.mxu0 %v4702_v27  ;;  %v8279_v27 = vld [vmem:[#allocation68_spill] sm:$0xff] }
 0x64c   : > { %v4116_v9 = vadd.f32 %v4115_v40, %v4027_v16  ;;  %v8280_v35 = vld [vmem:[#allocation76_spill] sm:$0xff] }
 0x64f   : > { %4765 = vmatpush.xpose.msrb.mxu0 %v4700_v2 }
 0x650   : > { %v4204_v3 = vpop.f32.mrf.mxu2 }
 0x651   : > { %v4205_v41 = vadd.f32 %v4204_v3, %v4116_v9  ;;  %v4293_v0 = vpop.f32.mrf.mxu3  ;;  %v4029_v12 = vpop.f32.mrf.mxu0 }
 0x652   : > { %v4030_v49 = vadd.f32 %v4029_v12, %v7514_v62  ;;  %v4118_v7 = vpop.f32.mrf.mxu1 }
 0x653   : > { %v7631_v42 = vadd.f32 %v4293_v0, %v4205_v41  ;;  %4766 = vmatpush.xpose.msrb.mxu0 %v4698_v44 }
 0x654   : > { %v4119_v20 = vadd.f32 %v4118_v7, %v4030_v49  ;;  %4344 = vmatmul.bf16.gmra.mxu0 %v8237_v6 }
 0x655   : > { %4433 = vmatmul.bf16.gmra.mxu1 %v8238_v56  ;;  %4522 = vmatmul.bf16.gmra.mxu2 %v8239_v24  ;;  %v4692_v56 = vmax.f32 %v7547_v38, 0.0  ;;  %v4686_v38 = vmax.f32 %v7534_v14, 0.0 }
 0x656   : > { %4611 = vmatmul.bf16.gmra.mxu3 %v7406_v1  ;;  %v4690_v1 = vmax.f32 %v7544_v51, 0.0 }
 0x657   : > { %4767 = vmatpush.xpose.msrb.mxu0 %v4696_v19  ;;  %v8282_v19 = vld [vmem:[#allocation61_spill] sm:$0xff] }
 0x658   : > { %v4207_v31 = vpop.f32.mrf.mxu2 }
 0x659   : > { %v4208_v55 = vadd.f32 %v4207_v31, %v4119_v20  ;;  %v4296_v21 = vpop.f32.mrf.mxu3  ;;  %v4031_v30 = vpop.f32.mrf.mxu0  ;;  %v8283_v31 = vld [vmem:[#allocation69_spill] sm:$0xff] }
 0x65a   : > { %v4032_v63 = vadd.f32 %v4031_v30, %v7514_v62  ;;  %v4120_v53 = vpop.f32.mrf.mxu1 }
 0x65b   : > { %v7640_v33 = vadd.f32 %v4296_v21, %v4208_v55  ;;  %4768 = vmatpush.xpose.msrb.mxu0 %v4694_v36  ;;  %v8284_v36 = vld [vmem:[#allocation77_spill] sm:$0xff]  ;;  %v8285_v55 = vld [vmem:[#allocation31_spill] sm:$0xff] }
 0x65c   : > { %v4121_v6 = vadd.f32 %v4120_v53, %v4032_v63 }
 0x65f   : > { %4769 = vmatpush.xpose.msrb.mxu0 %v4692_v56 }
 0x660   : > { %v4209_v24 = vpop.f32.mrf.mxu2 }
 0x661   : > { %v4210_v8 = vadd.f32 %v4209_v24, %v4121_v6  ;;  %v4298_v39 = vpop.f32.mrf.mxu3  ;;  %v4034_v52 = vpop.f32.mrf.mxu0 }
 0x662   : > { %v4035_v26 = vadd.f32 %v4034_v52, %v7514_v62  ;;  %v4123_v47 = vpop.f32.mrf.mxu1  ;;  %v8288_v52 = vld [vmem:[#allocation78_spill] sm:$0xff] }
 0x663   : > { %v7645_v25 = vadd.f32 %v4298_v39, %v4210_v8  ;;  %4770 = vmatpush.xpose.msrb.mxu0 %v4690_v1  ;;  %v8286_v8 = vld [vmem:[#allocation62_spill] sm:$0xff] }
 0x664   : > { %v4124_v48 = vadd.f32 %v4123_v47, %v4035_v26  ;;  %4349 = vmatmul.bf16.gmra.mxu0 %v8241_v17  ;;  %v4684_v17 = vmax.f32 %v7527_v37, 0.0  ;;  %v8281_v37 = vld [vmem:[#allocation27_spill] sm:$0xff]  ;;  %v8287_v39 = vld [vmem:[#allocation70_spill] sm:$0xff]  ;;  %v8289_v26 = vld [vmem:[#allocation32_spill] sm:$0xff] }
 0x665   : > { %4438 = vmatmul.bf16.gmra.mxu1 %v8242_v58  ;;  %4527 = vmatmul.bf16.gmra.mxu2 %v8243_v4  ;;  %v8277_v4 = vld [vmem:[#allocation43_spill] sm:$0xff] }
 0x666   : > { %4616 = vmatmul.bf16.gmra.mxu3 %v7414_v10  ;;  %v4682_v10 = vmax.f32 %v8277_v4, 0.0 }
 0x667   : > { %4771 = vmatpush.xpose.msrb.mxu0 %v4688_v59 }
 0x668   : > { %v4212_v51 = vpop.f32.mrf.mxu2 }
 0x669   : > { %v4213_v61 = vadd.f32 %v4212_v51, %v4124_v48  ;;  %v4301_v29 = vpop.f32.mrf.mxu3  ;;  %v4036_v60 = vpop.f32.mrf.mxu0 }
 0x66a   : > { %v4037_v43 = vadd.f32 %v4036_v60, %v7514_v62  ;;  %v4125_v23 = vpop.f32.mrf.mxu1 }
 0x66b   : > { %v7654_v18 = vadd.f32 %v4301_v29, %v4213_v61  ;;  %4772 = vmatpush.xpose.msrb.mxu0 %v4686_v38 }
 0x66c   : > { %v4126_v54 = vadd.f32 %v4125_v23, %v4037_v43  ;;  %v8290_v43 = vld [vmem:[#allocation63_spill] sm:$0xff] }
 0x66d   : > { %v8291_v23 = vld [vmem:[#allocation71_spill] sm:$0xff] }
 0x66f   : > { %4773 = vmatpush.xpose.msrb.mxu0 %v4684_v17  ;;  %v8293_v17 = vld [vmem:[#allocation33_spill] sm:$0xff] }
 0x670   : > { %v4214_v58 = vpop.f32.mrf.mxu2 }
 0x671   : > { %v4215_v22 = vadd.f32 %v4214_v58, %v4126_v54  ;;  %v4303_v15 = vpop.f32.mrf.mxu3  ;;  %v4039_v46 = vpop.f32.mrf.mxu0  ;;  %v8292_v54 = vld [vmem:[#allocation79_spill] sm:$0xff] }
 0x672   : > { %v4040_v14 = vadd.f32 %v4039_v46, %v7514_v62  ;;  %v4128_v57 = vpop.f32.mrf.mxu1 }
 0x673   : > { %v7659_v5 = vadd.f32 %v4303_v15, %v4215_v22  ;;  %4774 = vmatpush.xpose.msrb.mxu0 %v4682_v10 }
 0x674   : > { %v4129_v32 = vadd.f32 %v4128_v57, %v4040_v14  ;;  %4354 = vmatmul.bf16.gmra.mxu0 %v8278_v13  ;;  %v8294_v14 = vld [vmem:[#allocation41_spill] sm:$0xff] }
 0x675   : > { %4443 = vmatmul.bf16.gmra.mxu1 %v8279_v27  ;;  %4532 = vmatmul.bf16.gmra.mxu2 %v8280_v35  ;;  %v7697_v57 = vperm.slane %v8294_v14, 1 }
 0x676   : > { %4621 = vmatmul.bf16.gmra.mxu3 %v8281_v37 }
 0x678   : > { %v4217_v50 = vpop.f32.mrf.mxu2 }
 0x679   : > { %v4218_v34 = vadd.f32 %v4217_v50, %v4129_v32  ;;  %v4306_v16 = vpop.f32.mrf.mxu3  ;;  %v4041_v40 = vpop.f32.mrf.mxu0 }
 0x67a   : > { %v4042_v9 = vadd.f32 %v4041_v40, %v7514_v62  ;;  %v4130_v2 = vpop.f32.mrf.mxu1 }
 0x67b   : > { %v7666_v3 = vadd.f32 %v4306_v16, %v4218_v34 }
 0x67c   : > { %v4131_v44 = vadd.f32 %v4130_v2, %v4042_v9 }
 0x680   : > { %v4219_v41 = vpop.f32.mrf.mxu2 }
 0x681   : > { %v4220_v0 = vadd.f32 %v4219_v41, %v4131_v44  ;;  %v4308_v12 = vpop.f32.mrf.mxu3  ;;  %v7668_v49 = vpop.f32.mrf.mxu0 }
 0x682   : > { %v7670_v7 = vpop.f32.mrf.mxu1 }
 0x683   : > { %v7672_v20 = vadd.f32 %v4308_v12, %v4220_v0  ;;  %v8295_v12 = vld [vmem:[#allocation64_spill] sm:$0xff] }
 0x684   : > { %4359 = vmatmul.bf16.gmra.mxu0 %v8282_v19 }
 0x685   : > { %4448 = vmatmul.bf16.gmra.mxu1 %v8283_v31  ;;  %4537 = vmatmul.bf16.gmra.mxu2 %v8284_v36 }
 0x686   : > { %4626 = vmatmul.bf16.gmra.mxu3 %v8285_v55  ;;  %v8296_v55 = vld [vmem:[#allocation72_spill] sm:$0xff] }
 0x688   : > { %v7678_v21 = vpop.f32.mrf.mxu2 }
 0x689   : > { %v7680_v30 = vpop.f32.mrf.mxu3  ;;  %v4046_v63 = vpop.f32.mrf.mxu0 }
 0x68a   : > { %v4135_v53 = vpop.f32.mrf.mxu1 }
 0x690   : > { %v7682_v6 = vpop.f32.mrf.mxu2 }
 0x691   : > { %v7684_v56 = vpop.f32.mrf.mxu3  ;;  %v4049_v24 = vpop.f32.mrf.mxu0 }
 0x692   : > { %v4138_v1 = vpop.f32.mrf.mxu1  ;;  %v4050_v2 = vadd.f32 %v4049_v24, %v7514_v62 }
 0x694   : > { %4364 = vmatmul.bf16.gmra.mxu0 %v8286_v8  ;;  %v8297_v8 = vld [vmem:[#allocation80_spill] sm:$0xff] }
 0x695   : > { %4453 = vmatmul.bf16.gmra.mxu1 %v8287_v39  ;;  %4542 = vmatmul.bf16.gmra.mxu2 %v8288_v52  ;;  %v8298_v39 = vld [vmem:[#allocation34_spill] sm:$0xff]  ;;  %v4047_v52 = vadd.f32 %v4046_v63, %v7514_v62 }
 0x696   : > { %4631 = vmatmul.bf16.gmra.mxu3 %v8289_v26  ;;  %v4139_v26 = vadd.f32 %v4138_v1, %v4050_v2 }
 0x698   : > { %v4227_v47 = vpop.f32.mrf.mxu2 }
 0x699   : > { %v4316_v48 = vpop.f32.mrf.mxu3  ;;  %v4051_v59 = vpop.f32.mrf.mxu0  ;;  %v4228_v24 = vadd.f32 %v4227_v47, %v4139_v26 }
 0x69a   : > { %v4140_v51 = vpop.f32.mrf.mxu1  ;;  %v4052_v32 = vadd.f32 %v4051_v59, %v7514_v62 }
 0x69c   : > { %v4141_v44 = vadd.f32 %v4140_v51, %v4052_v32 }
 0x6a0   : > { %v4229_v38 = vpop.f32.mrf.mxu2 }
 0x6a1   : > { %v4318_v61 = vpop.f32.mrf.mxu3  ;;  %v4054_v29 = vpop.f32.mrf.mxu0  ;;  %v4230_v19 = vadd.f32 %v4229_v38, %v4141_v44 }
 0x6a2   : > { %v4143_v60 = vpop.f32.mrf.mxu1  ;;  %v4055_v15 = vadd.f32 %v4054_v29, %v7514_v62 }
 0x6a3   : > { %v4319_v51 = vadd.f32 %v4318_v61, %v4230_v19  ;;  %v4730_v19 = vmax.f32 %v7666_v3, 0.0 }
 0x6a4   : > { %4369 = vmatmul.bf16.gmra.mxu0 %v8290_v43  ;;  %v4144_v13 = vadd.f32 %v4143_v60, %v4055_v15 }
 0x6a5   : > { %4458 = vmatmul.bf16.gmra.mxu1 %v8291_v23  ;;  %4547 = vmatmul.bf16.gmra.mxu2 %v8292_v54  ;;  %v4740_v47 = vmax.f32 %v4319_v51, 0.0  ;;  %v8304_v51 = vld [vmem:[#allocation74_spill] sm:$0xff] }
 0x6a6   : > { %4636 = vmatmul.bf16.gmra.mxu3 %v8293_v17  ;;  %v4045_v17 = vadd.f32 %v7668_v49, %v7514_v62 }
 0x6a8   : > { %v4232_v58 = vpop.f32.mrf.mxu2  ;;  %v4134_v61 = vadd.f32 %v7670_v7, %v4045_v17 }
 0x6a9   : > { %v4321_v4 = vpop.f32.mrf.mxu3  ;;  %v4056_v10 = vpop.f32.mrf.mxu0  ;;  %v4233_v37 = vadd.f32 %v4232_v58, %v4144_v13  ;;  %v4136_v58 = vadd.f32 %v4135_v53, %v4047_v52 }
 0x6aa   : > { %v4145_v22 = vpop.f32.mrf.mxu1  ;;  %v4057_v46 = vadd.f32 %v4056_v10, %v7514_v62  ;;  %v4317_v10 = vadd.f32 %v4316_v48, %v4228_v24  ;;  %v4223_v15 = vadd.f32 %v7678_v21, %v4134_v61  ;;  %v8299_v48 = vld [vmem:[#allocation65_spill] sm:$0xff]  ;;  %v4728_v24 = vmax.f32 %v7659_v5, 0.0 }
 0x6ab   : > { %v4322_v31 = vadd.f32 %v4321_v4, %v4233_v37  ;;  %v4225_v1 = vadd.f32 %v7682_v6, %v4136_v58  ;;  %v8300_v37 = vld [vmem:[#allocation73_spill] sm:$0xff] }
 0x6ac   : > { %v4146_v27 = vadd.f32 %v4145_v22, %v4057_v46  ;;  %v4738_v14 = vmax.f32 %v4317_v10, 0.0  ;;  %v4312_v7 = vadd.f32 %v7680_v30, %v4223_v15  ;;  %v8301_v21 = vld [vmem:[#allocation81_spill] sm:$0xff]  ;;  %v4722_v10 = vmax.f32 %v7640_v33, 0.0 }
 0x6ad   : > { %v4742_v29 = vmax.f32 %v4322_v31, 0.0  ;;  %v4314_v46 = vadd.f32 %v7684_v56, %v4225_v1  ;;  %v8302_v56 = vld [vmem:[#allocation35_spill] sm:$0xff] }
 0x6b0   : > { %v4234_v35 = vpop.f32.mrf.mxu2 }
 0x6b1   : > { %v4235_v50 = vadd.f32 %v4234_v35, %v4146_v27  ;;  %v4323_v34 = vpop.f32.mrf.mxu3  ;;  %v4335_v16 = vpop.f32.mrf.mxu0  ;;  %v4736_v35 = vmax.f32 %v4314_v46, 0.0 }
 0x6b2   : > { %v4336_v40 = vadd.f32 %v4335_v16, %v7697_v57  ;;  %v4424_v9 = vpop.f32.mrf.mxu1 }
 0x6b3   : > { %v4324_v41 = vadd.f32 %v4323_v34, %v4235_v50  ;;  %v4734_v34 = vmax.f32 %v4312_v7, 0.0 }
 0x6b4   : > { %v4425_v0 = vadd.f32 %v4424_v9, %v4336_v40  ;;  %4374 = vmatmul.bf16.gmra.mxu0 %v8295_v12 }
 0x6b5   : > { %v4744_v36 = vmax.f32 %v4324_v41, 0.0  ;;  %4463 = vmatmul.bf16.gmra.mxu1 %v8296_v55  ;;  %4552 = vmatmul.bf16.gmra.mxu2 %v8297_v8 }
 0x6b6   : > { %4641 = vmatmul.bf16.gmra.mxu3 %v8298_v39 }
 0x6b7   : > { %4799 = vmatpush.xpose.msrb.mxu2 %v4744_v36 }
 0x6b8   : > { %v4513_v59 = vpop.f32.mrf.mxu2 }
 0x6b9   : > { %v4514_v60 = vadd.f32 %v4513_v59, %v4425_v0  ;;  %v4602_v43 = vpop.f32.mrf.mxu3  ;;  %v4337_v23 = vpop.f32.mrf.mxu0  ;;  %v4732_v0 = vmax.f32 %v7672_v20, 0.0  ;;  %v8303_v59 = vld [vmem:[#allocation12_spill] sm:$0xff]  ;;  %v8305_v20 = vld [vmem:[#allocation82_spill] sm:$0xff] }
 0x6ba   : > { %v4338_v38 = vadd.f32 %v4337_v23, %v7697_v57  ;;  %v4426_v54 = vpop.f32.mrf.mxu1 }
 0x6bb   : > { %v7710_v4 = vadd.f32 %v4602_v43, %v4514_v60  ;;  %4800 = vmatpush.xpose.msrb.mxu2 %v4742_v29  ;;  %v8306_v29 = vld [vmem:[#allocation36_spill] sm:$0xff]  ;;  %v4726_v60 = vmax.f32 %v7654_v18, 0.0 }
 0x6bc   : > { %v4427_v63 = vadd.f32 %v4426_v54, %v4338_v38 }
 0x6bf   : > { %4801 = vmatpush.xpose.msrb.mxu2 %v4740_v47 }
 0x6c0   : > { %v4515_v22 = vpop.f32.mrf.mxu2 }
 0x6c1   : > { %v4516_v32 = vadd.f32 %v4515_v22, %v4427_v63  ;;  %v4604_v62 = vpop.f32.mrf.mxu3  ;;  %v4340_v49 = vpop.f32.mrf.mxu0  ;;  %v4724_v63 = vmax.f32 %v7645_v25, 0.0  ;;  %v8309_v25 = vld [vmem:[#allocation83_spill] sm:$0xff] }
 0x6c2   : > { %v4341_v53 = vadd.f32 %v4340_v49, %v7697_v57  ;;  %v4429_v13 = vpop.f32.mrf.mxu1  ;;  %v8308_v49 = vld [vmem:[#allocation18_spill] sm:$0xff] }
 0x6c3   : > { %v7717_v27 = vadd.f32 %v4604_v62, %v4516_v32  ;;  %4802 = vmatpush.xpose.msrb.mxu2 %v4738_v14  ;;  %v8307_v32 = vld [vmem:[#allocation13_spill] sm:$0xff]  ;;  %v4720_v62 = vmax.f32 %v7631_v42, 0.0 }
 0x6c4   : > { %v4430_v6 = vadd.f32 %v4429_v13, %v4341_v53  ;;  %4379 = vmatmul.bf16.gmra.mxu0 %v8299_v48  ;;  %v8310_v53 = vld [vmem:[#allocation37_spill] sm:$0xff]  ;;  %v4718_v13 = vmax.f32 %v7626_v45, 0.0 }
 0x6c5   : > { %4468 = vmatmul.bf16.gmra.mxu1 %v8300_v37  ;;  %4557 = vmatmul.bf16.gmra.mxu2 %v8301_v21 }
 0x6c6   : > { %4646 = vmatmul.bf16.gmra.mxu3 %v8302_v56  ;;  %v4716_v56 = vmax.f32 %v7618_v28, 0.0  ;;  %v8314_v28 = vld [vmem:[#allocation38_spill] sm:$0xff] }
 0x6c7   : > { %4803 = vmatpush.xpose.msrb.mxu2 %v4736_v35 }
 0x6c8   : > { %v4518_v50 = vpop.f32.mrf.mxu2 }
 0x6c9   : > { %v4519_v16 = vadd.f32 %v4518_v50, %v4430_v6  ;;  %v4607_v40 = vpop.f32.mrf.mxu3  ;;  %v4342_v9 = vpop.f32.mrf.mxu0 }
 0x6ca   : > { %v4343_v2 = vadd.f32 %v4342_v9, %v7697_v57  ;;  %v4431_v44 = vpop.f32.mrf.mxu1 }
 0x6cb   : > { %v7725_v41 = vadd.f32 %v4607_v40, %v4519_v16  ;;  %4804 = vmatpush.xpose.msrb.mxu2 %v4734_v34  ;;  %v4714_v34 = vmax.f32 %v7611_v11, 0.0 }
 0x6cc   : > { %v4432_v30 = vadd.f32 %v4431_v44, %v4343_v2  ;;  %v8311_v44 = vld [vmem:[#allocation14_spill] sm:$0xff] }
 0x6cf   : > { %4805 = vmatpush.xpose.msrb.mxu2 %v4732_v0  ;;  %v8313_v0 = vld [vmem:[#allocation84_spill] sm:$0xff] }
 0x6d0   : > { %v4520_v12 = vpop.f32.mrf.mxu2 }
 0x6d1   : > { %v4521_v31 = vadd.f32 %v4520_v12, %v4432_v30  ;;  %v4609_v36 = vpop.f32.mrf.mxu3  ;;  %v4345_v55 = vpop.f32.mrf.mxu0  ;;  %v8312_v30 = vld [vmem:[#allocation19_spill] sm:$0xff] }
 0x6d2   : > { %v4346_v8 = vadd.f32 %v4345_v55, %v7697_v57  ;;  %v4434_v39 = vpop.f32.mrf.mxu1 }
 0x6d3   : > { %v7730_v52 = vadd.f32 %v4609_v36, %v4521_v31  ;;  %4806 = vmatpush.xpose.msrb.mxu2 %v4730_v19 }
 0x6d4   : > { %v4435_v26 = vadd.f32 %v4434_v39, %v4346_v8  ;;  %4384 = vmatmul.bf16.gmra.mxu0 %v8303_v59 }
 0x6d5   : > { %4473 = vmatmul.bf16.gmra.mxu1 %v8304_v51  ;;  %4562 = vmatmul.bf16.gmra.mxu2 %v8305_v20  ;;  %v8315_v20 = vld [vmem:[#allocation15_spill] sm:$0xff] }
 0x6d6   : > { %4651 = vmatmul.bf16.gmra.mxu3 %v8306_v29  ;;  %v8316_v29 = vld [vmem:[#allocation20_spill] sm:$0xff] }
 0x6d7   : > { %4807 = vmatpush.xpose.msrb.mxu2 %v4728_v24 }
 0x6d8   : > { %v4523_v3 = vpop.f32.mrf.mxu2 }
 0x6d9   : > { %v4524_v43 = vadd.f32 %v4523_v3, %v4435_v26  ;;  %v4612_v23 = vpop.f32.mrf.mxu3  ;;  %v4347_v38 = vpop.f32.mrf.mxu0  ;;  %v8317_v3 = vld [vmem:[#allocation24_spill] sm:$0xff] }
 0x6da   : > { %v4348_v54 = vadd.f32 %v4347_v38, %v7697_v57  ;;  %v4436_v17 = vpop.f32.mrf.mxu1 }
 0x6db   : > { %v7739_v58 = vadd.f32 %v4612_v23, %v4524_v43  ;;  %4808 = vmatpush.xpose.msrb.mxu2 %v4726_v60  ;;  %v8318_v60 = vld [vmem:[#allocation39_spill] sm:$0xff] }
 0x6dc   : > { %v4437_v5 = vadd.f32 %v4436_v17, %v4348_v54 }
 0x6df   : > { %4809 = vmatpush.xpose.msrb.mxu2 %v4724_v63 }
 0x6e0   : > { %v4525_v1 = vpop.f32.mrf.mxu2 }
 0x6e1   : > { %v4526_v47 = vadd.f32 %v4525_v1, %v4437_v5  ;;  %v4614_v61 = vpop.f32.mrf.mxu3  ;;  %v4350_v22 = vpop.f32.mrf.mxu0 }
 0x6e2   : > { %v4351_v18 = vadd.f32 %v4350_v22, %v7697_v57  ;;  %v4439_v15 = vpop.f32.mrf.mxu1  ;;  %v8322_v22 = vld [vmem:[#allocation40_spill] sm:$0xff] }
 0x6e3   : > { %v7744_v46 = vadd.f32 %v4614_v61, %v4526_v47  ;;  %4810 = vmatpush.xpose.msrb.mxu2 %v4722_v10  ;;  %v8319_v10 = vld [vmem:[#allocation16_spill] sm:$0xff]  ;;  %v8320_v47 = vld [vmem:[#allocation21_spill] sm:$0xff] }
 0x6e4   : > { %v4440_v14 = vadd.f32 %v4439_v15, %v4351_v18  ;;  %4389 = vmatmul.bf16.gmra.mxu0 %v8307_v32  ;;  %v8321_v61 = vld [vmem:[#allocation25_spill] sm:$0xff] }
 0x6e5   : > { %4478 = vmatmul.bf16.gmra.mxu1 %v8308_v49  ;;  %4567 = vmatmul.bf16.gmra.mxu2 %v8309_v25 }
 0x6e6   : > { %4656 = vmatmul.bf16.gmra.mxu3 %v8310_v53 }
 0x6e7   : > { %4811 = vmatpush.xpose.msrb.mxu2 %v4720_v62 }
 0x6e8   : > { %v4528_v33 = vpop.f32.mrf.mxu2 }
 0x6e9   : > { %v4529_v6 = vadd.f32 %v4528_v33, %v4440_v14  ;;  %v4617_v48 = vpop.f32.mrf.mxu3  ;;  %v4352_v7 = vpop.f32.mrf.mxu0  ;;  %v8323_v33 = vld [vmem:[#allocation17_spill] sm:$0xff] }
 0x6ea   : > { %v4353_v35 = vadd.f32 %v4352_v7, %v7697_v57  ;;  %v4441_v37 = vpop.f32.mrf.mxu1 }
 0x6eb   : > { %v7753_v21 = vadd.f32 %v4617_v48, %v4529_v6  ;;  %4812 = vmatpush.xpose.msrb.mxu2 %v4718_v13  ;;  %v8324_v13 = vld [vmem:[#allocation22_spill] sm:$0xff] }
 0x6ec   : > { %v4442_v42 = vadd.f32 %v4441_v37, %v4353_v35  ;;  %v8325_v6 = vld [vmem:[#allocation26_spill] sm:$0xff] }
 0x6ed   : > { %v8326_v48 = vld [vmem:[#allocation42_spill] sm:$0xff] }
 0x6ef   : > { %4813 = vmatpush.xpose.msrb.mxu2 %v4716_v56 }
 0x6f0   : > { %v4530_v50 = vpop.f32.mrf.mxu2 }
 0x6f1   : > { %v4531_v16 = vadd.f32 %v4530_v50, %v4442_v42  ;;  %v4619_v40 = vpop.f32.mrf.mxu3  ;;  %v7757_v9 = vpop.f32.mrf.mxu0 }
 0x6f2   : > { %v7759_v45 = vpop.f32.mrf.mxu1 }
 0x6f3   : > { %v7761_v2 = vadd.f32 %v4619_v40, %v4531_v16  ;;  %4814 = vmatpush.xpose.msrb.mxu2 %v4714_v34 }
 0x6f4   : > { %4394 = vmatmul.bf16.gmra.mxu0 %v8311_v44 }
 0x6f5   : > { %4483 = vmatmul.bf16.gmra.mxu1 %v8312_v30  ;;  %4572 = vmatmul.bf16.gmra.mxu2 %v8313_v0 }
 0x6f6   : > { %4661 = vmatmul.bf16.gmra.mxu3 %v8314_v28 }
 0x6f8   : > { %v7767_v12 = vpop.f32.mrf.mxu2 }
 0x6f9   : > { %v7769_v11 = vpop.f32.mrf.mxu3  ;;  %v4357_v19 = vpop.f32.mrf.mxu0 }
 0x6fa   : > { %v4358_v31 = vadd.f32 %v4357_v19, %v7697_v57  ;;  %v4446_v36 = vpop.f32.mrf.mxu1 }
 0x6fc   : > { %v4447_v55 = vadd.f32 %v4446_v36, %v4358_v31 }
 0x700   : > { %v4535_v8 = vpop.f32.mrf.mxu2 }
 0x701   : > { %v4536_v39 = vadd.f32 %v4535_v8, %v4447_v55  ;;  %v4624_v26 = vpop.f32.mrf.mxu3  ;;  %v7772_v59 = vpop.f32.mrf.mxu0 }
 0x702   : > { %v7774_v24 = vpop.f32.mrf.mxu1 }
 0x703   : > { %v7776_v51 = vadd.f32 %v4624_v26, %v4536_v39 }
 0x704   : > { %4399 = vmatmul.bf16.gmra.mxu0 %v8315_v20 }
 0x705   : > { %4488 = vmatmul.bf16.gmra.mxu1 %v8316_v29  ;;  %4577 = vmatmul.bf16.gmra.mxu2 %v8317_v3 }
 0x706   : > { %4666 = vmatmul.bf16.gmra.mxu3 %v8318_v60 }
 0x708   : > { %v7782_v43 = vpop.f32.mrf.mxu2 }
 0x709   : > { %v7784_v23 = vpop.f32.mrf.mxu3  ;;  %v4362_v38 = vpop.f32.mrf.mxu0 }
 0x70a   : > { %v4451_v54 = vpop.f32.mrf.mxu1  ;;  %v4363_v60 = vadd.f32 %v4362_v38, %v7697_v57 }
 0x710   : > { %v4540_v17 = vpop.f32.mrf.mxu2 }
 0x711   : > { %v7786_v5 = vpop.f32.mrf.mxu3  ;;  %v4365_v63 = vpop.f32.mrf.mxu0 }
 0x712   : > { %v4454_v1 = vpop.f32.mrf.mxu1  ;;  %v4366_v55 = vadd.f32 %v4365_v63, %v7697_v57 }
 0x714   : > { %4404 = vmatmul.bf16.gmra.mxu0 %v8319_v10  ;;  %v4455_v10 = vadd.f32 %v4454_v1, %v4366_v55 }
 0x715   : > { %4493 = vmatmul.bf16.gmra.mxu1 %v8320_v47  ;;  %4582 = vmatmul.bf16.gmra.mxu2 %v8321_v61 }
 0x716   : > { %4671 = vmatmul.bf16.gmra.mxu3 %v8322_v22 }
 0x718   : > { %v4543_v18 = vpop.f32.mrf.mxu2 }
 0x719   : > { %v4632_v15 = vpop.f32.mrf.mxu3  ;;  %v4367_v14 = vpop.f32.mrf.mxu0  ;;  %v4544_v61 = vadd.f32 %v4543_v18, %v4455_v10 }
 0x71a   : > { %v4456_v32 = vpop.f32.mrf.mxu1  ;;  %v4368_v34 = vadd.f32 %v4367_v14, %v7697_v57 }
 0x71c   : > { %v4457_v8 = vadd.f32 %v4456_v32, %v4368_v34  ;;  %v4361_v32 = vadd.f32 %v7772_v59, %v7697_v57 }
 0x71e   : > { %v4450_v18 = vadd.f32 %v7774_v24, %v4361_v32 }
 0x720   : > { %v4545_v62 = vpop.f32.mrf.mxu2 }
 0x721   : > { %v4634_v49 = vpop.f32.mrf.mxu3  ;;  %v4370_v25 = vpop.f32.mrf.mxu0  ;;  %v4546_v20 = vadd.f32 %v4545_v62, %v4457_v8  ;;  %v4452_v62 = vadd.f32 %v4451_v54, %v4363_v60  ;;  %v4701_v8 = vmax.f32 %v7776_v51, 0.0 }
 0x722   : > { %v4459_v53 = vpop.f32.mrf.mxu1  ;;  %v4371_v56 = vadd.f32 %v4370_v25, %v7697_v57 }
 0x723   : > { %v4635_v22 = vadd.f32 %v4634_v49, %v4546_v20  ;;  %v4541_v1 = vadd.f32 %v4540_v17, %v4452_v62  ;;  %v4356_v17 = vadd.f32 %v7757_v9, %v7697_v57 }
 0x724   : > { %4409 = vmatmul.bf16.gmra.mxu0 %v8323_v33  ;;  %v4460_v16 = vadd.f32 %v4459_v53, %v4371_v56 }
 0x725   : > { %4498 = vmatmul.bf16.gmra.mxu1 %v8324_v13  ;;  %4587 = vmatmul.bf16.gmra.mxu2 %v8325_v6 }
 0x726   : > { %4676 = vmatmul.bf16.gmra.mxu3 %v8326_v48  ;;  %v4633_v48 = vadd.f32 %v4632_v15, %v4544_v61 }
 0x728   : > { %v4548_v7 = vpop.f32.mrf.mxu2 }
 0x729   : > { %v4637_v35 = vpop.f32.mrf.mxu3  ;;  %v4372_v37 = vpop.f32.mrf.mxu0  ;;  %v4549_v30 = vadd.f32 %v4548_v7, %v4460_v16  ;;  %v4709_v7 = vmax.f32 %v4635_v22, 0.0 }
 0x72a   : > { %v4461_v42 = vpop.f32.mrf.mxu1  ;;  %v4373_v50 = vadd.f32 %v4372_v37, %v7697_v57  ;;  %v4630_v37 = vadd.f32 %v7786_v5, %v4541_v1 }
 0x72b   : > { %v4638_v29 = vadd.f32 %v4637_v35, %v4549_v30  ;;  %v4539_v35 = vadd.f32 %v7782_v43, %v4450_v18  ;;  %v4445_v43 = vadd.f32 %v7759_v45, %v4356_v17 }
 0x72c   : > { %v4462_v40 = vadd.f32 %v4461_v42, %v4373_v50  ;;  %v4707_v42 = vmax.f32 %v4633_v48, 0.0 }
 0x72d   : > { %v4711_v14 = vmax.f32 %v4638_v29, 0.0  ;;  %v4628_v16 = vadd.f32 %v7784_v23, %v4539_v35 }
 0x72f   : > { %v4703_v30 = vmax.f32 %v4628_v16, 0.0 }
 0x730   : > { %v4550_v44 = vpop.f32.mrf.mxu2 }
 0x731   : > { %v4551_v0 = vadd.f32 %v4550_v44, %v4462_v40  ;;  %v4639_v28 = vpop.f32.mrf.mxu3  ;;  %v4375_v19 = vpop.f32.mrf.mxu0  ;;  %v4705_v40 = vmax.f32 %v4630_v37, 0.0  ;;  %v4534_v44 = vadd.f32 %v7767_v12, %v4445_v43 }
 0x732   : > { %v4376_v31 = vadd.f32 %v4375_v19, %v7697_v57  ;;  %v4464_v36 = vpop.f32.mrf.mxu1 }
 0x733   : > { %v4640_v39 = vadd.f32 %v4639_v28, %v4551_v0  ;;  %v4623_v23 = vadd.f32 %v7769_v11, %v4534_v44  ;;  %v4695_v11 = vmax.f32 %v7753_v21, 0.0 }
 0x734   : > { %v4465_v26 = vadd.f32 %v4464_v36, %v4376_v31 }
 0x735   : > { %v4713_v3 = vmax.f32 %v4640_v39, 0.0  ;;  %v4699_v39 = vmax.f32 %v4623_v23, 0.0 }
 0x737   : > { %4779 = vmatpush.xpose.msrb.mxu1 %v4713_v3 }
 0x738   : > { %v4553_v47 = vpop.f32.mrf.mxu2 }
 0x739   : > { %v4554_v25 = vadd.f32 %v4553_v47, %v4465_v26  ;;  %v4642_v53 = vpop.f32.mrf.mxu3  ;;  %v4377_v33 = vpop.f32.mrf.mxu0  ;;  %v4697_v47 = vmax.f32 %v7761_v2, 0.0  ;;  %v4691_v2 = vmax.f32 %v7739_v58, 0.0 }
 0x73a   : > { %v4378_v13 = vadd.f32 %v4377_v33, %v7697_v57  ;;  %v4466_v63 = vpop.f32.mrf.mxu1 }
 0x73b   : > { %v7805_v6 = vadd.f32 %v4642_v53, %v4554_v25  ;;  %4780 = vmatpush.xpose.msrb.mxu1 %v4711_v14 }
 0x73c   : > { %v4467_v38 = vadd.f32 %v4466_v63, %v4378_v13  ;;  %v4693_v63 = vmax.f32 %v7744_v46, 0.0  ;;  %v4687_v46 = vmax.f32 %v7725_v41, 0.0 }
 0x73f   : > { %4781 = vmatpush.xpose.msrb.mxu1 %v4709_v7 }
 0x740   : > { %v4555_v49 = vpop.f32.mrf.mxu2 }
 0x741   : > { %v4556_v56 = vadd.f32 %v4555_v49, %v4467_v38  ;;  %v4644_v50 = vpop.f32.mrf.mxu3  ;;  %v4380_v59 = vpop.f32.mrf.mxu0  ;;  %v4689_v49 = vmax.f32 %v7730_v52, 0.0  ;;  %v4683_v52 = vmax.f32 %v7710_v4, 0.0 }
 0x742   : > { %v4381_v54 = vadd.f32 %v4380_v59, %v7697_v57  ;;  %v4469_v34 = vpop.f32.mrf.mxu1 }
 0x743   : > { %v7813_v15 = vadd.f32 %v4644_v50, %v4556_v56  ;;  %4782 = vmatpush.xpose.msrb.mxu1 %v4707_v42 }
 0x744   : > { %v4470_v24 = vadd.f32 %v4469_v34, %v4381_v54  ;;  %v4685_v34 = vmax.f32 %v7717_v27, 0.0 }
 0x747   : > { %4783 = vmatpush.xpose.msrb.mxu1 %v4705_v40 }
 0x748   : > { %v4558_v5 = vpop.f32.mrf.mxu2 }
 0x749   : > { %v4559_v0 = vadd.f32 %v4558_v5, %v4470_v24  ;;  %v4647_v28 = vpop.f32.mrf.mxu3  ;;  %v4382_v19 = vpop.f32.mrf.mxu0 }
 0x74a   : > { %v4383_v31 = vadd.f32 %v4382_v19, %v7697_v57  ;;  %v4471_v9 = vpop.f32.mrf.mxu1 }
 0x74b   : > { %v7819_v36 = vadd.f32 %v4647_v28, %v4559_v0  ;;  %4784 = vmatpush.xpose.msrb.mxu1 %v4703_v30 }
 0x74c   : > { %v4472_v55 = vadd.f32 %v4471_v9, %v4383_v31 }
 0x74f   : > { %4785 = vmatpush.xpose.msrb.mxu1 %v4701_v8 }
 0x750   : > { %v4560_v45 = vpop.f32.mrf.mxu2 }
 0x751   : > { %v4561_v26 = vadd.f32 %v4560_v45, %v4472_v55  ;;  %v4649_v12 = vpop.f32.mrf.mxu3  ;;  %v4385_v20 = vpop.f32.mrf.mxu0 }
 0x752   : > { %v4386_v29 = vadd.f32 %v4385_v20, %v7697_v57  ;;  %v4474_v3 = vpop.f32.mrf.mxu1 }
 0x753   : > { %v7824_v60 = vadd.f32 %v4649_v12, %v4561_v26  ;;  %4786 = vmatpush.xpose.msrb.mxu1 %v4699_v39 }
 0x754   : > { %v4475_v10 = vadd.f32 %v4474_v3, %v4386_v29 }
 0x757   : > { %4787 = vmatpush.xpose.msrb.mxu1 %v4697_v47 }
 0x758   : > { %v4563_v61 = vpop.f32.mrf.mxu2 }
 0x759   : > { %v4564_v51 = vadd.f32 %v4563_v61, %v4475_v10  ;;  %v4652_v22 = vpop.f32.mrf.mxu3  ;;  %v4387_v14 = vpop.f32.mrf.mxu0 }
 0x75a   : > { %v4388_v25 = vadd.f32 %v4387_v14, %v7697_v57  ;;  %v4476_v53 = vpop.f32.mrf.mxu1 }
 0x75b   : > { %v7829_v33 = vadd.f32 %v4652_v22, %v4564_v51  ;;  %4788 = vmatpush.xpose.msrb.mxu1 %v4695_v11 }
 0x75c   : > { %v4477_v13 = vadd.f32 %v4476_v53, %v4388_v25 }
 0x75f   : > { %4789 = vmatpush.xpose.msrb.mxu1 %v4693_v63 }
 0x760   : > { %v4565_v32 = vpop.f32.mrf.mxu2 }
 0x761   : > { %v4566_v62 = vadd.f32 %v4565_v32, %v4477_v13  ;;  %v4654_v38 = vpop.f32.mrf.mxu3  ;;  %v4390_v1 = vpop.f32.mrf.mxu0 }
 0x762   : > { %v4391_v21 = vadd.f32 %v4390_v1, %v7697_v57  ;;  %v4479_v48 = vpop.f32.mrf.mxu1 }
 0x763   : > { %v7834_v7 = vadd.f32 %v4654_v38, %v4566_v62  ;;  %4790 = vmatpush.xpose.msrb.mxu1 %v4691_v2 }
 0x764   : > { %v4480_v18 = vadd.f32 %v4479_v48, %v4391_v21 }
 0x767   : > { %4791 = vmatpush.xpose.msrb.mxu1 %v4689_v49 }
 0x768   : > { %v4568_v35 = vpop.f32.mrf.mxu2 }
 0x769   : > { %v4569_v37 = vadd.f32 %v4568_v35, %v4480_v18  ;;  %v4657_v42 = vpop.f32.mrf.mxu3  ;;  %v4392_v56 = vpop.f32.mrf.mxu0 }
 0x76a   : > { %v4393_v58 = vadd.f32 %v4392_v56, %v7697_v57  ;;  %v4481_v50 = vpop.f32.mrf.mxu1 }
 0x76b   : > { %v7839_v59 = vadd.f32 %v4657_v42, %v4569_v37  ;;  %4792 = vmatpush.xpose.msrb.mxu1 %v4687_v46 }
 0x76c   : > { %v4482_v54 = vadd.f32 %v4481_v50, %v4393_v58 }
 0x76f   : > { %4793 = vmatpush.xpose.msrb.mxu1 %v4685_v34 }
 0x770   : > { %v4570_v17 = vpop.f32.mrf.mxu2 }
 0x771   : > { %v4571_v24 = vadd.f32 %v4570_v17, %v4482_v54  ;;  %v4659_v16 = vpop.f32.mrf.mxu3  ;;  %v4395_v40 = vpop.f32.mrf.mxu0 }
 0x772   : > { %v4396_v41 = vadd.f32 %v4395_v40, %v7697_v57  ;;  %v4484_v43 = vpop.f32.mrf.mxu1 }
 0x773   : > { %v7844_v5 = vadd.f32 %v4659_v16, %v4571_v24  ;;  %4794 = vmatpush.xpose.msrb.mxu1 %v4683_v52 }
 0x774   : > { %v4485_v44 = vadd.f32 %v4484_v43, %v4396_v41 }
 0x778   : > { %v4573_v30 = vpop.f32.mrf.mxu2 }
 0x779   : > { %v4574_v0 = vadd.f32 %v4573_v30, %v4485_v44  ;;  %v4662_v28 = vpop.f32.mrf.mxu3  ;;  %v4397_v19 = vpop.f32.mrf.mxu0 }
 0x77a   : > { %v4398_v27 = vadd.f32 %v4397_v19, %v7697_v57  ;;  %v4486_v31 = vpop.f32.mrf.mxu1 }
 0x77b   : > { %v7847_v9 = vadd.f32 %v4662_v28, %v4574_v0 }
 0x77c   : > { %v4487_v4 = vadd.f32 %v4486_v31, %v4398_v27 }
 0x780   : > { %v4575_v55 = vpop.f32.mrf.mxu2 }
 0x781   : > { %v4576_v23 = vadd.f32 %v4575_v55, %v4487_v4  ;;  %v4664_v8 = vpop.f32.mrf.mxu3  ;;  %v4400_v45 = vpop.f32.mrf.mxu0 }
 0x782   : > { %v4489_v39 = vpop.f32.mrf.mxu1  ;;  %v4401_v44 = vadd.f32 %v4400_v45, %v7697_v57  ;;  %v4746_v45 = vld [vmem:[%s7906_s7] sm:$0x3] }
 0x783   : > { %v4665_v26 = vadd.f32 %v4664_v8, %v4576_v23 }
 0x784   : > { %v4490_v27 = vadd.f32 %v4489_v39, %v4401_v44  ;;  %v4755_v39 = vperm.slane %v4746_v45, 0 }
 0x786   : > { %4815 = vmatmul.f32.vlgmr.msrb.gmra.mxu2 %v4755_v39  ;;  %4775 = vmatmul.f32.vlgmr.msrb.gmra.mxu0 %v4755_v39 }
 0x788   : > { %v4578_v12 = vpop.f32.mrf.mxu2 }
 0x789   : > { %v4667_v20 = vpop.f32.mrf.mxu3  ;;  %v4402_v29 = vpop.f32.mrf.mxu0  ;;  %v4579_v31 = vadd.f32 %v4578_v12, %v4490_v27  ;;  %v4729_v12 = vmax.f32 %v7844_v5, 0.0  ;;  %v4721_v5 = vmax.f32 %v7824_v60, 0.0  ;;  %v4845_v60 = vlaneseq }
 0x78a   : > { %v4491_v3 = vpop.f32.mrf.mxu1  ;;  %v4403_v24 = vadd.f32 %v4402_v29, %v7697_v57 }
 0x78b   : > { %v4668_v23 = vadd.f32 %v4667_v20, %v4579_v31  ;;  %v4747_v20 = vld [vmem:[#allocation2] sm:$0x1]  ;;  %vm4847_vm2 = vcmp.lt.s32.totalorder %v4845_v60, 256 }
 0x78c   : > { %v4492_v30 = vadd.f32 %v4491_v3, %v4403_v24  ;;  %v4756_v3 = vperm.slane %v4746_v45, 1 }
 0x78d   : > { %v4735_v29 = vmax.f32 %v4668_v23, 0.0 }
 0x78e   : > { %4795 = vmatmul.f32.vlgmr.msrb.gmra.mxu1 %v4756_v3 }
 0x790   : > { %v4580_v10 = vpop.f32.mrf.mxu2 }
 0x791   : > { %v4669_v47 = vpop.f32.mrf.mxu3  ;;  %v4405_v61 = vpop.f32.mrf.mxu0  ;;  %v4581_v0 = vadd.f32 %v4580_v10, %v4492_v30  ;;  %v6351_v10 = vmov 0  }
 0x792   : > { %v4494_v11 = vpop.f32.mrf.mxu1  ;;  %v4406_v58 = vadd.f32 %v4405_v61, %v7697_v57  ;;  %v4733_v61 = vmax.f32 %v4665_v26, 0.0  ;;  %6211 = vset.pattern.permute.xlu0 %v6351_v10  ;;  %v4727_v26 = vmax.f32 %v7839_v59, 0.0  ;;  %v4715_v59 = vmax.f32 %v7805_v6, 0.0 }
 0x793   : > { %v4670_v4 = vadd.f32 %v4669_v47, %v4581_v0  ;;  %4750 = vperm.xlu0 %6211, %v4747_v20   ;;  %v4723_v47 = vmax.f32 %v7829_v33, 0.0 }
 0x794   : > { %v4495_v16 = vadd.f32 %v4494_v11, %v4406_v58  ;;  %v4719_v11 = vmax.f32 %v7819_v36, 0.0 }
 0x795   : > { %v4737_v8 = vmax.f32 %v4670_v4, 0.0 }
 0x798   : > { %v4583_v51 = vpop.f32.mrf.mxu2 }
 0x799   : > { %v4672_v22 = vpop.f32.mrf.mxu3  ;;  %v4407_v14 = vpop.f32.mrf.mxu0  ;;  %v4584_v40 = vadd.f32 %v4583_v51, %v4495_v16  ;;  %v4717_v51 = vmax.f32 %v7813_v15, 0.0 }
 0x79a   : > { %v4496_v25 = vpop.f32.mrf.mxu1  ;;  %v4408_v18 = vadd.f32 %v4407_v14, %v7697_v57 }
 0x79b   : > { %v4673_v28 = vadd.f32 %v4672_v22, %v4584_v40 }
 0x79c   : > { %v4497_v50 = vadd.f32 %v4496_v25, %v4408_v18 }
 0x79d   : > { %v4739_v55 = vmax.f32 %v4673_v28, 0.0 }
 0x7a0   : > { %v4585_v53 = vpop.f32.mrf.mxu2 }
 0x7a1   : > { %v4674_v13 = vpop.f32.mrf.mxu3  ;;  %v4410_v63 = vpop.f32.mrf.mxu0  ;;  %v4586_v34 = vadd.f32 %v4585_v53, %v4497_v50 }
 0x7a2   : > { %v4499_v32 = vpop.f32.mrf.mxu1  ;;  %v4411_v1 = vadd.f32 %v4410_v63, %v7697_v57 }
 0x7a3   : > { %v4675_v41 = vadd.f32 %v4674_v13, %v4586_v34 }
 0x7a4   : > { %v4500_v49 = vadd.f32 %v4499_v32, %v4411_v1 }
 0x7a5   : > { %v4741_v19 = vmax.f32 %v4675_v41, 0.0 }
 0x7a8   : > { %v4588_v2 = vpop.f32.mrf.mxu2 }
 0x7a9   : > { %v4677_v62 = vpop.f32.mrf.mxu3  ;;  %v4412_v38 = vpop.f32.mrf.mxu0  ;;  %v4589_v37 = vadd.f32 %v4588_v2, %v4500_v49 }
 0x7aa   : > { %v4413_v21 = vadd.f32 %v4412_v38, %v7697_v57  ;;  %v4501_v48 = vpop.f32.mrf.mxu1  ;;  %v4731_v57 = vmax.f32 %v7847_v9, 0.0  ;;  %v4725_v9 = vmax.f32 %v7834_v7, 0.0 }
 0x7ab   : > { %v4678_v17 = vadd.f32 %v4677_v62, %v4589_v37 }
 0x7ac   : > { %v4502_v35 = vadd.f32 %v4501_v48, %v4413_v21 }
 0x7ad   : > { %v4743_v43 = vmax.f32 %v4678_v17, 0.0 }
 0x7b0   : > { %v4590_v46 = vpop.f32.mrf.mxu2 }
 0x7b1   : > { %v4591_v42 = vadd.f32 %v4590_v46, %v4502_v35  ;;  %v4679_v56 = vpop.f32.mrf.mxu3 }
 0x7b3   : > { %v4680_v54 = vadd.f32 %v4679_v56, %v4591_v42 }
 0x7b5   : > { %v4745_v52 = vmax.f32 %v4680_v54, 0.0 }
 0x7b7   : > { %4819 = vmatpush.xpose.msrb.mxu3 %v4745_v52 }
 0x7bb   : > { %4820 = vmatpush.xpose.msrb.mxu3 %v4743_v43 }
 0x7bf   : > { %4821 = vmatpush.xpose.msrb.mxu3 %v4741_v19 }
 0x7c3   : > { %4822 = vmatpush.xpose.msrb.mxu3 %v4739_v55 }
 0x7c7   : > { %4823 = vmatpush.xpose.msrb.mxu3 %v4737_v8 }
 0x7cb   : > { %4824 = vmatpush.xpose.msrb.mxu3 %v4735_v29 }
 0x7cf   : > { %4825 = vmatpush.xpose.msrb.mxu3 %v4733_v61 }
 0x7d3   : > { %4826 = vmatpush.xpose.msrb.mxu3 %v4731_v57 }
 0x7d7   : > { %4827 = vmatpush.xpose.msrb.mxu3 %v4729_v12 }
 0x7db   : > { %4828 = vmatpush.xpose.msrb.mxu3 %v4727_v26 }
 0x7df   : > { %4829 = vmatpush.xpose.msrb.mxu3 %v4725_v9 }
 0x7e3   : > { %4830 = vmatpush.xpose.msrb.mxu3 %v4723_v47 }
 0x7e7   : > { %4831 = vmatpush.xpose.msrb.mxu3 %v4721_v5 }
 0x7eb   : > { %4832 = vmatpush.xpose.msrb.mxu3 %v4719_v11 }
 0x7ef   : > { %4833 = vmatpush.xpose.msrb.mxu3 %v4717_v51 }
 0x7f3   : > { %4834 = vmatpush.xpose.msrb.mxu3 %v4715_v59 }
 0x7f6   : > { %4835 = vmatmul.f32.vlgmr.msrb.gmra.mxu3 %v4756_v3 }
 0x803   : > { %v4776_v33 = vpop.f32.mrf.mxu0 }
 0x805   : > { %v4751_v22 = vpop.permute.xlu0 %4750 }
 0x806   : > { %v4753_v7 = vperm.slane %v4751_v22, 0 }
 0x808   : > { %v4777_v36 = vadd.f32 %v4776_v33, %v4753_v7 }
 0x809   : > { %v4816_v14 = vpop.f32.mrf.mxu2 }
 0x80a   : > { %v4817_v25 = vadd.f32 %v4816_v14, %v4753_v7 }
 0x80b   : > { %v4796_v53 = vpop.f32.mrf.mxu1 }
 0x80c   : > { %v4797_v63 = vadd.f32 %v4796_v53, %v4777_v36 }
 0x879   : > { %v4836_v15 = vpop.f32.mrf.mxu3 }
 0x87a   : > { %v4837_v13 = vadd.f32 %v4836_v15, %v4817_v25 }
 0x87c   : > { %v4841_v6 = vrot.slane %v4837_v13, 7 }
 0x87e   : > { %v4843_v32 = vsel %vm4842_vm1, %v4797_v63, %v4841_v6 }
 0x87f   : > { %4849 = vst.msk [vmem:[%s362_s28] sm:$0x3] %vm4847_vm2, %v4843_v32 }
 0x880   : > { %6300 = shalt.err (!%p6297_p8)
}
 0x881   : > { %6154 = dma.vmem_to_hbm [thread:$0]  (%p6443_p5), %s4864_s29, 32, %s4866_s30, %s4851_s8  }
 0x882 PF: > { %p6171_p9 = scmp.ge.s32.totalorder %s6343_s14, 2  ;;  %s4877_s23 = sand.u32 1, %s6331_s11  }
 0x883   : > { %s4878_s22 = scalar_lea.sflag [#allocation5], %s4877_s23 }
 0x884   : > { %p6164_p10 = pnand %p6171_p9, %p6447_p6 }
 0x886   : > { %p6165_p11 = pneg %p6164_p10 }
 0x888   : > { %6326 = dma.done.wait (%p6165_p11), %s4878_s22, 32  }
 0x889   : > { %6328 = vsyncadd (%p6165_p11), %s4878_s22, 4294967264  ;;  %p23_p12 = scmp.ge.s32.totalorder %s6430_s16, 4   ;;  %s8327_s11 = smov %s6335_s12 }
 0x88a   : > { %s8328_s12 = smov %s6339_s13  ;;  %s8329_s13 = smov %s6441_s19 }
 0x88b   : > { %s8330_s14 = smov %s6430_s16  ;;  %25 = sbr.rel (!%p23_p12) target bundleno = 8 (0x8), region = 100 }
 0x890   :  { %4884 = vsyncpa [#allocation4], 1 }
 0x891   :  { %4886 = vsyncpa [#allocation4 + $0x1], 1 }
 0x892   :  { %4887 = vsyncpa [#allocation7], 1 }
 0x893   :  { %4888 = vsyncpa [#allocation5], 1 }
 0x894   :  { %4890 = vsyncpa [#allocation5 + $0x1], 1 }

</bundles_post_ra>
